<compile_context>
chip_gen: v6e
topology: v6e:2x2x1
jax: 0.10.0
libtpu: 0.0.40
codegen_flags: <defaults>
</compile_context>

<pallas_src>
import numpy as np
import jax
import jax.numpy as jnp
from jax import lax
from jax.experimental import pallas as pl
from jax.experimental.pallas import tpu as pltpu

# ----------------------------- configuration --------------------------------
B_GRAPHS = 8                 # graphs per call
N_NODES = 16                 # atoms per graph
N_EDGES = 48                 # directed edges per graph
NUM_CHANNELS = (4, 8)        # (residue channels, atom channels)
NUM_LAYERS = (1, 2)          # num_layers[1] EGNN layers
EDGE_FEATURES = (0, 4)       # edge_features[1] = in_edge_nf

D_IN = NUM_CHANNELS[0] + NUM_CHANNELS[1]   # EGNN in_node_nf  = 12
HID = NUM_CHANNELS[1]                      # EGNN hidden_nf   = 8
D_OUT = NUM_CHANNELS[1]                    # EGNN out_node_nf = 8
D_OUT_PAD = 128                            # lane-dense output width
L = NUM_LAYERS[1]                          # number of E_GCL layers
E_IN = EDGE_FEATURES[1]                    # edge attr dim

# Batch folding: graphs within a block are stacked block-diagonally.
GRAPHS_PER_BLOCK = 4                       # 2 parallel blocks (v7x: one per TC)
NUM_BLOCKS = B_GRAPHS // GRAPHS_PER_BLOCK
GN = GRAPHS_PER_BLOCK * N_NODES            # node rows per block  = 64
GE = GRAPHS_PER_BLOCK * N_EDGES            # edge rows per block  = 192

X_OFF = D_IN                               # xyz columns inside the node slab
NODE_SLAB_W = D_IN + 3 + 1                 # [res | atm | xyz | pad] = 16

# Row layout of the packed per-layer weight slab (rows = contraction dims).
_W_SECTIONS = (("ew1s", HID), ("ew1t", HID), ("ew1r", 1), ("ew1a", E_IN),
               ("ew2", HID), ("nw1h", HID), ("nw1a", HID), ("nw2", HID),
               ("cw1", HID), ("cw2t", 1))
_W_OFF = {}
_off = 0
for _name, _n in _W_SECTIONS:
    _W_OFF[_name] = (_off, _off + _n)
    _off += _n
W_ROWS = _off                              # 62
N_BIAS = 1 + 5 * L                         # bi + (eb1,eb2,nb1,nb2,cb1) per layer


def _silu(x):
    # exp and the approximate reciprocal both issue to the EUP slot.
    return x * pl.reciprocal(1.0 + jnp.exp(-x), approx=True)


# ------------------------------- the kernel ---------------------------------
def _atomgraph_egnn_kernel(node_ref, eattr_ref, idxg_ref, idxs_ref,
                           wi_ref, wl_ref, bias_ref, wo_ref, bo_ref,
                           h_out_ref):
    f32, bf16 = jnp.float32, jnp.bfloat16

    node = node_ref[...]                               # (GN, 16) f32
    coord = node[:, X_OFF:X_OFF + 3]                   # (GN, 3)  f32
    eattr_bf = eattr_ref[...].astype(bf16)             # (GE, E_IN)

    # ---- block-diagonal graph one-hots (built once, exact in bf16) ----
    idxg = idxg_ref[...]                               # (GE, 2) int32 [row|col]
    row_e = idxg[:, 0:1]                               # (GE, 1)
    col_e = idxg[:, 1:2]
    e_iota = lax.broadcasted_iota(jnp.int32, (GE, GN), 1)
    row_oh_f = (row_e == e_iota).astype(f32)           # gather h_i
    col_oh_f = (col_e == e_iota).astype(f32)           # gather h_j
    row_oh = row_oh_f.astype(bf16)
    col_oh = col_oh_f.astype(bf16)
    diff_oh = (row_oh_f - col_oh_f).astype(bf16)       # coord[i]-coord[j]

    n_iota = lax.broadcasted_iota(jnp.int32, (GN, GE), 0)
    scat_f = (n_iota == idxs_ref[...]).astype(f32)     # (GN, GE) scatter-to-i
    deg = jnp.sum(scat_f, axis=1, keepdims=True)       # (GN, 1)
    inv_deg = 1.0 / jnp.maximum(deg, 1.0)              # exact, loop-invariant
    scatter_oh = scat_f.astype(bf16)

    # ---- embedding_in: node slab already holds [res|atm|xyz|pad]; wi_ext is
    #      zero on the xyz/pad rows so no concat/split is needed ----
    h = (jnp.dot(node.astype(bf16), wi_ref[...], preferred_element_type=f32)
         + bias_ref[0:1, :])

    for l in range(L):                                 # static unroll (L = 2)
        def w(name):
            o0, o1 = _W_OFF[name]
            return wl_ref[l, o0:o1, :]

        def bias_row(j):
            r = 1 + 5 * l + j
            return bias_ref[r:r + 1, :]

        eb1, eb2 = bias_row(0), bias_row(1)
        nb1, nb2, cb1 = bias_row(2), bias_row(3), bias_row(4)

        h_bf = h.astype(bf16)

        # ---- coord2radial: hi/lo split keeps coord[i]-coord[j] f32-exact ----
        c_hi = coord.astype(bf16)
        c_lo = (coord - c_hi.astype(f32)).astype(bf16)
        coord_diff = (jnp.dot(diff_oh, c_hi, preferred_element_type=f32)
                      + jnp.dot(diff_oh, c_lo, preferred_element_type=f32))
        radial = jnp.sum(coord_diff * coord_diff, axis=1, keepdims=True)

        # ---- edge_model: edge_mlp(cat[h_i, h_j, radial, e_attr]) ----
        hs = jnp.dot(h_bf, w("ew1s"), preferred_element_type=f32)     # (GN,H)
        ht = jnp.dot(h_bf, w("ew1t"), preferred_element_type=f32)
        pre = (jnp.dot(row_oh, hs.astype(bf16), preferred_element_type=f32)
               + jnp.dot(col_oh, ht.astype(bf16), preferred_element_type=f32)
               + radial * w("ew1r").astype(f32)
               + jnp.dot(eattr_bf, w("ew1a"), preferred_element_type=f32)
               + eb1)
        m = _silu(pre)
        m = _silu(jnp.dot(m.astype(bf16), w("ew2"),
                          preferred_element_type=f32) + eb2)
        m_bf = m.astype(bf16)

        # ---- coord_model (coords_agg='mean') ----
        cmid = _silu(jnp.dot(m_bf, w("cw1"), preferred_element_type=f32) + cb1)
        cw = jnp.sum(cmid * w("cw2t").astype(f32), axis=1, keepdims=True)
        trans = coord_diff * cw                                        # (GE,3)
        coord_sum = jnp.dot(scatter_oh, trans.astype(bf16),
                            preferred_element_type=f32)               # (GN,3)
        coord = coord + coord_sum * inv_deg
        # NOTE: AtomGraph.forward discards the EGNN coordinates; coord only
        # feeds the next layer's radial term, so it stays kernel-internal.

        # ---- node_model (residual): node_mlp(cat[h, segment_sum(m)]) ----
        agg = jnp.dot(scatter_oh, m_bf, preferred_element_type=f32)    # (GN,H)
        nmid = _silu(jnp.dot(h_bf, w("nw1h"), preferred_element_type=f32)
                     + jnp.dot(agg.astype(bf16), w("nw1a"),
                               preferred_element_type=f32)
                     + nb1)
        h = h + (jnp.dot(nmid.astype(bf16), w("nw2"),
                         preferred_element_type=f32) + nb2)

    # ---- embedding_out: 128-lane padded slab -> single unmasked store ----
    h_out_ref[...] = (jnp.dot(h.astype(bf16), wo_ref[...],
                              preferred_element_type=f32) + bo_ref[...])


# ----------------------------- weight packing --------------------------------
def _pack_weights(p):
    f32, bf16 = jnp.float32, jnp.bfloat16
    ew1, nw1 = p["ew1_full"], p["nw1_full"]
    sections = {
        "ew1s": ew1[:, :HID, :],
        "ew1t": ew1[:, HID:2 * HID, :],
        "ew1r": ew1[:, 2 * HID:2 * HID + 1, :],
        "ew1a": ew1[:, 2 * HID + 1:, :],
        "ew2": p["ew2"],
        "nw1h": nw1[:, :HID, :],
        "nw1a": nw1[:, HID:, :],
        "nw2": p["nw2"],
        "cw1": p["cw1"],
        "cw2t": jnp.transpose(p["cw2"], (0, 2, 1)),
    }
    w_layers = jnp.concatenate([sections[name] for name, _ in _W_SECTIONS],
                               axis=1).astype(bf16)          # (L, W_ROWS, HID)

    bias_rows = [p["bi"]]
    for l in range(L):
        bias_rows += [p["eb1"][l], p["eb2"][l], p["nb1"][l],
                      p["nb2"][l], p["cb1"][l]]
    bias_slab = jnp.concatenate(bias_rows, axis=0).astype(f32)  # (N_BIAS, HID)

    wi_ext = jnp.concatenate(
        [p["wi"], jnp.zeros((NODE_SLAB_W - D_IN, HID), f32)], axis=0
    ).astype(bf16)                                              # (16, HID)
    wo_pad = jnp.pad(p["wo"], ((0, 0), (0, D_OUT_PAD - D_OUT))).astype(bf16)
    bo_pad = jnp.pad(p["bo"], ((0, 0), (0, D_OUT_PAD - D_OUT))).astype(f32)
    return wi_ext, w_layers, bias_slab, wo_pad, bo_pad


# ------------------------------- the wrapper ---------------------------------
def atom_graph_forward(residue_feature, atom_feature, coords, row, col,
                       edge_attr, params):
    """AtomGraph.forward (egnn backbone) for a batch of B graphs."""
    f32 = jnp.float32
    B, N, _ = residue_feature.shape
    E = row.shape[1]
    assert (B, N, E) == (B_GRAPHS, N_NODES, N_EDGES)

    # --- per-block data packed into 4 DMA slabs ---
    node_slab = jnp.concatenate(
        [residue_feature.astype(f32), atom_feature.astype(f32),
         coords.astype(f32), jnp.zeros((B, N, 1), f32)], axis=-1,
    ).reshape(NUM_BLOCKS, GN, NODE_SLAB_W)
    eattr_blk = edge_attr.astype(f32).reshape(NUM_BLOCKS, GE, E_IN)

    # Block-diagonal indices: graph g inside a block owns node rows
    # [g*N, (g+1)*N) and edge rows [g*E, (g+1)*E).
    g_off = (jnp.arange(B, dtype=jnp.int32) % GRAPHS_PER_BLOCK)[:, None] * N
    row_g = row.astype(jnp.int32) + g_off
    col_g = col.astype(jnp.int32) + g_off
    idx_gather = jnp.stack([row_g, col_g], axis=-1).reshape(NUM_BLOCKS, GE, 2)
    idx_scatter = row_g.reshape(NUM_BLOCKS, 1, GE)

    wi_ext, w_layers, bias_slab, wo_pad, bo_pad = _pack_weights(params)

    args = (node_slab, eattr_blk, idx_gather, idx_scatter,
            wi_ext, w_layers, bias_slab, wo_pad, bo_pad)

    def per_block(shape):
        nd = len(shape)
        return pl.BlockSpec((None,) + shape,
                            lambda blk, _nd=nd: (blk,) + (0,) * _nd)

    def shared(a):
        nd = a.ndim
        return pl.BlockSpec(a.shape, lambda blk, _nd=nd: (0,) * _nd)

    in_specs = ([per_block((GN, NODE_SLAB_W)), per_block((GE, E_IN)),
                 per_block((GE, 2)), per_block((1, GE))]
                + [shared(a) for a in args[4:]])

    out = pl.pallas_call(
        _atomgraph_egnn_kernel,
        out_shape=jax.ShapeDtypeStruct((NUM_BLOCKS, GN, D_OUT_PAD), f32),
        grid=(NUM_BLOCKS,),
        in_specs=in_specs,
        out_specs=pl.BlockSpec((None, GN, D_OUT_PAD), lambda blk: (blk, 0, 0)),
        compiler_params=pltpu.CompilerParams(
            dimension_semantics=("parallel",)),
    )(*args)

    # Consumers that accept the 128-lane padded slab can skip this slice copy;
    # keep the module's (B, N, D_OUT) contract here.
    return out.reshape(B, N, D_OUT_PAD)[:, :, :D_OUT]


# --------------------------- deterministic params ----------------------------
def init_params(key):
    scale = 0.2
    ks = iter(jax.random.split(key, 32))

    def w(shape):
        return (scale * jax.random.normal(next(ks), shape)).astype(jnp.float32)

    edge_in = 2 * HID + 1 + E_IN   # cat([h_i, h_j, radial, edge_attr])
    return {
        "wi": w((D_IN, HID)), "bi": w((1, HID)),
        "ew1_full": w((L, edge_in, HID)), "eb1": w((L, 1, HID)),
        "ew2": w((L, HID, HID)), "eb2": w((L, 1, HID)),
        "nw1_full": w((L, 2 * HID, HID)), "nb1": w((L, 1, HID)),
        "nw2": w((L, HID, HID)), "nb2": w((L, 1, HID)),
        "cw1": w((L, HID, HID)), "cb1": w((L, 1, HID)),
        "cw2": w((L, HID, 1)),
        "wo": w((HID, D_OUT)), "bo": w((1, D_OUT)),
    }


# ------------------------------ pure-JAX reference ---------------------------
def atom_graph_reference(residue_feature, atom_feature, coords, row, col,
                         edge_attr, p):
    """All-f32 reference (unbatched EGNN math, looped over the batch)."""
    def one(res, atm, x, r, c, ea):
        h = jnp.concatenate([res, atm], axis=1).astype(jnp.float32)
        h = h @ p["wi"] + p["bi"]
        coord = x.astype(jnp.float32)
        ea = ea.astype(jnp.float32)
        for l in range(L):
            coord_diff = coord[r] - coord[c]
            radial = jnp.sum(coord_diff ** 2, axis=1, keepdims=True)
            e_in = jnp.concatenate([h[r], h[c], radial, ea], axis=1)
            m = jax.nn.silu(e_in @ p["ew1_full"][l] + p["eb1"][l])
            m = jax.nn.silu(m @ p["ew2"][l] + p["eb2"][l])
            cmid = jax.nn.silu(m @ p["cw1"][l] + p["cb1"][l])
            trans = coord_diff * (cmid @ p["cw2"][l])
            csum = jnp.zeros((N_NODES, 3), jnp.float32).at[r].add(trans)
            cnt = jnp.zeros((N_NODES, 1), jnp.float32).at[r].add(1.0)
            coord = coord + csum / jnp.maximum(cnt, 1.0)
            agg = jnp.zeros((N_NODES, HID), jnp.float32).at[r].add(m)
            n_in = jnp.concatenate([h, agg], axis=1)
            h = h + (jax.nn.silu(n_in @ p["nw1_full"][l] + p["nb1"][l])
                     @ p["nw2"][l] + p["nb2"][l])
        return h @ p["wo"] + p["bo"]

    return jnp.stack([one(residue_feature[b], atom_feature[b], coords[b],
                          row[b], col[b], edge_attr[b])
                      for b in range(residue_feature.shape[0])])


# ----------------------------------- main ------------------------------------
if __name__ == "__main__":
    key = jax.random.PRNGKey(0)
    k_res, k_atm, k_x, k_row, k_col, k_ea, k_par = jax.random.split(key, 7)

    residue_feature = jax.random.normal(
        k_res, (B_GRAPHS, N_NODES, NUM_CHANNELS[0]), jnp.float32)
    atom_feature = jax.random.normal(
        k_atm, (B_GRAPHS, N_NODES, NUM_CHANNELS[1]), jnp.float32)
    coords = jax.random.normal(k_x, (B_GRAPHS, N_NODES, 3), jnp.float32)
    row = jax.random.randint(k_row, (B_GRAPHS, N_EDGES), 0, N_NODES, jnp.int32)
    col = jax.random.randint(k_col, (B_GRAPHS, N_EDGES), 0, N_NODES, jnp.int32)
    edge_attr = jax.random.normal(k_ea, (B_GRAPHS, N_EDGES, E_IN), jnp.float32)

    params = init_params(k_par)

    out = atom_graph_forward(residue_feature, atom_feature, coords, row, col,
                             edge_attr, params)
    out = jax.block_until_ready(out)

    ref = jax.block_until_ready(
        atom_graph_reference(residue_feature, atom_feature, coords, row, col,
                             edge_attr, params))

    assert out.shape == (B_GRAPHS, N_NODES, D_OUT) and out.dtype == jnp.float32
    # Matmuls run with bf16 operands (f32 accumulation) on the MXU; the
    # coord-diff path is f32-exact via the hi/lo split.  3e-2 tolerance
    # absorbs the remaining bf16 rounding vs. the all-f32 reference.
    assert np.allclose(np.asarray(out), np.asarray(ref), rtol=3e-2, atol=3e-2), (
        "mismatch vs reference: max abs diff "
        f"{np.max(np.abs(np.asarray(out) - np.asarray(ref)))}")
    print("KERNEL_OK")
</pallas_src>

<mosaic_0001>
module attributes {stable_mosaic.version = 11 : i64} {
  func.func @_atomgraph_egnn_kernel(%arg0: i32, %arg1: memref<1x64x16xf32, #tpu.memory_space<vmem>>, %arg2: memref<1x192x4xf32, #tpu.memory_space<vmem>>, %arg3: memref<1x192x2xi32, #tpu.memory_space<vmem>>, %arg4: memref<1x1x192xi32, #tpu.memory_space<vmem>>, %arg5: memref<16x8xbf16, #tpu.memory_space<vmem>>, %arg6: memref<2x62x8xbf16, #tpu.memory_space<vmem>>, %arg7: memref<11x8xf32, #tpu.memory_space<vmem>>, %arg8: memref<8x128xbf16, #tpu.memory_space<vmem>>, %arg9: memref<1x128xf32, #tpu.memory_space<vmem>>, %arg10: memref<1x64x128xf32, #tpu.memory_space<vmem>>) attributes {dimension_semantics = [#tpu.dimension_semantics<parallel>], iteration_bounds = array<i64: 2>, scalar_prefetch = 0 : i64, scratch_operands = 0 : i64, tpu.core_type = #tpu.core_type<tc>, window_params = [{transform_indices = @transform_0, window_bounds = array<i64: 1, 64, 16>}, {transform_indices = @transform_1, window_bounds = array<i64: 1, 192, 4>}, {transform_indices = @transform_2, window_bounds = array<i64: 1, 192, 2>}, {transform_indices = @transform_3, window_bounds = array<i64: 1, 1, 192>}, {pipeline_mode = #tpu.pipeline_mode<synchronous>, transform_indices = @transform_4, window_bounds = array<i64: 16, 8>}, {pipeline_mode = #tpu.pipeline_mode<synchronous>, transform_indices = @transform_5, window_bounds = array<i64: 2, 62, 8>}, {pipeline_mode = #tpu.pipeline_mode<synchronous>, transform_indices = @transform_6, window_bounds = array<i64: 11, 8>}, {pipeline_mode = #tpu.pipeline_mode<synchronous>, transform_indices = @transform_7, window_bounds = array<i64: 8, 128>}, {pipeline_mode = #tpu.pipeline_mode<synchronous>, transform_indices = @transform_8, window_bounds = array<i64: 1, 128>}, {transform_indices = @transform_9, window_bounds = array<i64: 1, 64, 128>}]} {
    %c0 = arith.constant 0 : index
    %c0_0 = arith.constant 0 : index
    %c0_1 = arith.constant 0 : index
    %0 = vector.load %arg1[%c0, %c0_0, %c0_1] : memref<1x64x16xf32, #tpu.memory_space<vmem>>, vector<1x64x16xf32>
    %1 = vector.shape_cast %0 : vector<1x64x16xf32> to vector<64x16xf32>
    %2 = vector.extract_strided_slice %1 {offsets = [0, 12], sizes = [64, 3], strides = [1, 1]} : vector<64x16xf32> to vector<64x3xf32>
    %c0_2 = arith.constant 0 : index
    %c0_3 = arith.constant 0 : index
    %c0_4 = arith.constant 0 : index
    %3 = vector.load %arg2[%c0_2, %c0_3, %c0_4] : memref<1x192x4xf32, #tpu.memory_space<vmem>>, vector<1x192x4xf32>
    %4 = vector.shape_cast %3 : vector<1x192x4xf32> to vector<192x4xf32>
    %5 = arith.truncf %4 : vector<192x4xf32> to vector<192x4xbf16>
    %c0_5 = arith.constant 0 : index
    %c0_6 = arith.constant 0 : index
    %c0_7 = arith.constant 0 : index
    %6 = vector.load %arg3[%c0_5, %c0_6, %c0_7] : memref<1x192x2xi32, #tpu.memory_space<vmem>>, vector<1x192x2xi32>
    %7 = vector.shape_cast %6 : vector<1x192x2xi32> to vector<192x2xi32>
    %8 = vector.extract_strided_slice %7 {offsets = [0, 0], sizes = [192, 1], strides = [1, 1]} : vector<192x2xi32> to vector<192x1xi32>
    %9 = vector.extract_strided_slice %7 {offsets = [0, 1], sizes = [192, 1], strides = [1, 1]} : vector<192x2xi32> to vector<192x1xi32>
    %10 = tpu.iota {dimensions = array<i32: 1>} : vector<192x64xi32>
    %11 = vector.broadcast %8 : vector<192x1xi32> to vector<192x64xi32>
    %12 = arith.cmpi eq, %11, %10 : vector<192x64xi32>
    %13 = arith.extui %12 : vector<192x64xi1> to vector<192x64xi32>
    %14 = arith.sitofp %13 : vector<192x64xi32> to vector<192x64xf32>
    %15 = vector.broadcast %9 : vector<192x1xi32> to vector<192x64xi32>
    %16 = arith.cmpi eq, %15, %10 : vector<192x64xi32>
    %17 = arith.extui %16 : vector<192x64xi1> to vector<192x64xi32>
    %18 = arith.sitofp %17 : vector<192x64xi32> to vector<192x64xf32>
    %19 = arith.truncf %14 : vector<192x64xf32> to vector<192x64xbf16>
    %20 = arith.truncf %18 : vector<192x64xf32> to vector<192x64xbf16>
    %21 = arith.subf %14, %18 : vector<192x64xf32>
    %22 = arith.truncf %21 : vector<192x64xf32> to vector<192x64xbf16>
    %23 = tpu.iota {dimensions = array<i32: 0>} : vector<64x192xi32>
    %c0_8 = arith.constant 0 : index
    %c0_9 = arith.constant 0 : index
    %c0_10 = arith.constant 0 : index
    %24 = vector.load %arg4[%c0_8, %c0_9, %c0_10] : memref<1x1x192xi32, #tpu.memory_space<vmem>>, vector<1x1x192xi32>
    %25 = vector.shape_cast %24 : vector<1x1x192xi32> to vector<1x192xi32>
    %26 = vector.broadcast %25 : vector<1x192xi32> to vector<64x192xi32>
    %27 = arith.cmpi eq, %23, %26 : vector<64x192xi32>
    %28 = arith.extui %27 : vector<64x192xi1> to vector<64x192xi32>
    %29 = arith.sitofp %28 : vector<64x192xi32> to vector<64x192xf32>
    %cst = arith.constant dense<0.000000e+00> : vector<64xf32>
    %30 = vector.multi_reduction <add>, %29, %cst [1] : vector<64x192xf32> to vector<64xf32>
    %31 = vector.shape_cast %30 : vector<64xf32> to vector<64x1xf32>
    %cst_11 = arith.constant 1.000000e+00 : f32
    %32 = vector.broadcast %cst_11 : f32 to vector<64x1xf32>
    %33 = arith.maximumf %31, %32 : vector<64x1xf32>
    %cst_12 = arith.constant 1.000000e+00 : f32
    %34 = vector.broadcast %cst_12 : f32 to vector<64x1xf32>
    %35 = arith.divf %34, %33 : vector<64x1xf32>
    %36 = arith.truncf %29 : vector<64x192xf32> to vector<64x192xbf16>
    %37 = arith.truncf %1 : vector<64x16xf32> to vector<64x16xbf16>
    %c0_13 = arith.constant 0 : index
    %c0_14 = arith.constant 0 : index
    %38 = vector.load %arg5[%c0_13, %c0_14] : memref<16x8xbf16, #tpu.memory_space<vmem>>, vector<16x8xbf16>
    %cst_15 = arith.constant dense<0.000000e+00> : vector<64x8xf32>
    %39 = tpu.matmul %37, %38, %cst_15 {dimension_numbers = #tpu.dot_dimension_numbers<[1], [0], [0], [1], [0, 0, 1, 1], [], []>} : vector<64x16xbf16>, vector<16x8xbf16>, vector<64x8xf32> -> vector<64x8xf32>
    %c0_16 = arith.constant 0 : index
    %c0_17 = arith.constant 0 : index
    %40 = vector.load %arg7[%c0_16, %c0_17] : memref<11x8xf32, #tpu.memory_space<vmem>>, vector<1x8xf32>
    %41 = vector.broadcast %40 : vector<1x8xf32> to vector<64x8xf32>
    %42 = arith.addf %39, %41 : vector<64x8xf32>
    %c1 = arith.constant 1 : index
    %c0_18 = arith.constant 0 : index
    %43 = vector.load %arg7[%c1, %c0_18] : memref<11x8xf32, #tpu.memory_space<vmem>>, vector<1x8xf32>
    %c2 = arith.constant 2 : index
    %c0_19 = arith.constant 0 : index
    %44 = vector.load %arg7[%c2, %c0_19] : memref<11x8xf32, #tpu.memory_space<vmem>>, vector<1x8xf32>
    %c3 = arith.constant 3 : index
    %c0_20 = arith.constant 0 : index
    %45 = vector.load %arg7[%c3, %c0_20] : memref<11x8xf32, #tpu.memory_space<vmem>>, vector<1x8xf32>
    %c4 = arith.constant 4 : index
    %c0_21 = arith.constant 0 : index
    %46 = vector.load %arg7[%c4, %c0_21] : memref<11x8xf32, #tpu.memory_space<vmem>>, vector<1x8xf32>
    %c5 = arith.constant 5 : index
    %c0_22 = arith.constant 0 : index
    %47 = vector.load %arg7[%c5, %c0_22] : memref<11x8xf32, #tpu.memory_space<vmem>>, vector<1x8xf32>
    %48 = arith.truncf %42 : vector<64x8xf32> to vector<64x8xbf16>
    %49 = arith.truncf %2 : vector<64x3xf32> to vector<64x3xbf16>
    %50 = arith.extf %49 : vector<64x3xbf16> to vector<64x3xf32>
    %51 = arith.subf %2, %50 : vector<64x3xf32>
    %52 = arith.truncf %51 : vector<64x3xf32> to vector<64x3xbf16>
    %cst_23 = arith.constant dense<0.000000e+00> : vector<192x3xf32>
    %53 = tpu.matmul %22, %49, %cst_23 {dimension_numbers = #tpu.dot_dimension_numbers<[1], [0], [0], [1], [0, 0, 1, 1], [], []>} : vector<192x64xbf16>, vector<64x3xbf16>, vector<192x3xf32> -> vector<192x3xf32>
    %cst_24 = arith.constant dense<0.000000e+00> : vector<192x3xf32>
    %54 = tpu.matmul %22, %52, %cst_24 {dimension_numbers = #tpu.dot_dimension_numbers<[1], [0], [0], [1], [0, 0, 1, 1], [], []>} : vector<192x64xbf16>, vector<64x3xbf16>, vector<192x3xf32> -> vector<192x3xf32>
    %55 = arith.addf %53, %54 : vector<192x3xf32>
    %56 = arith.mulf %55, %55 : vector<192x3xf32>
    %cst_25 = arith.constant dense<0.000000e+00> : vector<192xf32>
    %57 = vector.multi_reduction <add>, %56, %cst_25 [1] : vector<192x3xf32> to vector<192xf32>
    %58 = vector.shape_cast %57 : vector<192xf32> to vector<192x1xf32>
    %c0_26 = arith.constant 0 : index
    %c0_27 = arith.constant 0 : index
    %c0_28 = arith.constant 0 : index
    %59 = vector.load %arg6[%c0_26, %c0_27, %c0_28] : memref<2x62x8xbf16, #tpu.memory_space<vmem>>, vector<1x8x8xbf16>
    %60 = vector.shape_cast %59 : vector<1x8x8xbf16> to vector<8x8xbf16>
    %cst_29 = arith.constant dense<0.000000e+00> : vector<64x8xf32>
    %61 = tpu.matmul %48, %60, %cst_29 {dimension_numbers = #tpu.dot_dimension_numbers<[1], [0], [0], [1], [0, 0, 1, 1], [], []>} : vector<64x8xbf16>, vector<8x8xbf16>, vector<64x8xf32> -> vector<64x8xf32>
    %c0_30 = arith.constant 0 : index
    %c8 = arith.constant 8 : index
    %c0_31 = arith.constant 0 : index
    %62 = vector.load %arg6[%c0_30, %c8, %c0_31] : memref<2x62x8xbf16, #tpu.memory_space<vmem>>, vector<1x8x8xbf16>
    %63 = vector.shape_cast %62 : vector<1x8x8xbf16> to vector<8x8xbf16>
    %cst_32 = arith.constant dense<0.000000e+00> : vector<64x8xf32>
    %64 = tpu.matmul %48, %63, %cst_32 {dimension_numbers = #tpu.dot_dimension_numbers<[1], [0], [0], [1], [0, 0, 1, 1], [], []>} : vector<64x8xbf16>, vector<8x8xbf16>, vector<64x8xf32> -> vector<64x8xf32>
    %65 = arith.truncf %61 : vector<64x8xf32> to vector<64x8xbf16>
    %cst_33 = arith.constant dense<0.000000e+00> : vector<192x8xf32>
    %66 = tpu.matmul %19, %65, %cst_33 {dimension_numbers = #tpu.dot_dimension_numbers<[1], [0], [0], [1], [0, 0, 1, 1], [], []>} : vector<192x64xbf16>, vector<64x8xbf16>, vector<192x8xf32> -> vector<192x8xf32>
    %67 = arith.truncf %64 : vector<64x8xf32> to vector<64x8xbf16>
    %cst_34 = arith.constant dense<0.000000e+00> : vector<192x8xf32>
    %68 = tpu.matmul %20, %67, %cst_34 {dimension_numbers = #tpu.dot_dimension_numbers<[1], [0], [0], [1], [0, 0, 1, 1], [], []>} : vector<192x64xbf16>, vector<64x8xbf16>, vector<192x8xf32> -> vector<192x8xf32>
    %69 = arith.addf %66, %68 : vector<192x8xf32>
    %c0_35 = arith.constant 0 : index
    %c16 = arith.constant 16 : index
    %c0_36 = arith.constant 0 : index
    %70 = vector.load %arg6[%c0_35, %c16, %c0_36] : memref<2x62x8xbf16, #tpu.memory_space<vmem>>, vector<1x1x8xbf16>
    %71 = vector.shape_cast %70 : vector<1x1x8xbf16> to vector<1x8xbf16>
    %72 = arith.extf %71 : vector<1x8xbf16> to vector<1x8xf32>
    %73 = vector.broadcast %58 : vector<192x1xf32> to vector<192x8xf32>
    %74 = vector.broadcast %72 : vector<1x8xf32> to vector<192x8xf32>
    %75 = arith.mulf %73, %74 : vector<192x8xf32>
    %76 = arith.addf %69, %75 : vector<192x8xf32>
    %c0_37 = arith.constant 0 : index
    %c17 = arith.constant 17 : index
    %c0_38 = arith.constant 0 : index
    %77 = vector.load %arg6[%c0_37, %c17, %c0_38] : memref<2x62x8xbf16, #tpu.memory_space<vmem>>, vector<1x4x8xbf16>
    %78 = vector.shape_cast %77 : vector<1x4x8xbf16> to vector<4x8xbf16>
    %cst_39 = arith.constant dense<0.000000e+00> : vector<192x8xf32>
    %79 = tpu.matmul %5, %78, %cst_39 {dimension_numbers = #tpu.dot_dimension_numbers<[1], [0], [0], [1], [0, 0, 1, 1], [], []>} : vector<192x4xbf16>, vector<4x8xbf16>, vector<192x8xf32> -> vector<192x8xf32>
    %80 = arith.addf %76, %79 : vector<192x8xf32>
    %81 = vector.broadcast %43 : vector<1x8xf32> to vector<192x8xf32>
    %82 = arith.addf %80, %81 : vector<192x8xf32>
    %cst_40 = arith.constant 0.000000e+00 : f32
    %83 = vector.broadcast %cst_40 : f32 to vector<192x8xf32>
    %84 = arith.subf %83, %82 : vector<192x8xf32>
    %85 = math.exp %84 : vector<192x8xf32>
    %cst_41 = arith.constant 1.000000e+00 : f32
    %86 = vector.broadcast %cst_41 : f32 to vector<192x8xf32>
    %87 = arith.addf %86, %85 : vector<192x8xf32>
    %88 = tpu.reciprocal %87 {approx = true} : vector<192x8xf32> -> vector<192x8xf32>
    %89 = arith.mulf %82, %88 : vector<192x8xf32>
    %90 = arith.truncf %89 : vector<192x8xf32> to vector<192x8xbf16>
    %c0_42 = arith.constant 0 : index
    %c21 = arith.constant 21 : index
    %c0_43 = arith.constant 0 : index
    %91 = vector.load %arg6[%c0_42, %c21, %c0_43] : memref<2x62x8xbf16, #tpu.memory_space<vmem>>, vector<1x8x8xbf16>
    %92 = vector.shape_cast %91 : vector<1x8x8xbf16> to vector<8x8xbf16>
    %cst_44 = arith.constant dense<0.000000e+00> : vector<192x8xf32>
    %93 = tpu.matmul %90, %92, %cst_44 {dimension_numbers = #tpu.dot_dimension_numbers<[1], [0], [0], [1], [0, 0, 1, 1], [], []>} : vector<192x8xbf16>, vector<8x8xbf16>, vector<192x8xf32> -> vector<192x8xf32>
    %94 = vector.broadcast %44 : vector<1x8xf32> to vector<192x8xf32>
    %95 = arith.addf %93, %94 : vector<192x8xf32>
    %cst_45 = arith.constant 0.000000e+00 : f32
    %96 = vector.broadcast %cst_45 : f32 to vector<192x8xf32>
    %97 = arith.subf %96, %95 : vector<192x8xf32>
    %98 = math.exp %97 : vector<192x8xf32>
    %cst_46 = arith.constant 1.000000e+00 : f32
    %99 = vector.broadcast %cst_46 : f32 to vector<192x8xf32>
    %100 = arith.addf %99, %98 : vector<192x8xf32>
    %101 = tpu.reciprocal %100 {approx = true} : vector<192x8xf32> -> vector<192x8xf32>
    %102 = arith.mulf %95, %101 : vector<192x8xf32>
    %103 = arith.truncf %102 : vector<192x8xf32> to vector<192x8xbf16>
    %c0_47 = arith.constant 0 : index
    %c53 = arith.constant 53 : index
    %c0_48 = arith.constant 0 : index
    %104 = vector.load %arg6[%c0_47, %c53, %c0_48] : memref<2x62x8xbf16, #tpu.memory_space<vmem>>, vector<1x8x8xbf16>
    %105 = vector.shape_cast %104 : vector<1x8x8xbf16> to vector<8x8xbf16>
    %cst_49 = arith.constant dense<0.000000e+00> : vector<192x8xf32>
    %106 = tpu.matmul %103, %105, %cst_49 {dimension_numbers = #tpu.dot_dimension_numbers<[1], [0], [0], [1], [0, 0, 1, 1], [], []>} : vector<192x8xbf16>, vector<8x8xbf16>, vector<192x8xf32> -> vector<192x8xf32>
    %107 = vector.broadcast %47 : vector<1x8xf32> to vector<192x8xf32>
    %108 = arith.addf %106, %107 : vector<192x8xf32>
    %cst_50 = arith.constant 0.000000e+00 : f32
    %109 = vector.broadcast %cst_50 : f32 to vector<192x8xf32>
    %110 = arith.subf %109, %108 : vector<192x8xf32>
    %111 = math.exp %110 : vector<192x8xf32>
    %cst_51 = arith.constant 1.000000e+00 : f32
    %112 = vector.broadcast %cst_51 : f32 to vector<192x8xf32>
    %113 = arith.addf %112, %111 : vector<192x8xf32>
    %114 = tpu.reciprocal %113 {approx = true} : vector<192x8xf32> -> vector<192x8xf32>
    %115 = arith.mulf %108, %114 : vector<192x8xf32>
    %c0_52 = arith.constant 0 : index
    %c61 = arith.constant 61 : index
    %c0_53 = arith.constant 0 : index
    %116 = vector.load %arg6[%c0_52, %c61, %c0_53] : memref<2x62x8xbf16, #tpu.memory_space<vmem>>, vector<1x1x8xbf16>
    %117 = vector.shape_cast %116 : vector<1x1x8xbf16> to vector<1x8xbf16>
    %118 = arith.extf %117 : vector<1x8xbf16> to vector<1x8xf32>
    %119 = vector.broadcast %118 : vector<1x8xf32> to vector<192x8xf32>
    %120 = arith.mulf %115, %119 : vector<192x8xf32>
    %cst_54 = arith.constant dense<0.000000e+00> : vector<192xf32>
    %121 = vector.multi_reduction <add>, %120, %cst_54 [1] : vector<192x8xf32> to vector<192xf32>
    %122 = vector.shape_cast %121 : vector<192xf32> to vector<192x1xf32>
    %123 = vector.broadcast %122 : vector<192x1xf32> to vector<192x3xf32>
    %124 = arith.mulf %55, %123 : vector<192x3xf32>
    %125 = arith.truncf %124 : vector<192x3xf32> to vector<192x3xbf16>
    %cst_55 = arith.constant dense<0.000000e+00> : vector<64x3xf32>
    %126 = tpu.matmul %36, %125, %cst_55 {dimension_numbers = #tpu.dot_dimension_numbers<[1], [0], [0], [1], [0, 0, 1, 1], [], []>} : vector<64x192xbf16>, vector<192x3xbf16>, vector<64x3xf32> -> vector<64x3xf32>
    %127 = vector.broadcast %35 : vector<64x1xf32> to vector<64x3xf32>
    %128 = arith.mulf %126, %127 : vector<64x3xf32>
    %129 = arith.addf %2, %128 : vector<64x3xf32>
    %cst_56 = arith.constant dense<0.000000e+00> : vector<64x8xf32>
    %130 = tpu.matmul %36, %103, %cst_56 {dimension_numbers = #tpu.dot_dimension_numbers<[1], [0], [0], [1], [0, 0, 1, 1], [], []>} : vector<64x192xbf16>, vector<192x8xbf16>, vector<64x8xf32> -> vector<64x8xf32>
    %c0_57 = arith.constant 0 : index
    %c29 = arith.constant 29 : index
    %c0_58 = arith.constant 0 : index
    %131 = vector.load %arg6[%c0_57, %c29, %c0_58] : memref<2x62x8xbf16, #tpu.memory_space<vmem>>, vector<1x8x8xbf16>
    %132 = vector.shape_cast %131 : vector<1x8x8xbf16> to vector<8x8xbf16>
    %cst_59 = arith.constant dense<0.000000e+00> : vector<64x8xf32>
    %133 = tpu.matmul %48, %132, %cst_59 {dimension_numbers = #tpu.dot_dimension_numbers<[1], [0], [0], [1], [0, 0, 1, 1], [], []>} : vector<64x8xbf16>, vector<8x8xbf16>, vector<64x8xf32> -> vector<64x8xf32>
    %134 = arith.truncf %130 : vector<64x8xf32> to vector<64x8xbf16>
    %c0_60 = arith.constant 0 : index
    %c37 = arith.constant 37 : index
    %c0_61 = arith.constant 0 : index
    %135 = vector.load %arg6[%c0_60, %c37, %c0_61] : memref<2x62x8xbf16, #tpu.memory_space<vmem>>, vector<1x8x8xbf16>
    %136 = vector.shape_cast %135 : vector<1x8x8xbf16> to vector<8x8xbf16>
    %cst_62 = arith.constant dense<0.000000e+00> : vector<64x8xf32>
    %137 = tpu.matmul %134, %136, %cst_62 {dimension_numbers = #tpu.dot_dimension_numbers<[1], [0], [0], [1], [0, 0, 1, 1], [], []>} : vector<64x8xbf16>, vector<8x8xbf16>, vector<64x8xf32> -> vector<64x8xf32>
    %138 = arith.addf %133, %137 : vector<64x8xf32>
    %139 = vector.broadcast %45 : vector<1x8xf32> to vector<64x8xf32>
    %140 = arith.addf %138, %139 : vector<64x8xf32>
    %cst_63 = arith.constant 0.000000e+00 : f32
    %141 = vector.broadcast %cst_63 : f32 to vector<64x8xf32>
    %142 = arith.subf %141, %140 : vector<64x8xf32>
    %143 = math.exp %142 : vector<64x8xf32>
    %cst_64 = arith.constant 1.000000e+00 : f32
    %144 = vector.broadcast %cst_64 : f32 to vector<64x8xf32>
    %145 = arith.addf %144, %143 : vector<64x8xf32>
    %146 = tpu.reciprocal %145 {approx = true} : vector<64x8xf32> -> vector<64x8xf32>
    %147 = arith.mulf %140, %146 : vector<64x8xf32>
    %148 = arith.truncf %147 : vector<64x8xf32> to vector<64x8xbf16>
    %c0_65 = arith.constant 0 : index
    %c45 = arith.constant 45 : index
    %c0_66 = arith.constant 0 : index
    %149 = vector.load %arg6[%c0_65, %c45, %c0_66] : memref<2x62x8xbf16, #tpu.memory_space<vmem>>, vector<1x8x8xbf16>
    %150 = vector.shape_cast %149 : vector<1x8x8xbf16> to vector<8x8xbf16>
    %cst_67 = arith.constant dense<0.000000e+00> : vector<64x8xf32>
    %151 = tpu.matmul %148, %150, %cst_67 {dimension_numbers = #tpu.dot_dimension_numbers<[1], [0], [0], [1], [0, 0, 1, 1], [], []>} : vector<64x8xbf16>, vector<8x8xbf16>, vector<64x8xf32> -> vector<64x8xf32>
    %152 = vector.broadcast %46 : vector<1x8xf32> to vector<64x8xf32>
    %153 = arith.addf %151, %152 : vector<64x8xf32>
    %154 = arith.addf %42, %153 : vector<64x8xf32>
    %c6 = arith.constant 6 : index
    %c0_68 = arith.constant 0 : index
    %155 = vector.load %arg7[%c6, %c0_68] : memref<11x8xf32, #tpu.memory_space<vmem>>, vector<1x8xf32>
    %c7 = arith.constant 7 : index
    %c0_69 = arith.constant 0 : index
    %156 = vector.load %arg7[%c7, %c0_69] : memref<11x8xf32, #tpu.memory_space<vmem>>, vector<1x8xf32>
    %c8_70 = arith.constant 8 : index
    %c0_71 = arith.constant 0 : index
    %157 = vector.load %arg7[%c8_70, %c0_71] : memref<11x8xf32, #tpu.memory_space<vmem>>, vector<1x8xf32>
    %c9 = arith.constant 9 : index
    %c0_72 = arith.constant 0 : index
    %158 = vector.load %arg7[%c9, %c0_72] : memref<11x8xf32, #tpu.memory_space<vmem>>, vector<1x8xf32>
    %159 = arith.truncf %154 : vector<64x8xf32> to vector<64x8xbf16>
    %160 = arith.truncf %129 : vector<64x3xf32> to vector<64x3xbf16>
    %161 = arith.extf %160 : vector<64x3xbf16> to vector<64x3xf32>
    %162 = arith.subf %129, %161 : vector<64x3xf32>
    %163 = arith.truncf %162 : vector<64x3xf32> to vector<64x3xbf16>
    %cst_73 = arith.constant dense<0.000000e+00> : vector<192x3xf32>
    %164 = tpu.matmul %22, %160, %cst_73 {dimension_numbers = #tpu.dot_dimension_numbers<[1], [0], [0], [1], [0, 0, 1, 1], [], []>} : vector<192x64xbf16>, vector<64x3xbf16>, vector<192x3xf32> -> vector<192x3xf32>
    %cst_74 = arith.constant dense<0.000000e+00> : vector<192x3xf32>
    %165 = tpu.matmul %22, %163, %cst_74 {dimension_numbers = #tpu.dot_dimension_numbers<[1], [0], [0], [1], [0, 0, 1, 1], [], []>} : vector<192x64xbf16>, vector<64x3xbf16>, vector<192x3xf32> -> vector<192x3xf32>
    %166 = arith.addf %164, %165 : vector<192x3xf32>
    %167 = arith.mulf %166, %166 : vector<192x3xf32>
    %cst_75 = arith.constant dense<0.000000e+00> : vector<192xf32>
    %168 = vector.multi_reduction <add>, %167, %cst_75 [1] : vector<192x3xf32> to vector<192xf32>
    %169 = vector.shape_cast %168 : vector<192xf32> to vector<192x1xf32>
    %c1_76 = arith.constant 1 : index
    %c0_77 = arith.constant 0 : index
    %c0_78 = arith.constant 0 : index
    %170 = vector.load %arg6[%c1_76, %c0_77, %c0_78] : memref<2x62x8xbf16, #tpu.memory_space<vmem>>, vector<1x8x8xbf16>
    %171 = vector.shape_cast %170 : vector<1x8x8xbf16> to vector<8x8xbf16>
    %cst_79 = arith.constant dense<0.000000e+00> : vector<64x8xf32>
    %172 = tpu.matmul %159, %171, %cst_79 {dimension_numbers = #tpu.dot_dimension_numbers<[1], [0], [0], [1], [0, 0, 1, 1], [], []>} : vector<64x8xbf16>, vector<8x8xbf16>, vector<64x8xf32> -> vector<64x8xf32>
    %c1_80 = arith.constant 1 : index
    %c8_81 = arith.constant 8 : index
    %c0_82 = arith.constant 0 : index
    %173 = vector.load %arg6[%c1_80, %c8_81, %c0_82] : memref<2x62x8xbf16, #tpu.memory_space<vmem>>, vector<1x8x8xbf16>
    %174 = vector.shape_cast %173 : vector<1x8x8xbf16> to vector<8x8xbf16>
    %cst_83 = arith.constant dense<0.000000e+00> : vector<64x8xf32>
    %175 = tpu.matmul %159, %174, %cst_83 {dimension_numbers = #tpu.dot_dimension_numbers<[1], [0], [0], [1], [0, 0, 1, 1], [], []>} : vector<64x8xbf16>, vector<8x8xbf16>, vector<64x8xf32> -> vector<64x8xf32>
    %176 = arith.truncf %172 : vector<64x8xf32> to vector<64x8xbf16>
    %cst_84 = arith.constant dense<0.000000e+00> : vector<192x8xf32>
    %177 = tpu.matmul %19, %176, %cst_84 {dimension_numbers = #tpu.dot_dimension_numbers<[1], [0], [0], [1], [0, 0, 1, 1], [], []>} : vector<192x64xbf16>, vector<64x8xbf16>, vector<192x8xf32> -> vector<192x8xf32>
    %178 = arith.truncf %175 : vector<64x8xf32> to vector<64x8xbf16>
    %cst_85 = arith.constant dense<0.000000e+00> : vector<192x8xf32>
    %179 = tpu.matmul %20, %178, %cst_85 {dimension_numbers = #tpu.dot_dimension_numbers<[1], [0], [0], [1], [0, 0, 1, 1], [], []>} : vector<192x64xbf16>, vector<64x8xbf16>, vector<192x8xf32> -> vector<192x8xf32>
    %180 = arith.addf %177, %179 : vector<192x8xf32>
    %c1_86 = arith.constant 1 : index
    %c16_87 = arith.constant 16 : index
    %c0_88 = arith.constant 0 : index
    %181 = vector.load %arg6[%c1_86, %c16_87, %c0_88] : memref<2x62x8xbf16, #tpu.memory_space<vmem>>, vector<1x1x8xbf16>
    %182 = vector.shape_cast %181 : vector<1x1x8xbf16> to vector<1x8xbf16>
    %183 = arith.extf %182 : vector<1x8xbf16> to vector<1x8xf32>
    %184 = vector.broadcast %169 : vector<192x1xf32> to vector<192x8xf32>
    %185 = vector.broadcast %183 : vector<1x8xf32> to vector<192x8xf32>
    %186 = arith.mulf %184, %185 : vector<192x8xf32>
    %187 = arith.addf %180, %186 : vector<192x8xf32>
    %c1_89 = arith.constant 1 : index
    %c17_90 = arith.constant 17 : index
    %c0_91 = arith.constant 0 : index
    %188 = vector.load %arg6[%c1_89, %c17_90, %c0_91] : memref<2x62x8xbf16, #tpu.memory_space<vmem>>, vector<1x4x8xbf16>
    %189 = vector.shape_cast %188 : vector<1x4x8xbf16> to vector<4x8xbf16>
    %cst_92 = arith.constant dense<0.000000e+00> : vector<192x8xf32>
    %190 = tpu.matmul %5, %189, %cst_92 {dimension_numbers = #tpu.dot_dimension_numbers<[1], [0], [0], [1], [0, 0, 1, 1], [], []>} : vector<192x4xbf16>, vector<4x8xbf16>, vector<192x8xf32> -> vector<192x8xf32>
    %191 = arith.addf %187, %190 : vector<192x8xf32>
    %192 = vector.broadcast %155 : vector<1x8xf32> to vector<192x8xf32>
    %193 = arith.addf %191, %192 : vector<192x8xf32>
    %cst_93 = arith.constant 0.000000e+00 : f32
    %194 = vector.broadcast %cst_93 : f32 to vector<192x8xf32>
    %195 = arith.subf %194, %193 : vector<192x8xf32>
    %196 = math.exp %195 : vector<192x8xf32>
    %cst_94 = arith.constant 1.000000e+00 : f32
    %197 = vector.broadcast %cst_94 : f32 to vector<192x8xf32>
    %198 = arith.addf %197, %196 : vector<192x8xf32>
    %199 = tpu.reciprocal %198 {approx = true} : vector<192x8xf32> -> vector<192x8xf32>
    %200 = arith.mulf %193, %199 : vector<192x8xf32>
    %201 = arith.truncf %200 : vector<192x8xf32> to vector<192x8xbf16>
    %c1_95 = arith.constant 1 : index
    %c21_96 = arith.constant 21 : index
    %c0_97 = arith.constant 0 : index
    %202 = vector.load %arg6[%c1_95, %c21_96, %c0_97] : memref<2x62x8xbf16, #tpu.memory_space<vmem>>, vector<1x8x8xbf16>
    %203 = vector.shape_cast %202 : vector<1x8x8xbf16> to vector<8x8xbf16>
    %cst_98 = arith.constant dense<0.000000e+00> : vector<192x8xf32>
    %204 = tpu.matmul %201, %203, %cst_98 {dimension_numbers = #tpu.dot_dimension_numbers<[1], [0], [0], [1], [0, 0, 1, 1], [], []>} : vector<192x8xbf16>, vector<8x8xbf16>, vector<192x8xf32> -> vector<192x8xf32>
    %205 = vector.broadcast %156 : vector<1x8xf32> to vector<192x8xf32>
    %206 = arith.addf %204, %205 : vector<192x8xf32>
    %cst_99 = arith.constant 0.000000e+00 : f32
    %207 = vector.broadcast %cst_99 : f32 to vector<192x8xf32>
    %208 = arith.subf %207, %206 : vector<192x8xf32>
    %209 = math.exp %208 : vector<192x8xf32>
    %cst_100 = arith.constant 1.000000e+00 : f32
    %210 = vector.broadcast %cst_100 : f32 to vector<192x8xf32>
    %211 = arith.addf %210, %209 : vector<192x8xf32>
    %212 = tpu.reciprocal %211 {approx = true} : vector<192x8xf32> -> vector<192x8xf32>
    %213 = arith.mulf %206, %212 : vector<192x8xf32>
    %214 = arith.truncf %213 : vector<192x8xf32> to vector<192x8xbf16>
    %cst_101 = arith.constant dense<0.000000e+00> : vector<64x8xf32>
    %215 = tpu.matmul %36, %214, %cst_101 {dimension_numbers = #tpu.dot_dimension_numbers<[1], [0], [0], [1], [0, 0, 1, 1], [], []>} : vector<64x192xbf16>, vector<192x8xbf16>, vector<64x8xf32> -> vector<64x8xf32>
    %c1_102 = arith.constant 1 : index
    %c29_103 = arith.constant 29 : index
    %c0_104 = arith.constant 0 : index
    %216 = vector.load %arg6[%c1_102, %c29_103, %c0_104] : memref<2x62x8xbf16, #tpu.memory_space<vmem>>, vector<1x8x8xbf16>
    %217 = vector.shape_cast %216 : vector<1x8x8xbf16> to vector<8x8xbf16>
    %cst_105 = arith.constant dense<0.000000e+00> : vector<64x8xf32>
    %218 = tpu.matmul %159, %217, %cst_105 {dimension_numbers = #tpu.dot_dimension_numbers<[1], [0], [0], [1], [0, 0, 1, 1], [], []>} : vector<64x8xbf16>, vector<8x8xbf16>, vector<64x8xf32> -> vector<64x8xf32>
    %219 = arith.truncf %215 : vector<64x8xf32> to vector<64x8xbf16>
    %c1_106 = arith.constant 1 : index
    %c37_107 = arith.constant 37 : index
    %c0_108 = arith.constant 0 : index
    %220 = vector.load %arg6[%c1_106, %c37_107, %c0_108] : memref<2x62x8xbf16, #tpu.memory_space<vmem>>, vector<1x8x8xbf16>
    %221 = vector.shape_cast %220 : vector<1x8x8xbf16> to vector<8x8xbf16>
    %cst_109 = arith.constant dense<0.000000e+00> : vector<64x8xf32>
    %222 = tpu.matmul %219, %221, %cst_109 {dimension_numbers = #tpu.dot_dimension_numbers<[1], [0], [0], [1], [0, 0, 1, 1], [], []>} : vector<64x8xbf16>, vector<8x8xbf16>, vector<64x8xf32> -> vector<64x8xf32>
    %223 = arith.addf %218, %222 : vector<64x8xf32>
    %224 = vector.broadcast %157 : vector<1x8xf32> to vector<64x8xf32>
    %225 = arith.addf %223, %224 : vector<64x8xf32>
    %cst_110 = arith.constant 0.000000e+00 : f32
    %226 = vector.broadcast %cst_110 : f32 to vector<64x8xf32>
    %227 = arith.subf %226, %225 : vector<64x8xf32>
    %228 = math.exp %227 : vector<64x8xf32>
    %cst_111 = arith.constant 1.000000e+00 : f32
    %229 = vector.broadcast %cst_111 : f32 to vector<64x8xf32>
    %230 = arith.addf %229, %228 : vector<64x8xf32>
    %231 = tpu.reciprocal %230 {approx = true} : vector<64x8xf32> -> vector<64x8xf32>
    %232 = arith.mulf %225, %231 : vector<64x8xf32>
    %233 = arith.truncf %232 : vector<64x8xf32> to vector<64x8xbf16>
    %c1_112 = arith.constant 1 : index
    %c45_113 = arith.constant 45 : index
    %c0_114 = arith.constant 0 : index
    %234 = vector.load %arg6[%c1_112, %c45_113, %c0_114] : memref<2x62x8xbf16, #tpu.memory_space<vmem>>, vector<1x8x8xbf16>
    %235 = vector.shape_cast %234 : vector<1x8x8xbf16> to vector<8x8xbf16>
    %cst_115 = arith.constant dense<0.000000e+00> : vector<64x8xf32>
    %236 = tpu.matmul %233, %235, %cst_115 {dimension_numbers = #tpu.dot_dimension_numbers<[1], [0], [0], [1], [0, 0, 1, 1], [], []>} : vector<64x8xbf16>, vector<8x8xbf16>, vector<64x8xf32> -> vector<64x8xf32>
    %237 = vector.broadcast %158 : vector<1x8xf32> to vector<64x8xf32>
    %238 = arith.addf %236, %237 : vector<64x8xf32>
    %239 = arith.addf %154, %238 : vector<64x8xf32>
    %240 = arith.truncf %239 : vector<64x8xf32> to vector<64x8xbf16>
    %c0_116 = arith.constant 0 : index
    %c0_117 = arith.constant 0 : index
    %241 = vector.load %arg8[%c0_116, %c0_117] : memref<8x128xbf16, #tpu.memory_space<vmem>>, vector<8x128xbf16>
    %cst_118 = arith.constant dense<0.000000e+00> : vector<64x128xf32>
    %242 = tpu.matmul %240, %241, %cst_118 {dimension_numbers = #tpu.dot_dimension_numbers<[1], [0], [0], [1], [0, 0, 1, 1], [], []>} : vector<64x8xbf16>, vector<8x128xbf16>, vector<64x128xf32> -> vector<64x128xf32>
    %c0_119 = arith.constant 0 : index
    %c0_120 = arith.constant 0 : index
    %243 = vector.load %arg9[%c0_119, %c0_120] : memref<1x128xf32, #tpu.memory_space<vmem>>, vector<1x128xf32>
    %244 = vector.broadcast %243 : vector<1x128xf32> to vector<64x128xf32>
    %245 = arith.addf %242, %244 : vector<64x128xf32>
    %c0_121 = arith.constant 0 : index
    %c0_122 = arith.constant 0 : index
    %c0_123 = arith.constant 0 : index
    %246 = vector.load %arg10[%c0_121, %c0_122, %c0_123] : memref<1x64x128xf32, #tpu.memory_space<vmem>>, vector<1x64x128xf32>
    %247 = vector.shape_cast %246 : vector<1x64x128xf32> to vector<64x128xf32>
    %248 = vector.shape_cast %245 : vector<64x128xf32> to vector<1x64x128xf32>
    tpu.vector_store %arg10[%c0_121, %c0_122, %c0_123], %248 {strides = array<i32>} : memref<1x64x128xf32, #tpu.memory_space<vmem>>, vector<1x64x128xf32>,
    return
  }
  func.func @transform_0(%arg0: i32) -> (i32, i32, i32) {
    %c0_i32 = arith.constant 0 : i32
    %c0_i32_0 = arith.constant 0 : i32
    %c0_i32_1 = arith.constant 0 : i32
    return %arg0, %c0_i32, %c0_i32_0 : i32, i32, i32
  }
  func.func @transform_1(%arg0: i32) -> (i32, i32, i32) {
    %c0_i32 = arith.constant 0 : i32
    %c0_i32_0 = arith.constant 0 : i32
    %c0_i32_1 = arith.constant 0 : i32
    return %arg0, %c0_i32, %c0_i32_0 : i32, i32, i32
  }
  func.func @transform_2(%arg0: i32) -> (i32, i32, i32) {
    %c0_i32 = arith.constant 0 : i32
    %c0_i32_0 = arith.constant 0 : i32
    %c0_i32_1 = arith.constant 0 : i32
    return %arg0, %c0_i32, %c0_i32_0 : i32, i32, i32
  }
  func.func @transform_3(%arg0: i32) -> (i32, i32, i32) {
    %c0_i32 = arith.constant 0 : i32
    %c0_i32_0 = arith.constant 0 : i32
    %c0_i32_1 = arith.constant 0 : i32
    return %arg0, %c0_i32, %c0_i32_0 : i32, i32, i32
  }
  func.func @transform_4(%arg0: i32) -> (i32, i32) {
    %c0_i32 = arith.constant 0 : i32
    %c0_i32_0 = arith.constant 0 : i32
    %c0_i32_1 = arith.constant 0 : i32
    return %c0_i32, %c0_i32_0 : i32, i32
  }
  func.func @transform_5(%arg0: i32) -> (i32, i32, i32) {
    %c0_i32 = arith.constant 0 : i32
    %c0_i32_0 = arith.constant 0 : i32
    %c0_i32_1 = arith.constant 0 : i32
    %c0_i32_2 = arith.constant 0 : i32
    return %c0_i32, %c0_i32_0, %c0_i32_1 : i32, i32, i32
  }
  func.func @transform_6(%arg0: i32) -> (i32, i32) {
    %c0_i32 = arith.constant 0 : i32
    %c0_i32_0 = arith.constant 0 : i32
    %c0_i32_1 = arith.constant 0 : i32
    return %c0_i32, %c0_i32_0 : i32, i32
  }
  func.func @transform_7(%arg0: i32) -> (i32, i32) {
    %c0_i32 = arith.constant 0 : i32
    %c0_i32_0 = arith.constant 0 : i32
    %c0_i32_1 = arith.constant 0 : i32
    return %c0_i32, %c0_i32_0 : i32, i32
  }
  func.func @transform_8(%arg0: i32) -> (i32, i32) {
    %c0_i32 = arith.constant 0 : i32
    %c0_i32_0 = arith.constant 0 : i32
    %c0_i32_1 = arith.constant 0 : i32
    return %c0_i32, %c0_i32_0 : i32, i32
  }
  func.func @transform_9(%arg0: i32) -> (i32, i32, i32) {
    %c0_i32 = arith.constant 0 : i32
    %c0_i32_0 = arith.constant 0 : i32
    %c0_i32_1 = arith.constant 0 : i32
    return %arg0, %c0_i32, %c0_i32_0 : i32, i32, i32
  }
}

</mosaic_0001>

<bundles_post_ra>
// kernel: tpu_custom_call.1
= control target key start
LH: loop header
LB: loop body
LE: loop exit
PB: predicated region body
PF: predicated region fallthrough
CT: control target
= control target key end

     0   :  { %14 = vsyncpa [#allocation3], 0  ;;  %s10527_s0 = inlined_call_operand.vmem [shape: f32[2,64,16], index: 0, kind: input, shape index: {}]   ;;  %s10528_s1 = inlined_call_operand.vmem [shape: f32[2,192,4], index: 1, kind: input, shape index: {}]   ;;  %s10529_s2 = inlined_call_operand.vmem [shape: s32[2,192,2], index: 2, kind: input, shape index: {}]   ;;  %s10530_s3 = inlined_call_operand.vmem [shape: s32[2,1,192], index: 3, kind: input, shape index: {}]   ;;  %s10531_s4 = inlined_call_operand.vmem [shape: bf16[16,8], index: 4, kind: input, shape index: {}]   ;;  %s10532_s5 = inlined_call_operand.vmem [shape: bf16[2,62,8], index: 5, kind: input, shape index: {}]   ;;  %s10533_s6 = inlined_call_operand.vmem [shape: f32[11,8], index: 6, kind: input, shape index: {}]   ;;  %s10534_s7 = inlined_call_operand.vmem [shape: bf16[8,128], index: 7, kind: input, shape index: {}]   ;;  %s10535_s8 = inlined_call_operand.vmem [shape: f32[1,128], index: 8, kind: input, shape index: {}]   ;;  %s10536_s9 = inlined_call_operand.hbm [shape: f32[2,64,128], index: 9, kind: output, shape index: {}]  }
   0x1   :  { %16 = vsyncpa [#allocation3 + $0x1], 0  ;;  %s7894_s30 = smov 0   ;;  %s7896_s10 = smov 0  }
   0x2   :  { %s7898_s11 = smov 0   ;;  %s7900_s12 = smov 0  }
   0x3 LB: > { %s7915_s13 = sadd.s32 4294967295, %s7833_s12   ;;  %s5986_s14 = sadd.s32 4294967294, %s7833_s12   ;;  %s7833_s12 = sphi %s7900_s12, %s10951_s12   ;;  %s7829_s11 = sphi %s7898_s11, %s10950_s11   ;;  %s7825_s10 = sphi %s7896_s10, %s10949_s10   ;;  %s7821_s30 = sphi %s7894_s30, %s10948_s30  }
   0x4   : > { %s7919_s15 = sadd.s32 1, %s7833_s12   ;;  %s238_s16 = sadd.s32 1, %s7829_s11 }
   0x5   : > { %s235_s17 = ssub.s32 %s7833_s12, %s7919_s15  ;;  %p248_p0 = scmp.ne.s32.totalorder %s7829_s11, %s7825_s10 }
   0x6   : > { %p236_p1 = scmp.eq.s32.totalorder %s235_s17, 0  ;;  %p249_p2 = scmp.eq.s32.totalorder %s7915_s13, 1 }
   0x7   : > { %p254_p3 = scmp.ne.s32.totalorder %s7825_s10, %s7821_s30  ;;  %p255_p4 = scmp.eq.s32.totalorder %s5986_s14, 1 }
   0x8   : > { %s7930_s18 = scalar_select %p236_p1, %s7829_s11, %s238_s16  }
   0x9   : > { %p7932_p5 = por %p249_p2, %p248_p0  ;;  %p7936_p6 = por %p255_p4, %p254_p3 }
   0xa   : > { %p5989_p7 = scmp.ge.s32.totalorder %s7833_s12, 1  ;;  %p319_p8 = scmp.lt.s32.totalorder %s7833_s12, 3 }
   0xc   : > { %p320_p9 = pnand %p5989_p7, %p319_p8 }
   0xe   : > { %323 = sbr.rel (%p320_p9) target bundleno = 3772 (0xebc), region = 56 }
  0x13   : > { %p369_p10 = scmp.lt.s32.totalorder %s7915_s13, 1  ;;  %v10540_v0 = vmov 0   ;;  %v7193_v1 = vld [vmem:[%s10531_s4] sm:$0xff]   ;;  %vm955_vm0 = vcmask 130048   ;;  %v7836_v14 = vmov 1   ;;  %s7837_s17 = smov 116   ;;  %v10539_v52 = vlaneseq }
  0x14   : > { %7166 = vset.pattern.permute.xlu1 %v10540_v0  ;;  %7165 = vset.pattern.permute.xlu0 %v10540_v0  ;;  %v10537_v57 = vmov 0.0   ;;  %vm873_vm6 = vcmask 523264   ;;  %vm1499_vm9 = vcmask 1043456   ;;  %s7840_s14 = smov 12  }
  0x15   : > { %s7949_s23 = scalar_select %p369_p10, %s7915_s13, 1  ;;  %6595 = vmatprep.subr.bf16.mxu0 %v7193_v1  ;;  %v8084_v53 = vand.u32 127, %v10539_v52 }
  0x16   : > { %6596 = vmatpush3.bf16.msra.mxu0 %v7193_v1 }
  0x17   : > { %s7117_s24 = smul.u32 192, %s7949_s23  ;;  %s6340_s25 = sshll.u32 %s7949_s23, 6 }
  0x18   : > { %s7956_s28 = scalar_lea.vmem %s10527_s0, %s6340_s25 }
  0x19   : > { %s7963_s16 = scalar_lea.vmem %s10529_s2, %s7117_s24  ;;  %v7966_v2 = vld [vmem:[%s7956_s28 + $0x30] sm:$0xff]  ;;  %v7969_v3 = vld [vmem:[%s7956_s28 + $0x38] sm:$0xff]  ;;  %v7978_v7 = vld [vmem:[%s7956_s28 + $0x20] sm:$0xff]  ;;  %s8594_s25 = scalar_lea.vmem %s10528_s1, %s7117_s24 }
  0x1a   : > { %v434_v4 = vld [vmem:[%s7963_s16 + $0x8] sm:$0xff]  ;;  %v433_v5 = vld [vmem:[%s7963_s16] sm:$0xff]  ;;  %v7975_v6 = vpack.c.bf16 %v7969_v3, %v7966_v2  ;;  %v7990_v11 = vld [vmem:[%s7956_s28 + $0x10] sm:$0xff]  ;;  %s366_s24 = sand.u32 1, %s7825_s10  }
  0x1b   : > { %463 = vperm.xlu1 %7166, %v434_v4   ;;  %460 = vperm.xlu0 %7165, %v433_v5   ;;  %v7981_v8 = vld [vmem:[%s7956_s28 + $0x28] sm:$0xff]  ;;  %v7984_v9 = vld [vmem:[%s7956_s28] sm:$0xff]  ;;  %v7993_v12 = vld [vmem:[%s7956_s28 + $0x18] sm:$0xff]  ;;  %s5990_s26 = sshll.u32 %s366_s24, 6 }
  0x1c   : > { %v7987_v10 = vld [vmem:[%s7956_s28 + $0x8] sm:$0xff]  ;;  %v8004_v15 = vpack.c.bf16 %v7981_v8, %v7978_v7  ;;  %v8008_v16 = vpack.c.bf16 %v7993_v12, %v7990_v11  ;;  %v436_v17 = vld [vmem:[%s7963_s16 + $0x18] sm:$0xff]  ;;  %v435_v18 = vld [vmem:[%s7963_s16 + $0x10] sm:$0xff]  ;;  %v1048_v32 = vunpack.c.l.bf16 %v7975_v6  ;;  %v1049_v33 = vunpack.c.h.bf16 %v7975_v6  ;;  %s368_s29 = scalar_lea.vmem [#allocation2], %s5990_s26 }
  0x1d   : > { %v7997_v13 = vpack.c.bf16 %v7987_v10, %v7984_v9  ;;  %v438_v19 = vld [vmem:[%s7963_s16 + $0x28] sm:$0xff]  ;;  %v440_v20 = vld [vmem:[%s7963_s16 + $0x38] sm:$0xff]  ;;  %v437_v21 = vld [vmem:[%s7963_s16 + $0x20] sm:$0xff] }
  0x1e   : > { %v443_v22 = vld [vmem:[%s7963_s16 + $0x50] sm:$0xff]  ;;  %v441_v24 = vld [vmem:[%s7963_s16 + $0x40] sm:$0xff]  ;;  %v444_v25 = vld [vmem:[%s7963_s16 + $0x58] sm:$0xff]  ;;  %v1056_v35 = vsub.f32 %v7966_v2, %v1048_v32  ;;  %v1057_v36 = vsub.f32 %v7969_v3, %v1049_v33  ;;  %v1046_v39 = vunpack.c.l.bf16 %v8004_v15  ;;  %v1047_v40 = vunpack.c.h.bf16 %v8004_v15 }
  0x1f   : > { %7167 = vset.pattern.permute.xlu1 %v7836_v14  ;;  %1253 = vrot.lane.b32.xlu0 %v7975_v6, %s7837_s17  ;;  %v439_v23 = vld [vmem:[%s7963_s16 + $0x30] sm:$0xff]  ;;  %v445_v26 = vld [vmem:[%s7963_s16 + $0x60] sm:$0xff]  ;;  %v448_v27 = vld [vmem:[%s7963_s16 + $0x78] sm:$0xff]  ;;  %v1042_v44 = vunpack.c.l.bf16 %v7997_v13  ;;  %v1043_v45 = vunpack.c.h.bf16 %v7997_v13 }
  0x20   : > { %604 = vperm.xlu1 %7167, %v433_v5   ;;  %6597 = vmatprep.mubr.msk.bf16.mxu0 %vm955_vm0, %v7997_v13  ;;  %v442_v28 = vld [vmem:[%s7963_s16 + $0x48] sm:$0xff]  ;;  %v449_v29 = vld [vmem:[%s7963_s16 + $0x80] sm:$0xff]  ;;  %v452_v30 = vld [vmem:[%s7963_s16 + $0x98] sm:$0xff]  ;;  %v1061_v38 = vpack.c.bf16 %v1057_v36, %v1056_v35  ;;  %v1054_v42 = vsub.f32 %v7978_v7, %v1046_v39  ;;  %v1055_v43 = vsub.f32 %v7981_v8, %v1047_v40 }
  0x21   : > { %6598 = vmatmul.mubr.msk.bf16.vlgmr.msra.gmra.mxu0 %vm955_vm0, %v8008_v16  ;;  %v453_v31 = vld [vmem:[%s7963_s16 + $0xa0] sm:$0xff]  ;;  %v447_v34 = vld [vmem:[%s7963_s16 + $0x70] sm:$0xff]  ;;  %v446_v41 = vld [vmem:[%s7963_s16 + $0x68] sm:$0xff]  ;;  %v1050_v48 = vsub.f32 %v7984_v9, %v1042_v44  ;;  %v1051_v49 = vsub.f32 %v7987_v10, %v1043_v45 }
  0x22   : > { %6601 = vmatprep.mubr.msk.bf16.mxu0 %vm955_vm0, %v8004_v15  ;;  %v451_v37 = vld [vmem:[%s7963_s16 + $0x90] sm:$0xff]  ;;  %v8067_v46 = vld [vmem:[%s7963_s16 + $0xb8] sm:$0xff]  ;;  %v1060_v47 = vpack.c.bf16 %v1055_v43, %v1054_v42  ;;  %v450_v51 = vld [vmem:[%s7963_s16 + $0x88] sm:$0xff] }
  0x23   : > { %1251 = vrot.lane.b32.xlu0 %v8004_v15, %s7837_s17  ;;  %v1058_v50 = vpack.c.bf16 %v1051_v49, %v1050_v48  ;;  %v454_v56 = vld [vmem:[%s7963_s16 + $0xa8] sm:$0xff]  ;;  %v1044_v15 = vunpack.c.l.bf16 %v8008_v16 }
  0x24   : > { %607 = vperm.xlu1 %7167, %v434_v4   ;;  %v455_v4 = vld [vmem:[%s7963_s16 + $0xb0] sm:$0xff]  ;;  %s5888_s16 = sshll.u32 %s368_s29, 4  ;;  %s10483_s16 = int_to_ptr.vmem [resolvable:$true] %s5888_s16 }
  0x27   : > { %469 = vperm.xlu0 %7165, %v436_v17  }
  0x28   : > { %7168 = vset.pattern.permute.xlu1 %v10540_v0 }
  0x29   : > { %466 = vperm.xlu1 %7168, %v435_v18   ;;  %6602 = vmatmul.mubr.msk.bf16.gmra.mxu0 %vm955_vm0, %v7975_v6 }
  0x2b   : > { %475 = vperm.xlu0 %7165, %v438_v19  }
  0x2d   : > { %7169 = vset.pattern.permute.xlu1 %v7836_v14 }
  0x2e   : > { %610 = vperm.xlu1 %7169, %v435_v18  }
  0x2f   : > { %1247 = vrot.lane.b32.xlu0 %v7997_v13, %s7837_s17 }
  0x32   : > { %1249 = vrot.lane.b32.xlu1 %v8008_v16, %s7837_s17 }
  0x33   : > { %481 = vperm.xlu0 %7165, %v440_v20   ;;  %7170 = vset.pattern.permute.xlu1 %v10540_v0 }
  0x36   : > { %472 = vperm.xlu1 %7170, %v437_v21  }
  0x37   : > { %490 = vperm.xlu0 %7165, %v443_v22  }
  0x3a   : > { %7171 = vset.pattern.permute.xlu1 %v7836_v14 }
  0x3b   : > { %616 = vperm.xlu1 %7171, %v437_v21   ;;  %7176 = vset.pattern.permute.xlu0 %v7836_v14 }
  0x3c   : > { %613 = vperm.xlu0 %7176, %v436_v17   ;;  %v1045_v17 = vunpack.c.h.bf16 %v8008_v16 }
  0x3f   : > { %619 = vperm.xlu1 %7171, %v438_v19  }
  0x40   : > { %625 = vperm.xlu0 %7176, %v440_v20  }
  0x43   : > { %7172 = vset.pattern.permute.xlu1 %v10540_v0 }
  0x44   : > { %478 = vperm.xlu1 %7172, %v439_v23   ;;  %628 = vperm.xlu0 %7176, %v441_v24  }
  0x48   : > { %7173 = vset.pattern.permute.xlu1 %v7836_v14  ;;  %637 = vperm.xlu0 %7176, %v444_v25  }
  0x49   : > { %622 = vperm.xlu1 %7173, %v439_v23   ;;  %v1053_v23 = vsub.f32 %v7993_v12, %v1045_v17 }
  0x4c   : > { %640 = vperm.xlu0 %7176, %v445_v26  }
  0x4d   : > { %7174 = vset.pattern.permute.xlu1 %v10540_v0 }
  0x4e   : > { %484 = vperm.xlu1 %7174, %v441_v24  }
  0x50   : > { %649 = vperm.xlu0 %7176, %v448_v27  }
  0x52   : > { %487 = vperm.xlu1 %7174, %v442_v28  }
  0x54   : > { %652 = vperm.xlu0 %7176, %v449_v29  }
  0x56   : > { %7175 = vset.pattern.permute.xlu1 %v7836_v14 }
  0x57   : > { %631 = vperm.xlu1 %7175, %v442_v28  }
  0x58   : > { %661 = vperm.xlu0 %7176, %v452_v30  }
  0x5b   : > { %7177 = vset.pattern.permute.xlu1 %v10540_v0 }
  0x5c   : > { %493 = vperm.xlu1 %7177, %v444_v25   ;;  %664 = vperm.xlu0 %7176, %v453_v31  }
  0x60   : > { %7178 = vset.pattern.permute.xlu1 %v7836_v14  ;;  %7188 = vset.pattern.permute.xlu0 %v10540_v0 }
  0x61   : > { %634 = vperm.xlu1 %7178, %v443_v22   ;;  %502 = vperm.xlu0 %7188, %v447_v34   ;;  %v1052_v22 = vsub.f32 %v7990_v11, %v1044_v15  ;;  %v1568_v11 = vld [vmem:[%s10532_s5 + $0x4] sm:$0xf] }
  0x62   : > { %v1570_v42 = vsel %vm1499_vm9, %v1568_v11, 0 }
  0x63   : > { %v1059_v25 = vpack.c.bf16 %v1053_v23, %v1052_v22 }
  0x65   : > { %7179 = vset.pattern.permute.xlu1 %v10540_v0  ;;  %514 = vperm.xlu0 %7188, %v451_v37  }
  0x66   : > { %496 = vperm.xlu1 %7179, %v445_v26  }
  0x69   : > { %1072 = vrot.lane.b32.xlu0 %v1061_v38, %s7837_s17 }
  0x6a   : > { %499 = vperm.xlu1 %7179, %v446_v41  }
  0x6d   : > { %529 = vperm.xlu0 %7188, %v8067_v46  }
  0x6e   : > { %7180 = vset.pattern.permute.xlu1 %v7836_v14 }
  0x6f   : > { %643 = vperm.xlu1 %7180, %v446_v41  }
  0x71   : > { %1070 = vrot.lane.b32.xlu0 %v1060_v47, %s7837_s17 }
  0x72   : > { %7192 = vset.pattern.permute.xlu0 %v7836_v14 }
  0x73   : > { %7181 = vset.pattern.permute.xlu1 %v10540_v0 }
  0x74   : > { %505 = vperm.xlu1 %7181, %v448_v27  }
  0x75   : > { %1066 = vrot.lane.b32.xlu0 %v1058_v50, %s7837_s17 }
  0x78   : > { %7182 = vset.pattern.permute.xlu1 %v7836_v14 }
  0x79   : > { %646 = vperm.xlu1 %7182, %v447_v34  }
  0x7d   : > { %7183 = vset.pattern.permute.xlu1 %v10540_v0 }
  0x7e   : > { %508 = vperm.xlu1 %7183, %v449_v29  }
  0x82   : > { %511 = vperm.xlu1 %7183, %v450_v51  }
  0x86   : > { %7184 = vset.pattern.permute.xlu1 %v7836_v14 }
  0x87   : > { %655 = vperm.xlu1 %7184, %v450_v51  }
  0x8b   : > { %7185 = vset.pattern.permute.xlu1 %v10540_v0 }
  0x8c   : > { %517 = vperm.xlu1 %7185, %v452_v30  }
  0x90   : > { %7186 = vset.pattern.permute.xlu1 %v7836_v14 }
  0x91   : > { %658 = vperm.xlu1 %7186, %v451_v37  }
  0x95   : > { %7187 = vset.pattern.permute.xlu1 %v10540_v0 }
  0x96   : > { %v464_v54 = vpop.permute.xlu1 %463  ;;  %v461_v55 = vpop.permute.xlu0 %460  ;;  %520 = vperm.xlu1 %7187, %v453_v31  }
  0x97   : > { %vm532_vm1 = vcmp.eq.s32.totalorder %v464_v54, %v8084_v53  ;;  %vm531_vm2 = vcmp.eq.s32.totalorder %v461_v55, %v8084_v53 }
  0x98   : > { %v5997_v58 = vsel %vm532_vm1, 1.0, %v10537_v57  ;;  %v5996_v59 = vsel %vm531_vm2, 1.0, %v10537_v57 }
  0x99   : > { %v8092_v60 = vpack.c.bf16 %v5997_v58, %v5996_v59 }
  0x9a   : > { %523 = vperm.xlu1 %7187, %v454_v56   ;;  %v1254_v61 = vpop.permute.xlu0 %1253 }
  0x9b   : > { %10678 = vst [vmem:[#allocation5_spill] sm:$0xff] %v8092_v60  ;;  %v605_v62 = vpop.permute.xlu1 %604  ;;  %6637 = vmatprep.subr.bf16.mxu0 %v1254_v61 }
  0x9c   : > { %vm675_vm3 = vcmp.eq.s32.totalorder %v605_v62, %v8084_v53  ;;  %6638 = vmatpush3.bf16.msra.mxu0 %v1254_v61 }
  0x9d   : > { %v6020_v1 = vsel %vm675_vm3, 1.0, %v10537_v57 }
  0x9e   : > { %7189 = vset.pattern.permute.xlu1 %v7836_v14  ;;  %v1252_v63 = vpop.permute.xlu0 %1251  ;;  %v771_v5 = vsub.f32 %v5996_v59, %v6020_v1 }
  0x9f   : > { %v608_v2 = vpop.permute.xlu1 %607  ;;  %667 = vperm.xlu1 %7189, %v454_v56   ;;  %6639 = vmatprep.subr.bf16.mxu0 %v1252_v63 }
  0xa0   : > { %vm676_vm4 = vcmp.eq.s32.totalorder %v608_v2, %v8084_v53  ;;  %6640 = vmatpush3.bf16.msra.mxu0 %v1252_v63 }
  0xa1   : > { %v6021_v3 = vsel %vm676_vm4, 1.0, %v10537_v57 }
  0xa2   : > { %v8100_v6 = vpack.c.bf16 %v6021_v3, %v6020_v1  ;;  %v772_v7 = vsub.f32 %v5997_v58, %v6021_v3  ;;  %v470_v8 = vpop.permute.xlu0 %469 }
  0xa3   : > { %vm534_vm5 = vcmp.eq.s32.totalorder %v470_v8, %v8084_v53  ;;  %7190 = vset.pattern.permute.xlu1 %v10540_v0 }
  0xa4   : > { %10679 = vst [vmem:[#allocation6_spill] sm:$0xff] %v8100_v6  ;;  %v8104_v9 = vpack.c.bf16 %v772_v7, %v771_v5  ;;  %v5999_v10 = vsel %vm534_vm5, 1.0, %v10537_v57  ;;  %v467_v13 = vpop.permute.xlu1 %466  ;;  %526 = vperm.xlu1 %7190, %v455_v4  }
  0xa5   : > { %vm533_vm7 = vcmp.eq.s32.totalorder %v467_v13, %v8084_v53 }
  0xa6   : > { %10680 = vst [vmem:[#allocation7_spill] sm:$0xff] %v8104_v9  ;;  %v5998_v18 = vsel %vm533_vm7, 1.0, %v10537_v57  ;;  %6613 = vmatprep.mubr.msk.bf16.mxu1 %vm873_vm6, %v8104_v9  ;;  %6645 = vmatprep.mubr.msk.bf16.mxu0 %vm873_vm6, %v8104_v9  ;;  %v476_v19 = vpop.permute.xlu0 %475 }
  0xa7   : > { %v8115_v20 = vpack.c.bf16 %v5999_v10, %v5998_v18  ;;  %vm536_vm8 = vcmp.eq.s32.totalorder %v476_v19, %v8084_v53 }
  0xa8   : > { %7191 = vset.pattern.permute.xlu1 %v7836_v14  ;;  %v6001_v27 = vsel %vm536_vm8, 1.0, %v10537_v57 }
  0xa9   : > { %10681 = vst [vmem:[#allocation8_spill] sm:$0xff] %v8115_v20  ;;  %v611_v21 = vpop.permute.xlu1 %610  ;;  %670 = vperm.xlu1 %7191, %v455_v4  }
  0xaa   : > { %v1248_v16 = vpop.permute.xlu0 %1247  ;;  %vm677_vm11 = vcmp.eq.s32.totalorder %v611_v21, %v8084_v53 }
  0xab   : > { %v6022_v31 = vsel %vm677_vm11, 1.0, %v10537_v57 }
  0xac   : > { %v773_v34 = vsub.f32 %v5998_v18, %v6022_v31 }
  0xad   : > { %673 = vperm.xlu1 %7191, %v8067_v46   ;;  %v1250_v24 = vpop.permute.xlu1 %1249 }
  0xae   : > { %6641 = vmatprep.subr.bf16.mxu0 %v1250_v24  ;;  %v482_v26 = vpop.permute.xlu0 %481 }
  0xaf   : > { %6642 = vmatpush3.bf16.msra.mxu0 %v1250_v24  ;;  %vm538_vm15 = vcmp.eq.s32.totalorder %v482_v26, %v8084_v53 }
  0xb0   : > { %6643 = vmatprep.subr.bf16.mxu0 %v1248_v16  ;;  %v6003_v46 = vsel %vm538_vm15, 1.0, %v10537_v57 }
  0xb1   : > { %v473_v14 = vpop.permute.xlu1 %472  ;;  %1068 = vrot.lane.b32.xlu1 %v1059_v25, %s7837_s17 }
  0xb2   : > { %vm535_vm10 = vcmp.eq.s32.totalorder %v473_v14, %v8084_v53  ;;  %v8128_v12 = vpop.permute.xlu0 %490 }
  0xb3   : > { %v6000_v28 = vsel %vm535_vm10, 1.0, %v10537_v57  ;;  %6644 = vmatpush3.bf16.msra.mxu0 %v1248_v16  ;;  %vm541_vm8 = vcmp.eq.s32.totalorder %v8128_v12, %v8084_v53 }
  0xb4   : > { %v8132_v29 = vpack.c.bf16 %v6001_v27, %v6000_v28  ;;  %7102 = vmatprep.subr.msk.bf16.mxu0 %vm1499_vm9, %v1568_v11  ;;  %v6006_v25 = vsel %vm541_vm8, 1.0, %v10537_v57 }
  0xb6   : > { %10682 = vst [vmem:[#allocation9_spill] sm:$0xff] %v8132_v29  ;;  %v617_v30 = vpop.permute.xlu1 %616 }
  0xb7   : > { %vm679_vm12 = vcmp.eq.s32.totalorder %v617_v30, %v8084_v53  ;;  %v614_v32 = vpop.permute.xlu0 %613 }
  0xb8   : > { %vm678_vm13 = vcmp.eq.s32.totalorder %v614_v32, %v8084_v53  ;;  %v6024_v35 = vsel %vm679_vm12, 1.0, %v10537_v57 }
  0xb9   : > { %v6023_v33 = vsel %vm678_vm13, 1.0, %v10537_v57  ;;  %v775_v43 = vsub.f32 %v6000_v28, %v6024_v35 }
  0xba   : > { %v8140_v36 = vpack.c.bf16 %v6023_v33, %v6022_v31  ;;  %v774_v37 = vsub.f32 %v5999_v10, %v6023_v33  ;;  %v620_v38 = vpop.permute.xlu1 %619 }
  0xbb   : > { %vm680_vm14 = vcmp.eq.s32.totalorder %v620_v38, %v8084_v53  ;;  %v626_v39 = vpop.permute.xlu0 %625 }
  0xbc   : > { %10683 = vst [vmem:[#allocation10_spill] sm:$0xff] %v8140_v36  ;;  %v8144_v40 = vpack.c.bf16 %v774_v37, %v773_v34  ;;  %v6025_v41 = vsel %vm680_vm14, 1.0, %v10537_v57  ;;  %vm682_vm0 = vcmp.eq.s32.totalorder %v626_v39, %v8084_v53 }
  0xbd   : > { %v8148_v44 = vpack.c.bf16 %v6025_v41, %v6024_v35  ;;  %v776_v45 = vsub.f32 %v6001_v27, %v6025_v41  ;;  %v6027_v54 = vsel %vm682_vm0, 1.0, %v10537_v57 }
  0xbe   : > { %10684 = vst [vmem:[#allocation11_spill] sm:$0xff] %v8144_v40  ;;  %6646 = vmatmul.mubr.msk.bf16.vlgmr.msra.gmra.mxu0 %vm873_vm6, %v8144_v40  ;;  %v778_v58 = vsub.f32 %v6003_v46, %v6027_v54 }
  0xbf   : > { %10685 = vst [vmem:[#allocation12_spill] sm:$0xff] %v8148_v44  ;;  %v8153_v47 = vpack.c.bf16 %v776_v45, %v775_v43  ;;  %v479_v48 = vpop.permute.xlu1 %478  ;;  %v629_v49 = vpop.permute.xlu0 %628  ;;  %6680 = vmatpush3.bf16.msra.mxu0 %v1570_v42 }
  0xc0   : > { %vm537_vm1 = vcmp.eq.s32.totalorder %v479_v48, %v8084_v53  ;;  %vm683_vm5 = vcmp.eq.s32.totalorder %v629_v49, %v8084_v53 }
  0xc1   : > { %10686 = vst [vmem:[#allocation13_spill] sm:$0xff] %v8153_v47  ;;  %v6002_v50 = vsel %vm537_vm1, 1.0, %v10537_v57  ;;  %6649 = vmatprep.mubr.msk.bf16.mxu0 %vm873_vm6, %v8153_v47  ;;  %v6028_v13 = vsel %vm683_vm5, 1.0, %v10537_v57 }
  0xc2   : > { %v8160_v51 = vpack.c.bf16 %v6003_v46, %v6002_v50 }
  0xc3   : > { %v638_v55 = vpop.permute.xlu0 %637 }
  0xc4   : > { %10687 = vst [vmem:[#allocation14_spill] sm:$0xff] %v8160_v51  ;;  %v623_v56 = vpop.permute.xlu1 %622  ;;  %vm686_vm11 = vcmp.eq.s32.totalorder %v638_v55, %v8084_v53 }
  0xc5   : > { %vm681_vm2 = vcmp.eq.s32.totalorder %v623_v56, %v8084_v53  ;;  %v6031_v14 = vsel %vm686_vm11, 1.0, %v10537_v57 }
  0xc6   : > { %v6026_v59 = vsel %vm681_vm2, 1.0, %v10537_v57 }
  0xc7   : > { %v777_v61 = vsub.f32 %v6002_v50, %v6026_v59  ;;  %v8165_v62 = vpack.c.bf16 %v6027_v54, %v6026_v59  ;;  %v641_v63 = vpop.permute.xlu0 %640 }
  0xc8   : > { %vm687_vm15 = vcmp.eq.s32.totalorder %v641_v63, %v8084_v53 }
  0xc9   : > { %10688 = vst [vmem:[#allocation15_spill] sm:$0xff] %v8165_v62  ;;  %v8167_v1 = vpack.c.bf16 %v778_v58, %v777_v61  ;;  %v485_v2 = vpop.permute.xlu1 %484  ;;  %v6032_v45 = vsel %vm687_vm15, 1.0, %v10537_v57 }
  0xca   : > { %vm539_vm3 = vcmp.eq.s32.totalorder %v485_v2, %v8084_v53 }
  0xcb   : > { %10689 = vst [vmem:[#allocation16_spill] sm:$0xff] %v8167_v1  ;;  %6650 = vmatmul.mubr.msk.bf16.gmra.mxu0 %vm873_vm6, %v8167_v1  ;;  %v8171_v3 = vpop.permute.xlu0 %649  ;;  %v6004_v5 = vsel %vm539_vm3, 1.0, %v10537_v57 }
  0xcc   : > { %v779_v19 = vsub.f32 %v6004_v5, %v6028_v13  ;;  %vm690_vm3 = vcmp.eq.s32.totalorder %v8171_v3, %v8084_v53 }
  0xcd   : > { %v488_v4 = vpop.permute.xlu1 %487  ;;  %v6035_v2 = vsel %vm690_vm3, 1.0, %v10537_v57 }
  0xce   : > { %vm540_vm4 = vcmp.eq.s32.totalorder %v488_v4, %v8084_v53 }
  0xcf   : > { %v6005_v7 = vsel %vm540_vm4, 1.0, %v10537_v57  ;;  %v8178_v8 = vpop.permute.xlu0 %652 }
  0xd0   : > { %v8180_v10 = vpack.c.bf16 %v6005_v7, %v6004_v5  ;;  %vm691_vm8 = vcmp.eq.s32.totalorder %v8178_v8, %v8084_v53 }
  0xd2   : > { %10690 = vst [vmem:[#allocation17_spill] sm:$0xff] %v8180_v10  ;;  %v632_v15 = vpop.permute.xlu1 %631 }
  0xd3   : > { %vm684_vm7 = vcmp.eq.s32.totalorder %v632_v15, %v8084_v53  ;;  %v8184_v17 = vpop.permute.xlu0 %661 }
  0xd4   : > { %v6029_v18 = vsel %vm684_vm7, 1.0, %v10537_v57 }
  0xd5   : > { %v8187_v21 = vpack.c.bf16 %v6029_v18, %v6028_v13  ;;  %v780_v22 = vsub.f32 %v6005_v7, %v6029_v18 }
  0xd7   : > { %10691 = vst [vmem:[#allocation18_spill] sm:$0xff] %v8187_v21  ;;  %v8191_v23 = vpack.c.bf16 %v780_v22, %v779_v19  ;;  %v494_v16 = vpop.permute.xlu1 %493  ;;  %v8193_v24 = vpop.permute.xlu0 %664 }
  0xd8   : > { %vm542_vm10 = vcmp.eq.s32.totalorder %v494_v16, %v8084_v53 }
  0xd9   : > { %10692 = vst [vmem:[#allocation19_spill] sm:$0xff] %v8191_v23  ;;  %v6007_v26 = vsel %vm542_vm10, 1.0, %v10537_v57  ;;  %6653 = vmatprep.mubr.msk.bf16.mxu0 %vm873_vm6, %v8191_v23 }
  0xda   : > { %v8201_v27 = vpack.c.bf16 %v6007_v26, %v6006_v25  ;;  %v782_v30 = vsub.f32 %v6007_v26, %v6031_v14 }
  0xdc   : > { %10693 = vst [vmem:[#allocation20_spill] sm:$0xff] %v8201_v27  ;;  %v635_v11 = vpop.permute.xlu1 %634  ;;  %v503_v12 = vpop.permute.xlu0 %502 }
  0xdd   : > { %vm685_vm12 = vcmp.eq.s32.totalorder %v635_v11, %v8084_v53  ;;  %vm545_vm1 = vcmp.eq.s32.totalorder %v503_v12, %v8084_v53 }
  0xde   : > { %v6030_v28 = vsel %vm685_vm12, 1.0, %v10537_v57  ;;  %v6010_v59 = vsel %vm545_vm1, 1.0, %v10537_v57  ;;  %vm695_vm1 = vcmp.eq.s32.totalorder %v8193_v24, %v8084_v53 }
  0xdf   : > { %v8206_v31 = vpack.c.bf16 %v6031_v14, %v6030_v28  ;;  %v781_v32 = vsub.f32 %v6006_v25, %v6030_v28  ;;  %v6036_v14 = vsel %vm691_vm8, 1.0, %v10537_v57  ;;  %vm1486_vm8 = vcmask 64512  }
  0xe0   : > { %v515_v33 = vpop.permute.xlu0 %514 }
  0xe1   : > { %10694 = vst [vmem:[#allocation21_spill] sm:$0xff] %v8206_v31  ;;  %v8208_v34 = vpack.c.bf16 %v782_v30, %v781_v32  ;;  %v497_v35 = vpop.permute.xlu1 %496  ;;  %vm549_vm11 = vcmp.eq.s32.totalorder %v515_v33, %v8084_v53 }
  0xe2   : > { %vm543_vm13 = vcmp.eq.s32.totalorder %v497_v35, %v8084_v53 }
  0xe3   : > { %10695 = vst [vmem:[#allocation22_spill] sm:$0xff] %v8208_v34  ;;  %6654 = vmatmul.mubr.msk.bf16.gmra.mxu0 %vm873_vm6, %v8208_v34  ;;  %v6008_v39 = vsel %vm543_vm13, 1.0, %v10537_v57  ;;  %vm694_vm13 = vcmp.eq.s32.totalorder %v8184_v17, %v8084_v53 }
  0xe4   : > { %v1073_v37 = vpop.permute.xlu0 %1072  ;;  %v783_v50 = vsub.f32 %v6008_v39, %v6032_v45 }
  0xe5   : > { %v500_v38 = vpop.permute.xlu1 %499  ;;  %6605 = vmatprep.subr.bf16.mxu1 %v1073_v37 }
  0xe6   : > { %vm544_vm14 = vcmp.eq.s32.totalorder %v500_v38, %v8084_v53  ;;  %6606 = vmatpush3.bf16.msra.mxu1 %v1073_v37  ;;  %v6014_v37 = vsel %vm549_vm11, 1.0, %v10537_v57  ;;  %vm10633_vm11 = vcmask 1041408  }
  0xe7   : > { %v6009_v41 = vsel %vm544_vm14, 1.0, %v10537_v57 }
  0xe8   : > { %v8217_v42 = vpack.c.bf16 %v6009_v41, %v6008_v39  ;;  %v8219_v43 = vpop.permute.xlu0 %529  ;;  %v6039_v39 = vsel %vm694_vm13, 1.0, %v10537_v57 }
  0xe9   : > { %vm554_vm3 = vcmp.eq.s32.totalorder %v8219_v43, %v8084_v53  ;;  %v6060_v43 = vld [vmem:[%s10533_s6] ss:$0 sm:$0xff] }
  0xea   : > { %10696 = vst [vmem:[#allocation23_spill] sm:$0xff] %v8217_v42  ;;  %v644_v46 = vpop.permute.xlu1 %643  ;;  %v6019_v24 = vsel %vm554_vm3, 1.0, %v10537_v57 }
  0xeb   : > { %vm688_vm0 = vcmp.eq.s32.totalorder %v644_v46, %v8084_v53 }
  0xec   : > { %v6033_v48 = vsel %vm688_vm0, 1.0, %v10537_v57  ;;  %v1071_v49 = vpop.permute.xlu0 %1070 }
  0xed   : > { %v8225_v54 = vpack.c.bf16 %v6033_v48, %v6032_v45  ;;  %v784_v55 = vsub.f32 %v6009_v41, %v6033_v48  ;;  %6607 = vmatprep.subr.bf16.mxu1 %v1071_v49 }
  0xee   : > { %6608 = vmatpush3.bf16.msra.mxu1 %v1071_v49 }
  0xef   : > { %10697 = vst [vmem:[#allocation24_spill] sm:$0xff] %v8225_v54  ;;  %v8227_v56 = vpack.c.bf16 %v784_v55, %v783_v50  ;;  %v506_v58 = vpop.permute.xlu1 %505  ;;  %v6599_v55 = vpop.f32.mrf.mxu0 }
  0xf0   : > { %vm546_vm2 = vcmp.eq.s32.totalorder %v506_v58, %v8084_v53 }
  0xf1   : > { %10698 = vst [vmem:[#allocation25_spill] sm:$0xff] %v8227_v56  ;;  %v6011_v61 = vsel %vm546_vm2, 1.0, %v10537_v57  ;;  %6657 = vmatprep.mubr.msk.bf16.mxu0 %vm873_vm6, %v8227_v56  ;;  %v1002_v58 = vpop.f32.mrf.mxu0 }
  0xf2   : > { %v8236_v63 = vpack.c.bf16 %v6011_v61, %v6010_v59  ;;  %v786_v7 = vsub.f32 %v6011_v61, %v6035_v2 }
  0xf4   : > { %10699 = vst [vmem:[#allocation26_spill] sm:$0xff] %v8236_v63  ;;  %v647_v4 = vpop.permute.xlu1 %646 }
  0xf5   : > { %vm689_vm4 = vcmp.eq.s32.totalorder %v647_v4, %v8084_v53  ;;  %v6600_v4 = vpop.f32.mrf.mxu0 }
  0xf6   : > { %v6034_v5 = vsel %vm689_vm4, 1.0, %v10537_v57 }
  0xf7   : > { %v8241_v13 = vpack.c.bf16 %v6035_v2, %v6034_v5  ;;  %v785_v15 = vsub.f32 %v6010_v59, %v6034_v5 }
  0xf9   : > { %10700 = vst [vmem:[#allocation27_spill] sm:$0xff] %v8241_v13  ;;  %v8243_v18 = vpack.c.bf16 %v786_v7, %v785_v15  ;;  %v509_v3 = vpop.permute.xlu1 %508  ;;  %v6040_v7 = vsel %vm695_vm1, 1.0, %v10537_v57 }
  0xfa   : > { %vm547_vm5 = vcmp.eq.s32.totalorder %v509_v3, %v8084_v53 }
  0xfb   : > { %10701 = vst [vmem:[#allocation28_spill] sm:$0xff] %v8243_v18  ;;  %6658 = vmatmul.mubr.msk.bf16.gmra.mxu0 %vm873_vm6, %v8243_v18  ;;  %v6012_v22 = vsel %vm547_vm5, 1.0, %v10537_v57 }
  0xfc   : > { %v787_v12 = vsub.f32 %v6012_v22, %v6036_v14 }
  0xfd   : > { %v512_v19 = vpop.permute.xlu1 %511 }
  0xfe   : > { %vm548_vm7 = vcmp.eq.s32.totalorder %v512_v19, %v8084_v53 }
  0xff   : > { %v6013_v16 = vsel %vm548_vm7, 1.0, %v10537_v57 }
 0x100   : > { %v8251_v25 = vpack.c.bf16 %v6013_v16, %v6012_v22 }
 0x102   : > { %10702 = vst [vmem:[#allocation29_spill] sm:$0xff] %v8251_v25  ;;  %v656_v26 = vpop.permute.xlu1 %655 }
 0x103   : > { %vm692_vm10 = vcmp.eq.s32.totalorder %v656_v26, %v8084_v53 }
 0x104   : > { %v6037_v11 = vsel %vm692_vm10, 1.0, %v10537_v57  ;;  %vm1412_vm10 = vcmask 23552  }
 0x105   : > { %v8259_v28 = vpack.c.bf16 %v6037_v11, %v6036_v14  ;;  %v788_v30 = vsub.f32 %v6013_v16, %v6037_v11  ;;  %v1005_v16 = vpop.f32.mrf.mxu0 }
 0x107   : > { %10703 = vst [vmem:[#allocation30_spill] sm:$0xff] %v8259_v28  ;;  %v8261_v32 = vpack.c.bf16 %v788_v30, %v787_v12  ;;  %v518_v35 = vpop.permute.xlu1 %517  ;;  %v6603_v12 = vpop.f32.mrf.mxu0 }
 0x108   : > { %vm550_vm12 = vcmp.eq.s32.totalorder %v518_v35, %v8084_v53 }
 0x109   : > { %10704 = vst [vmem:[#allocation31_spill] sm:$0xff] %v8261_v32  ;;  %v6015_v8 = vsel %vm550_vm12, 1.0, %v10537_v57  ;;  %6661 = vmatprep.mubr.msk.bf16.mxu0 %vm873_vm6, %v8261_v32  ;;  %vm10632_vm12 = vcmask 31744  }
 0x10a   : > { %v8268_v38 = vpack.c.bf16 %v6015_v8, %v6014_v37  ;;  %v790_v45 = vsub.f32 %v6015_v8, %v6039_v39 }
 0x10c   : > { %10705 = vst [vmem:[#allocation32_spill] sm:$0xff] %v8268_v38  ;;  %v659_v33 = vpop.permute.xlu1 %658 }
 0x10d   : > { %vm693_vm14 = vcmp.eq.s32.totalorder %v659_v33, %v8084_v53 }
 0x10e   : > { %v6038_v41 = vsel %vm693_vm14, 1.0, %v10537_v57 }
 0x10f   : > { %v8275_v46 = vpack.c.bf16 %v6039_v39, %v6038_v41  ;;  %v789_v48 = vsub.f32 %v6014_v37, %v6038_v41  ;;  %v1018_v37 = vpop.f32.mrf.mxu0  ;;  %v8310_v39 = vadd.f32 %v6060_v43, %v1002_v58  ;;  %v8312_v41 = vadd.f32 %v6060_v43, %v1005_v16 }
 0x110   : > { %v8335_v16 = vadd.f32 %v6599_v55, %v6060_v43  ;;  %v8357_v55 = vadd.f32 %v6603_v12, %v6060_v43 }
 0x111   : > { %10706 = vst [vmem:[#allocation33_spill] sm:$0xff] %v8275_v46  ;;  %v8277_v49 = vpack.c.bf16 %v790_v45, %v789_v48  ;;  %v521_v50 = vpop.permute.xlu1 %520  ;;  %10712 = vst [vmem:[#allocation39_spill] sm:$0xff] %v8310_v39  ;;  %v6604_v45 = vpop.f32.mrf.mxu0 }
 0x112   : > { %vm551_vm15 = vcmp.eq.s32.totalorder %v521_v50, %v8084_v53  ;;  %10713 = vst [vmem:[#allocation40_spill] sm:$0xff] %v8312_v41  ;;  %10719 = vst [vmem:[#allocation46_spill] sm:$0xff] %v8335_v16 }
 0x113   : > { %10707 = vst [vmem:[#allocation34_spill] sm:$0xff] %v8277_v49  ;;  %6662 = vmatmul.mubr.msk.bf16.gmra.mxu0 %vm873_vm6, %v8277_v49  ;;  %v6016_v59 = vsel %vm551_vm15, 1.0, %v10537_v57  ;;  %v1021_v58 = vpop.f32.mrf.mxu0  ;;  %10723 = vst [vmem:[#allocation50_spill] sm:$0xff] %v8357_v55 }
 0x114   : > { %v791_v3 = vsub.f32 %v6016_v59, %v6040_v7 }
 0x115   : > { %v524_v17 = vpop.permute.xlu1 %523 }
 0x116   : > { %vm552_vm0 = vcmp.eq.s32.totalorder %v524_v17, %v8084_v53 }
 0x117   : > { %v6017_v61 = vsel %vm552_vm0, 1.0, %v10537_v57 }
 0x118   : > { %v8285_v2 = vpack.c.bf16 %v6017_v61, %v6016_v59 }
 0x11a   : > { %10708 = vst [vmem:[#allocation35_spill] sm:$0xff] %v8285_v2  ;;  %v668_v5 = vpop.permute.xlu1 %667 }
 0x11b   : > { %vm696_vm2 = vcmp.eq.s32.totalorder %v668_v5, %v8084_v53  ;;  %v8320_v5 = vpack.c.bf16 %v8312_v41, %v8310_v39 }
 0x11c   : > { %v6041_v15 = vsel %vm696_vm2, 1.0, %v10537_v57 }
 0x11d   : > { %v8292_v19 = vpack.c.bf16 %v6041_v15, %v6040_v7  ;;  %v792_v22 = vsub.f32 %v6017_v61, %v6041_v15  ;;  %10715 = vst [vmem:[#allocation42_spill] sm:$0xff] %v8320_v5  ;;  %v1067_v7 = vpop.permute.xlu0 %1066 }
 0x11f   : > { %10709 = vst [vmem:[#allocation36_spill] sm:$0xff] %v8292_v19  ;;  %v8296_v26 = vpack.c.bf16 %v792_v22, %v791_v3  ;;  %v527_v14 = vpop.permute.xlu1 %526  ;;  %v8330_v3 = vadd.f32 %v6060_v43, %v1021_v58  ;;  %v1485_v22 = vld [vmem:[%s10532_s5] sm:$0xf] }
 0x120   : > { %vm553_vm4 = vcmp.eq.s32.totalorder %v527_v14, %v8084_v53  ;;  %v8337_v14 = vadd.f32 %v6600_v4, %v6060_v43  ;;  %v8359_v4 = vadd.f32 %v6604_v45, %v6060_v43 }
 0x121   : > { %10710 = vst [vmem:[#allocation37_spill] sm:$0xff] %v8296_v26  ;;  %v6018_v11 = vsel %vm553_vm4, 1.0, %v10537_v57  ;;  %6665 = vmatprep.mubr.msk.bf16.mxu0 %vm873_vm6, %v8296_v26  ;;  %10718 = vst [vmem:[#allocation45_spill] sm:$0xff] %v8330_v3 }
 0x122   : > { %v8303_v30 = vpack.c.bf16 %v6019_v24, %v6018_v11  ;;  %10720 = vst [vmem:[#allocation47_spill] sm:$0xff] %v8337_v14  ;;  %10724 = vst [vmem:[#allocation51_spill] sm:$0xff] %v8359_v4 }
 0x124   : > { %10711 = vst [vmem:[#allocation38_spill] sm:$0xff] %v8303_v30  ;;  %v671_v35 = vpop.permute.xlu1 %670 }
 0x125   : > { %vm697_vm5 = vcmp.eq.s32.totalorder %v671_v35, %v8084_v53  ;;  %v8347_v35 = vpack.c.bf16 %v8337_v14, %v8335_v16 }
 0x126   : > { %v6042_v8 = vsel %vm697_vm5, 1.0, %v10537_v57 }
 0x127   : > { %v793_v50 = vsub.f32 %v6018_v11, %v6042_v8  ;;  %10722 = vst [vmem:[#allocation49_spill] sm:$0xff] %v8347_v35 }
 0x128   : > { %v674_v33 = vpop.permute.xlu1 %673 }
 0x129   : > { %vm698_vm7 = vcmp.eq.s32.totalorder %v674_v33, %v8084_v53  ;;  %v8326_v53 = vadd.f32 %v6060_v43, %v1018_v37  ;;  %v8363_v37 = vpack.c.bf16 %v8359_v4, %v8357_v55 }
 0x12a   : > { %v6043_v48 = vsel %vm698_vm7, 1.0, %v10537_v57 }
 0x12b   : > { %v8316_v17 = vpack.c.bf16 %v6043_v48, %v6042_v8  ;;  %v794_v59 = vsub.f32 %v6019_v24, %v6043_v48  ;;  %10717 = vst [vmem:[#allocation44_spill] sm:$0xff] %v8326_v53  ;;  %v1501_v24 = vsel %vm1499_vm9, %v1485_v22, 0  ;;  %v8343_v11 = vpack.c.bf16 %v8330_v3, %v8326_v53  ;;  %10725 = vst [vmem:[#allocation52_spill] sm:$0xff] %v8363_v37 }
 0x12c   : > { %v1069_v61 = vpop.permute.xlu1 %1068 }
 0x12d   : > { %10714 = vst [vmem:[#allocation41_spill] sm:$0xff] %v8316_v17  ;;  %v8322_v15 = vpack.c.bf16 %v794_v59, %v793_v50  ;;  %6609 = vmatprep.subr.bf16.mxu1 %v1069_v61  ;;  %10721 = vst [vmem:[#allocation48_spill] sm:$0xff] %v8343_v11 }
 0x12e   : > { %6610 = vmatpush3.bf16.msra.mxu1 %v1069_v61 }
 0x12f   : > { %10716 = vst [vmem:[#allocation43_spill] sm:$0xff] %v8322_v15  ;;  %6666 = vmatmul.mubr.msk.bf16.gmra.mxu0 %vm873_vm6, %v8322_v15  ;;  %6611 = vmatprep.subr.bf16.mxu1 %v1067_v7 }
 0x130   : > { %6681 = vmatprep.mubr.msk.bf16.mxu0 %vm1486_vm8, %v8320_v5 }
 0x132   : > { %6612 = vmatpush3.bf16.msra.mxu1 %v1067_v7 }
 0x133   : > { %7101 = vmatprep.subr.msk.bf16.mxu1 %vm1499_vm9, %v1485_v22 }
 0x135   : > { %6614 = vmatmul.mubr.msk.bf16.vlgmr.msra.gmra.mxu1 %vm873_vm6, %v8144_v40 }
 0x136   : > { %6617 = vmatprep.mubr.msk.bf16.mxu1 %vm873_vm6, %v8153_v47  ;;  %6670 = vmatpush3.bf16.msra.mxu1 %v1501_v24 }
 0x137   : > { %6682 = vmatmul.mubr.msk.bf16.vlgmr.msra.gmra.mxu0 %vm1486_vm8, %v8347_v35 }
 0x138   : > { %6685 = vmatprep.mubr.msk.bf16.mxu0 %vm1486_vm8, %v8343_v11 }
 0x13d   : > { %6618 = vmatmul.mubr.msk.bf16.gmra.mxu1 %vm873_vm6, %v8167_v1 }
 0x13e   : > { %6621 = vmatprep.mubr.msk.bf16.mxu1 %vm873_vm6, %v8191_v23 }
 0x13f   : > { %6686 = vmatmul.mubr.msk.bf16.gmra.mxu0 %vm1486_vm8, %v8363_v37 }
 0x140   : > { %6729 = vmatprep.mubr.msk.bf16.mxu0 %vm873_vm6, %v8092_v60 }
 0x145   : > { %6622 = vmatmul.mubr.msk.bf16.gmra.mxu1 %vm873_vm6, %v8208_v34 }
 0x146   : > { %6625 = vmatprep.mubr.msk.bf16.mxu1 %vm873_vm6, %v8227_v56 }
 0x14d   : > { %6626 = vmatmul.mubr.msk.bf16.gmra.mxu1 %vm873_vm6, %v8243_v18 }
 0x14e   : > { %6629 = vmatprep.mubr.msk.bf16.mxu1 %vm873_vm6, %v8261_v32 }
 0x155   : > { %6630 = vmatmul.mubr.msk.bf16.gmra.mxu1 %vm873_vm6, %v8277_v49 }
 0x156   : > { %6633 = vmatprep.mubr.msk.bf16.mxu1 %vm873_vm6, %v8296_v26 }
 0x15d   : > { %6634 = vmatmul.mubr.msk.bf16.gmra.mxu1 %vm873_vm6, %v8322_v15 }
 0x15e   : > { %6671 = vmatprep.mubr.msk.bf16.mxu1 %vm1486_vm8, %v8320_v5 }
 0x165   : > { %6672 = vmatmul.mubr.msk.bf16.vlgmr.msra.gmra.mxu1 %vm1486_vm8, %v8347_v35 }
 0x166   : > { %6675 = vmatprep.mubr.msk.bf16.mxu1 %vm1486_vm8, %v8343_v11 }
 0x16d   : > { %6676 = vmatmul.mubr.msk.bf16.gmra.mxu1 %vm1486_vm8, %v8363_v37 }
 0x16e   : > { %6697 = vmatprep.mubr.msk.bf16.mxu1 %vm873_vm6, %v8100_v6 }
 0x17e   : > { %v6647_v12 = vpop.f32.mrf.mxu0 }
 0x180   : > { %v1293_v43 = vpop.f32.mrf.mxu0 }
 0x182   : > { %v6648_v8 = vpop.f32.mrf.mxu0 }
 0x184   : > { %v1296_v33 = vpop.f32.mrf.mxu0 }
 0x18b   : > { %v6651_v45 = vpop.f32.mrf.mxu0 }
 0x18d   : > { %v1309_v48 = vpop.f32.mrf.mxu0 }
 0x18f   : > { %v6652_v50 = vpop.f32.mrf.mxu0 }
 0x191   : > { %v1312_v59 = vpop.f32.mrf.mxu0 }
 0x1a3   : > { %v8397_v61 = vpop.f32.mrf.mxu0 }
 0x1a5   : > { %v8399_v7 = vpop.f32.mrf.mxu0 }
 0x1a7   : > { %v8401_v58 = vpop.f32.mrf.mxu0 }
 0x1a9   : > { %v8403_v22 = vpop.f32.mrf.mxu0 }
 0x1bb   : > { %v8405_v24 = vpop.f32.mrf.mxu0 }
 0x1bd   : > { %v8407_v57 = vpop.f32.mrf.mxu0 }
 0x1bf   : > { %v8409_v52 = vpop.f32.mrf.mxu0 }
 0x1c1   : > { %v8411_v0 = vpop.f32.mrf.mxu0 }
 0x1d3   : > { %v8413_v6 = vpop.f32.mrf.mxu0 }
 0x1d5   : > { %v8415_v60 = vpop.f32.mrf.mxu0 }
 0x1d7   : > { %v8417_v55 = vpop.f32.mrf.mxu0 }
 0x1d9   : > { %v8419_v4 = vpop.f32.mrf.mxu0 }
 0x1ef   : > { %v8421_v53 = vpop.f32.mrf.mxu0 }
 0x1f1   : > { %v8423_v16 = vpop.f32.mrf.mxu0 }
 0x1f3   : > { %v8425_v3 = vpop.f32.mrf.mxu0 }
 0x1f5   : > { %v6615_v14 = vpop.f32.mrf.mxu1  ;;  %v8427_v15 = vpop.f32.mrf.mxu0 }
 0x1f6   : > { %v8437_v34 = vadd.f32 %v6647_v12, %v6615_v14 }
 0x1f7   : > { %v1148_v39 = vpop.f32.mrf.mxu1  ;;  %v6683_v41 = vpop.f32.mrf.mxu0 }
 0x1f8   : > { %v8429_v26 = vadd.f32 %v1293_v43, %v1148_v39  ;;  %10728 = vst [vmem:[#allocation55_spill] sm:$0xff] %v8437_v34  ;;  %v1390_v14 = vmul.f32 %v8437_v34, %v8437_v34 }
 0x1f9   : > { %v6616_v49 = vpop.f32.mrf.mxu1  ;;  %v8431_v32 = vpop.f32.mrf.mxu0 }
 0x1fa   : > { %10726 = vst [vmem:[#allocation53_spill] sm:$0xff] %v8429_v26  ;;  %v8433_v18 = vadd.f32 %v6648_v8, %v6616_v49  ;;  %v1388_v56 = vmul.f32 %v8429_v26, %v8429_v26 }
 0x1fb   : > { %v1151_v23 = vpop.f32.mrf.mxu1  ;;  %v6684_v1 = vpop.f32.mrf.mxu0 }
 0x1fc   : > { %10727 = vst [vmem:[#allocation54_spill] sm:$0xff] %v8433_v18  ;;  %v8439_v47 = vadd.f32 %v1296_v33, %v1151_v23  ;;  %v1413_v40 = vsel %vm1412_vm10, %v1388_v56, 0.0  ;;  %v1391_v39 = vmul.f32 %v8433_v18, %v8433_v18  ;;  %v7194_v18 = vld [vmem:[%s10532_s5 + $0x8] ss:$0 sps:$4 sm:$0x77]  }
 0x1fd   : > { %v6619_v43 = vpop.f32.mrf.mxu1  ;;  %1414 = vadd.xlane.f32.xlu1 %v1413_v40  ;;  %v1609_v37 = vpop.f32.mrf.mxu0 }
 0x1fe   : > { %10729 = vst [vmem:[#allocation56_spill] sm:$0xff] %v8439_v47  ;;  %v1389_v49 = vmul.f32 %v8439_v47, %v8439_v47  ;;  %v1422_v56 = vsel %vm1412_vm10, %v1391_v39, 0.0  ;;  %v8452_v40 = vadd.f32 %v6651_v45, %v6619_v43  ;;  %v1419_v47 = vsel %vm1412_vm10, %v1390_v14, 0.0 }
 0x1ff   : > { %v1164_v8 = vpop.f32.mrf.mxu1  ;;  %v6687_v11 = vpop.f32.mrf.mxu0 }
 0x200   : > { %v8448_v12 = vadd.f32 %v1309_v48, %v1164_v8  ;;  %v1416_v23 = vsel %vm1412_vm10, %v1389_v49, 0.0  ;;  %10731 = vst [vmem:[#allocation58_spill] sm:$0xff] %v8452_v40 }
 0x201   : > { %v6620_v33 = vpop.f32.mrf.mxu1  ;;  %1417 = vadd.xlane.f32.xlu0 %v1416_v23  ;;  %1423 = vadd.xlane.f32.xlu1 %v1422_v56  ;;  %v1622_v35 = vpop.f32.mrf.mxu0 }
 0x202   : > { %10730 = vst [vmem:[#allocation57_spill] sm:$0xff] %v8448_v12  ;;  %v8458_v48 = vadd.f32 %v6652_v50, %v6620_v33  ;;  %v1392_v39 = vmul.f32 %v8448_v12, %v8448_v12  ;;  %v1394_v50 = vmul.f32 %v8452_v40, %v8452_v40  ;;  %v2036_v33 = vshll.u32 %v7194_v18, 16 }
 0x203   : > { %v1167_v5 = vpop.f32.mrf.mxu1  ;;  %v6688_v26 = vpop.f32.mrf.mxu0 }
 0x204   : > { %10732 = vst [vmem:[#allocation59_spill] sm:$0xff] %v8458_v48  ;;  %v8460_v8 = vadd.f32 %v1312_v59, %v1167_v5  ;;  %v1644_v49 = vpack.c.bf16 %v6688_v26, %v6687_v11  ;;  %v1425_v26 = vsel %vm1412_vm10, %v1392_v39, 0.0  ;;  %v1395_v11 = vmul.f32 %v8458_v48, %v8458_v48 }
 0x205   : > { %v6623_v23 = vpop.f32.mrf.mxu1  ;;  %1420 = vadd.xlane.f32.xlu0 %v1419_v47  ;;  %v1625_v45 = vpop.f32.mrf.mxu0  ;;  %v1642_v59 = vpack.c.bf16 %v6684_v1, %v6683_v41  ;;  %v2038_v34 = vrot.slane %v2036_v33, 1 }
 0x206   : > { %10733 = vst [vmem:[#allocation60_spill] sm:$0xff] %v8460_v8  ;;  %v1643_v43 = vpack.c.bf16 %v1625_v45, %v1622_v35  ;;  %6689 = vmatprep.subr.bf16.mxu1 %v1644_v49  ;;  %v1393_v14 = vmul.f32 %v8460_v8, %v8460_v8 }
 0x207   : > { %v1180_v56 = vpop.f32.mrf.mxu1  ;;  %6690 = vmatpush3.bf16.msra.mxu1 %v1644_v49  ;;  %v8476_v49 = vadd.f32 %v8397_v61, %v6623_v23  ;;  %v1641_v61 = vpack.c.bf16 %v1609_v37, %v8431_v32 }
 0x208   : > { %v8469_v5 = vadd.f32 %v8399_v7, %v1180_v56  ;;  %6691 = vmatprep.subr.bf16.mxu1 %v1643_v43  ;;  %v1428_v47 = vsel %vm1412_vm10, %v1393_v14, 0.0  ;;  %v1431_v7 = vsel %vm1412_vm10, %v1394_v50, 0.0  ;;  %v2034_v56 = vshrl.u32 %v7194_v18, 16 }
 0x209   : > { %v6624_v35 = vpop.f32.mrf.mxu1  ;;  %1426 = vadd.xlane.f32.xlu0 %v1425_v26  ;;  %1429 = vadd.xlane.f32.xlu1 %v1428_v47  ;;  %10735 = vst [vmem:[#allocation62_spill] sm:$0xff] %v8476_v49  ;;  %v1434_v26 = vsel %vm1412_vm10, %v1395_v11, 0.0 }
 0x20a   : > { %10734 = vst [vmem:[#allocation61_spill] sm:$0xff] %v8469_v5  ;;  %v8480_v39 = vadd.f32 %v8401_v58, %v6624_v35  ;;  %v1396_v1 = vmul.f32 %v8469_v5, %v8469_v5  ;;  %v1398_v58 = vmul.f32 %v8476_v49, %v8476_v49 }
 0x20b   : > { %v1183_v45 = vpop.f32.mrf.mxu1  ;;  %6692 = vmatpush3.bf16.msra.mxu1 %v1643_v43 }
 0x20c   : > { %10736 = vst [vmem:[#allocation63_spill] sm:$0xff] %v8480_v39  ;;  %v8483_v14 = vadd.f32 %v8403_v22, %v1183_v45  ;;  %6693 = vmatprep.subr.bf16.mxu1 %v1642_v59  ;;  %v2039_v22 = vor.u32 %v2038_v34, %v2034_v56  ;;  %v1437_v50 = vsel %vm1412_vm10, %v1396_v1, 0.0  ;;  %v1399_v32 = vmul.f32 %v8480_v39, %v8480_v39 }
 0x20d   : > { %v6627_v41 = vpop.f32.mrf.mxu1  ;;  %1432 = vadd.xlane.f32.xlu0 %v1431_v7  ;;  %1435 = vadd.xlane.f32.xlu1 %v1434_v26  ;;  %v1443_v34 = vsel %vm1412_vm10, %v1398_v58, 0.0 }
 0x20e   : > { %10737 = vst [vmem:[#allocation64_spill] sm:$0xff] %v8483_v14  ;;  %v1397_v18 = vmul.f32 %v8483_v14, %v8483_v14  ;;  %v8501_v47 = vadd.f32 %v8405_v24, %v6627_v41  ;;  %v1446_v45 = vsel %vm1412_vm10, %v1399_v32, 0.0 }
 0x20f   : > { %v1196_v23 = vpop.f32.mrf.mxu1  ;;  %6694 = vmatpush3.bf16.msra.mxu1 %v1642_v59 }
 0x210   : > { %v8494_v43 = vadd.f32 %v8407_v57, %v1196_v23  ;;  %6695 = vmatprep.subr.bf16.mxu1 %v1641_v61  ;;  %v1440_v33 = vsel %vm1412_vm10, %v1397_v18, 0.0  ;;  %10739 = vst [vmem:[#allocation66_spill] sm:$0xff] %v8501_v47  ;;  %v2079_v57 = vsel %vm10633_vm11, %v2039_v22, 0 }
 0x211   : > { %v6628_v37 = vpop.f32.mrf.mxu1  ;;  %1438 = vadd.xlane.f32.xlu0 %v1437_v50  ;;  %1441 = vadd.xlane.f32.xlu1 %v1440_v33 }
 0x212   : > { %10738 = vst [vmem:[#allocation65_spill] sm:$0xff] %v8494_v43  ;;  %v8506_v35 = vadd.f32 %v8409_v52, %v6628_v37  ;;  %v1400_v24 = vmul.f32 %v8494_v43, %v8494_v43 }
 0x213   : > { %v1199_v11 = vpop.f32.mrf.mxu1  ;;  %6696 = vmatpush3.bf16.msra.mxu1 %v1641_v61 }
 0x214   : > { %10740 = vst [vmem:[#allocation67_spill] sm:$0xff] %v8506_v35  ;;  %v8509_v59 = vadd.f32 %v8411_v0, %v1199_v11  ;;  %7103 = vmatprep.subr.msk.bf16.mxu1 %vm10633_vm11, %v2039_v22  ;;  %v1402_v0 = vmul.f32 %v8501_v47, %v8501_v47  ;;  %v1449_v1 = vsel %vm1412_vm10, %v1400_v24, 0.0  ;;  %v1403_v61 = vmul.f32 %v8506_v35, %v8506_v35 }
 0x215   : > { %v6631_v7 = vpop.f32.mrf.mxu1  ;;  %1444 = vadd.xlane.f32.xlu0 %v1443_v34  ;;  %1447 = vadd.xlane.f32.xlu1 %v1446_v45 }
 0x216   : > { %10741 = vst [vmem:[#allocation68_spill] sm:$0xff] %v8509_v59  ;;  %6698 = vmatmul.mubr.msk.bf16.vlgmr.msra.gmra.mxu1 %vm873_vm6, %v8140_v36  ;;  %v1401_v52 = vmul.f32 %v8509_v59, %v8509_v59  ;;  %v8531_v23 = vadd.f32 %v8413_v6, %v6631_v7  ;;  %v1455_v22 = vsel %vm1412_vm10, %v1402_v0, 0.0  ;;  %v1458_v33 = vsel %vm1412_vm10, %v1403_v61, 0.0 }
 0x217   : > { %v1212_v56 = vpop.f32.mrf.mxu1  ;;  %6701 = vmatprep.mubr.msk.bf16.mxu1 %vm873_vm6, %v8148_v44  ;;  %6754 = vmatpush3.bf16.msra.mxu1 %v2079_v57 }
 0x218   : > { %v8524_v26 = vadd.f32 %v8415_v60, %v1212_v56  ;;  %v1452_v41 = vsel %vm1412_vm10, %v1401_v52, 0.0  ;;  %10743 = vst [vmem:[#allocation70_spill] sm:$0xff] %v8531_v23 }
 0x219   : > { %v6632_v18 = vpop.f32.mrf.mxu1  ;;  %1450 = vadd.xlane.f32.xlu0 %v1449_v1  ;;  %1453 = vadd.xlane.f32.xlu1 %v1452_v41 }
 0x21a   : > { %10742 = vst [vmem:[#allocation69_spill] sm:$0xff] %v8524_v26  ;;  %v8535_v50 = vadd.f32 %v8417_v55, %v6632_v18  ;;  %v1404_v32 = vmul.f32 %v8524_v26, %v8524_v26  ;;  %v1406_v55 = vmul.f32 %v8531_v23, %v8531_v23 }
 0x21b   : > { %v1215_v58 = vpop.f32.mrf.mxu1 }
 0x21c   : > { %10744 = vst [vmem:[#allocation71_spill] sm:$0xff] %v8535_v50  ;;  %v8538_v60 = vadd.f32 %v8419_v4, %v1215_v58  ;;  %v1461_v34 = vsel %vm1412_vm10, %v1404_v32, 0.0  ;;  %v1407_v45 = vmul.f32 %v8535_v50, %v8535_v50  ;;  %v1467_v56 = vsel %vm1412_vm10, %v1406_v55, 0.0 }
 0x21d   : > { %v6635_v37 = vpop.f32.mrf.mxu1  ;;  %1456 = vadd.xlane.f32.xlu0 %v1455_v22  ;;  %1459 = vadd.xlane.f32.xlu1 %v1458_v33 }
 0x21e   : > { %10745 = vst [vmem:[#allocation72_spill] sm:$0xff] %v8538_v60  ;;  %6702 = vmatmul.mubr.msk.bf16.gmra.mxu1 %vm873_vm6, %v8165_v62  ;;  %v1405_v6 = vmul.f32 %v8538_v60, %v8538_v60  ;;  %v8559_v7 = vadd.f32 %v8421_v53, %v6635_v37  ;;  %v1470_v1 = vsel %vm1412_vm10, %v1407_v45, 0.0 }
 0x21f   : > { %v1228_v11 = vpop.f32.mrf.mxu1  ;;  %6705 = vmatprep.mubr.msk.bf16.mxu1 %vm873_vm6, %v8187_v21 }
 0x220   : > { %v8552_v4 = vadd.f32 %v8423_v16, %v1228_v11  ;;  %v1464_v57 = vsel %vm1412_vm10, %v1405_v6, 0.0  ;;  %10747 = vst [vmem:[#allocation74_spill] sm:$0xff] %v8559_v7  ;;  %v1410_v58 = vmul.f32 %v8559_v7, %v8559_v7 }
 0x221   : > { %v6636_v24 = vpop.f32.mrf.mxu1  ;;  %1462 = vadd.xlane.f32.xlu0 %v1461_v34  ;;  %1465 = vadd.xlane.f32.xlu1 %v1464_v57 }
 0x222   : > { %10746 = vst [vmem:[#allocation73_spill] sm:$0xff] %v8552_v4  ;;  %v8563_v0 = vadd.f32 %v8425_v3, %v6636_v24  ;;  %v1408_v41 = vmul.f32 %v8552_v4, %v8552_v4  ;;  %v1479_v37 = vsel %vm1412_vm10, %v1410_v58, 0.0  ;;  %v402_v58 = vld [vmem:[%s8594_s25 + $0x28] sm:$0xff]  ;;  %v8759_v4 = vld [vmem:[%s10533_s6 + $0x1] ss:$0 sm:$0xff] }
 0x223   : > { %v1231_v52 = vpop.f32.mrf.mxu1 }
 0x224   : > { %10748 = vst [vmem:[#allocation75_spill] sm:$0xff] %v8563_v0  ;;  %v8566_v16 = vadd.f32 %v8427_v15, %v1231_v52  ;;  %v1473_v15 = vsel %vm1412_vm10, %v1408_v41, 0.0  ;;  %v1411_v22 = vmul.f32 %v8563_v0, %v8563_v0 }
 0x225   : > { %1468 = vadd.xlane.f32.xlu0 %v1467_v56  ;;  %1471 = vadd.xlane.f32.xlu1 %v1470_v1  ;;  %v6673_v61 = vpop.f32.mrf.mxu1  ;;  %v397_v56 = vld [vmem:[%s8594_s25] sm:$0xff]  ;;  %v398_v1 = vld [vmem:[%s8594_s25 + $0x8] sm:$0xff] }
 0x226   : > { %10749 = vst [vmem:[#allocation76_spill] sm:$0xff] %v8566_v16  ;;  %6706 = vmatmul.mubr.msk.bf16.gmra.mxu1 %vm873_vm6, %v8206_v31  ;;  %v1409_v53 = vmul.f32 %v8566_v16, %v8566_v16  ;;  %v1482_v6 = vsel %vm1412_vm10, %v1411_v22, 0.0  ;;  %v8602_v41 = vpack.c.bf16 %v398_v1, %v397_v56  ;;  %v411_v1 = vld [vmem:[%s8594_s25 + $0x70] sm:$0xff] }
 0x227   : > { %v1537_v18 = vpop.f32.mrf.mxu1  ;;  %6709 = vmatprep.mubr.msk.bf16.mxu1 %vm873_vm6, %v8225_v54 }
 0x228   : > { %v1476_v3 = vsel %vm1412_vm10, %v1409_v53, 0.0  ;;  %10750 = vst [vmem:[#allocation77_spill] sm:$0xff] %v8602_v41 }
 0x229   : > { %1474 = vadd.xlane.f32.xlu0 %v1473_v15  ;;  %1477 = vadd.xlane.f32.xlu1 %v1476_v3  ;;  %v6674_v33 = vpop.f32.mrf.mxu1  ;;  %v400_v15 = vld [vmem:[%s8594_s25 + $0x18] sm:$0xff]  ;;  %v401_v3 = vld [vmem:[%s8594_s25 + $0x20] sm:$0xff] }
 0x22a   : > { %v1638_v52 = vpack.c.bf16 %v6674_v33, %v6673_v61  ;;  %v399_v61 = vld [vmem:[%s8594_s25 + $0x10] sm:$0xff] }
 0x22b   : > { %v1540_v32 = vpop.f32.mrf.mxu1  ;;  %v8612_v22 = vpack.c.bf16 %v400_v15, %v399_v61  ;;  %v403_v33 = vld [vmem:[%s8594_s25 + $0x30] sm:$0xff]  ;;  %v413_v61 = vld [vmem:[%s8594_s25 + $0x80] sm:$0xff]  ;;  %v414_v15 = vld [vmem:[%s8594_s25 + $0x88] sm:$0xff] }
 0x22c   : > { %v1637_v53 = vpack.c.bf16 %v1540_v32, %v1537_v18  ;;  %v8614_v18 = vpack.c.bf16 %v402_v58, %v401_v3  ;;  %v404_v32 = vld [vmem:[%s8594_s25 + $0x38] sm:$0xff]  ;;  %v8662_v58 = vpack.c.bf16 %v414_v15, %v413_v61 }
 0x22d   : > { %1480 = vadd.xlane.f32.xlu0 %v1479_v37  ;;  %1483 = vadd.xlane.f32.xlu1 %v1482_v6  ;;  %v6677_v11 = vpop.f32.mrf.mxu1  ;;  %10751 = vst [vmem:[#allocation78_spill] sm:$0xff] %v8612_v22  ;;  %v405_v37 = vld [vmem:[%s8594_s25 + $0x40] sm:$0xff]  ;;  %v406_v6 = vld [vmem:[%s8594_s25 + $0x48] sm:$0xff] }
 0x22e   : > { %6710 = vmatmul.mubr.msk.bf16.gmra.mxu1 %vm873_vm6, %v8241_v13  ;;  %10752 = vst [vmem:[#allocation79_spill] sm:$0xff] %v8614_v18  ;;  %10758 = vst [vmem:[#allocation85_spill] sm:$0xff] %v8662_v58 }
 0x22f   : > { %v1553_v55 = vpop.f32.mrf.mxu1  ;;  %6713 = vmatprep.mubr.msk.bf16.mxu1 %vm873_vm6, %v8259_v28 }
 0x231   : > { %v6678_v34 = vpop.f32.mrf.mxu1 }
 0x232   : > { %v1640_v57 = vpack.c.bf16 %v6678_v34, %v6677_v11  ;;  %v8628_v11 = vpack.c.bf16 %v404_v32, %v403_v33  ;;  %v407_v34 = vld [vmem:[%s8594_s25 + $0x50] sm:$0xff]  ;;  %v416_v32 = vld [vmem:[%s8594_s25 + $0x98] sm:$0xff] }
 0x233   : > { %v1556_v45 = vpop.f32.mrf.mxu1  ;;  %v415_v33 = vld [vmem:[%s8594_s25 + $0x90] sm:$0xff] }
 0x234   : > { %v1639_v24 = vpack.c.bf16 %v1556_v45, %v1553_v55  ;;  %6721 = vmatprep.subr.bf16.mxu0 %v1640_v57  ;;  %10753 = vst [vmem:[#allocation80_spill] sm:$0xff] %v8628_v11  ;;  %v8630_v55 = vpack.c.bf16 %v406_v6, %v405_v37  ;;  %v409_v45 = vld [vmem:[%s8594_s25 + $0x60] sm:$0xff]  ;;  %v418_v6 = vld [vmem:[%s8594_s25 + $0xa8] sm:$0xff] }
 0x235   : > { %6722 = vmatpush3.bf16.msra.mxu0 %v1640_v57  ;;  %v408_v57 = vld [vmem:[%s8594_s25 + $0x58] sm:$0xff]  ;;  %v417_v37 = vld [vmem:[%s8594_s25 + $0xa0] sm:$0xff] }
 0x236   : > { %6714 = vmatmul.mubr.msk.bf16.gmra.mxu1 %vm873_vm6, %v8275_v46  ;;  %6723 = vmatprep.subr.bf16.mxu0 %v1639_v24  ;;  %10754 = vst [vmem:[#allocation81_spill] sm:$0xff] %v8630_v55 }
 0x237   : > { %6717 = vmatprep.mubr.msk.bf16.mxu1 %vm873_vm6, %v8292_v19  ;;  %v10763_v19 = vlaneseq }
 0x239   : > { %6724 = vmatpush3.bf16.msra.mxu0 %v1639_v24  ;;  %v410_v24 = vld [vmem:[%s8594_s25 + $0x68] sm:$0xff]  ;;  %v8733_v46 = vshrl.u32 %v10763_v19, 7 }
 0x23a   : > { %6725 = vmatprep.subr.bf16.mxu0 %v1638_v52  ;;  %v8646_v56 = vpack.c.bf16 %v410_v24, %v409_v45  ;;  %v419_v45 = vld [vmem:[%s8594_s25 + $0xb0] sm:$0xff]  ;;  %v420_v24 = vld [vmem:[%s8594_s25 + $0xb8] sm:$0xff] }
 0x23b   : > { %10764 = vst [vmem:[#allocation89_spill] sm:$0xff] %v8733_v46  ;;  %v8743_v13 = vsub.s32 0, %v8733_v46 }
 0x23c   : > { %10756 = vst [vmem:[#allocation83_spill] sm:$0xff] %v8646_v56 }
 0x23d   : > { %6726 = vmatpush3.bf16.msra.mxu0 %v1638_v52  ;;  %v8644_v52 = vpack.c.bf16 %v408_v57, %v407_v34  ;;  %v8676_v34 = vpack.c.bf16 %v416_v32, %v415_v33  ;;  %v8678_v57 = vpack.c.bf16 %v418_v6, %v417_v37  ;;  %10765 = vst [vmem:[#allocation90_spill] sm:$0xff] %v8743_v13 }
 0x23e   : > { %6718 = vmatmul.mubr.msk.bf16.gmra.mxu1 %vm873_vm6, %v8316_v17  ;;  %6727 = vmatprep.subr.bf16.mxu0 %v1637_v53 }
 0x23f   : > { %6755 = vmatprep.mubr.msk.bf16.mxu1 %vm10632_vm12, %v8602_v41  ;;  %10755 = vst [vmem:[#allocation82_spill] sm:$0xff] %v8644_v52  ;;  %10759 = vst [vmem:[#allocation86_spill] sm:$0xff] %v8676_v34 }
 0x240   : > { %10760 = vst [vmem:[#allocation87_spill] sm:$0xff] %v8678_v57 }
 0x241   : > { %6728 = vmatpush3.bf16.msra.mxu0 %v1637_v53  ;;  %v412_v53 = vld [vmem:[%s8594_s25 + $0x78] sm:$0xff]  ;;  %s5995_s25 = sshll.u32 %s7949_s23, 1 }
 0x242   : > { %v8660_v3 = vpack.c.bf16 %v412_v53, %v411_v1  ;;  %v8690_v1 = vpack.c.bf16 %v420_v24, %v419_v45  ;;  %v7195_v53 = vld [vmem:[%s10532_s5 + $0x8] sm:$0x7c]   ;;  %v10762_v45 = vmov 0   ;;  %s387_s27 = scalar_lea.vmem %s10530_s3, %s5995_s25  ;;  %s7841_s25 = smov [#allocation2]  }
 0x243   : > { %v2430_v61 = vshrl.u32 %v7195_v53, 16  ;;  %v2433_v15 = vshll.u32 %v7195_v53, 16  ;;  %s7777_s26 = sshll.u32 %s7841_s25, 4  ;;  %s7778_s26 = int_to_ptr.vmem [resolvable:$false] %s7777_s26 }
 0x244   : > { %6730 = vmatmul.mubr.msk.bf16.vlgmr.msra.gmra.mxu0 %vm873_vm6, %v8115_v20  ;;  %10757 = vst [vmem:[#allocation84_spill] sm:$0xff] %v8660_v3  ;;  %10761 = vst [vmem:[#allocation88_spill] sm:$0xff] %v8690_v1  ;;  %p7780_p0 = scmp.lt.s32.totalorder %s10483_s16, %s7778_s26 }
 0x245   : > { %6733 = vmatprep.mubr.msk.bf16.mxu0 %vm873_vm6, %v8132_v29  ;;  %v2432_v33 = vrot.slane %v2430_v61, 2  ;;  %v2435_v32 = vrot.slane %v2433_v15, 3 }
 0x246   : > { %6756 = vmatmul.mubr.msk.bf16.vlgmr.msra.gmra.mxu1 %vm10632_vm12, %v8612_v22 }
 0x247   : > { %6759 = vmatprep.mubr.msk.bf16.mxu1 %vm10632_vm12, %v8614_v18  ;;  %v2436_v37 = vor.u32 %v2435_v32, %v2432_v33 }
 0x249   : > { %7104 = vmatprep.subr.msk.bf16.mxu0 %vm1499_vm9, %v2436_v37  ;;  %v2474_v6 = vsel %vm1499_vm9, %v2436_v37, 0 }
 0x24a   : > { %6780 = vmatpush3.bf16.msra.mxu0 %v2474_v6 }
 0x24b   : > { %3242 = vmatprep.subr.bf16.mxu0 %v10762_v45 }
 0x24c   : > { %6734 = vmatmul.mubr.msk.bf16.gmra.mxu0 %vm873_vm6, %v8160_v51 }
 0x24d   : > { %6737 = vmatprep.mubr.msk.bf16.mxu0 %vm873_vm6, %v8180_v10 }
 0x24e   : > { %6760 = vmatmul.mubr.msk.bf16.gmra.mxu1 %vm10632_vm12, %v8628_v11 }
 0x24f   : > { %6763 = vmatprep.mubr.msk.bf16.mxu1 %vm10632_vm12, %v8630_v55 }
 0x254   : > { %6738 = vmatmul.mubr.msk.bf16.gmra.mxu0 %vm873_vm6, %v8201_v27 }
 0x255   : > { %6741 = vmatprep.mubr.msk.bf16.mxu0 %vm873_vm6, %v8217_v42  ;;  %v1975_v42 = vld [vmem:[%s10532_s5 + $0x8] sm:$0x1] }
 0x256   : > { %6764 = vmatmul.mubr.msk.bf16.gmra.mxu1 %vm10632_vm12, %v8644_v52  ;;  %v1976_v10 = vunpack.c.l.bf16 %v1975_v42 }
 0x257   : > { %6767 = vmatprep.mubr.msk.bf16.mxu1 %vm10632_vm12, %v8646_v56 }
 0x258   : > { %v8750_v19 = vrot.slane %v1976_v10, %v8743_v13 }
 0x25c   : > { %6742 = vmatmul.mubr.msk.bf16.gmra.mxu0 %vm873_vm6, %v8236_v63 }
 0x25d   : > { %6745 = vmatprep.mubr.msk.bf16.mxu0 %vm873_vm6, %v8251_v25 }
 0x25e   : > { %6768 = vmatmul.mubr.msk.bf16.gmra.mxu1 %vm10632_vm12, %v8660_v3 }
 0x25f   : > { %6771 = vmatprep.mubr.msk.bf16.mxu1 %vm10632_vm12, %v8662_v58 }
 0x264   : > { %6746 = vmatmul.mubr.msk.bf16.gmra.mxu0 %vm873_vm6, %v8268_v38 }
 0x265   : > { %6749 = vmatprep.mubr.msk.bf16.mxu0 %vm873_vm6, %v8285_v2 }
 0x266   : > { %6772 = vmatmul.mubr.msk.bf16.gmra.mxu1 %vm10632_vm12, %v8676_v34 }
 0x267   : > { %6775 = vmatprep.mubr.msk.bf16.mxu1 %vm10632_vm12, %v8678_v57 }
 0x26c   : > { %6750 = vmatmul.mubr.msk.bf16.gmra.mxu0 %vm873_vm6, %v8303_v30 }
 0x26e   : > { %6776 = vmatmul.mubr.msk.bf16.gmra.mxu1 %vm10632_vm12, %v8690_v1 }
 0x286   : > { %v1415_v55 = vpop.xlane.xlu1 %1414 }
 0x287   : > { %v1981_v42 = vmul.f32 %v8750_v19, %v1415_v55 }
 0x28a   : > { %v1418_v15 = vpop.xlane.xlu0 %1417  ;;  %v1424_v2 = vpop.xlane.xlu1 %1423 }
 0x28b   : > { %v1984_v7 = vmul.f32 %v8750_v19, %v1424_v2 }
 0x28e   : > { %v1421_v6 = vpop.xlane.xlu0 %1420 }
 0x28f   : > { %v1983_v62 = vmul.f32 %v8750_v19, %v1421_v6 }
 0x292   : > { %v1427_v18 = vpop.xlane.xlu0 %1426  ;;  %v1430_v17 = vpop.xlane.xlu1 %1429 }
 0x293   : > { %v1985_v14 = vmul.f32 %v8750_v19, %v1427_v18 }
 0x296   : > { %v1433_v25 = vpop.xlane.xlu0 %1432  ;;  %v1436_v51 = vpop.xlane.xlu1 %1435 }
 0x29a   : > { %v1439_v54 = vpop.xlane.xlu0 %1438  ;;  %v1442_v44 = vpop.xlane.xlu1 %1441 }
 0x29e   : > { %v1445_v36 = vpop.xlane.xlu0 %1444 }
 0x2a2   : > { %v1451_v40 = vpop.xlane.xlu0 %1450 }
 0x2d6   : > { %v6699_v24 = vpop.f32.mrf.mxu1 }
 0x2d8   : > { %v1715_v57 = vpop.f32.mrf.mxu1 }
 0x2da   : > { %v6700_v34 = vpop.f32.mrf.mxu1 }
 0x2dc   : > { %v1718_v1 = vpop.f32.mrf.mxu1 }
 0x2de   : > { %v8702_v58 = vpop.f32.mrf.mxu1 }
 0x2e0   : > { %v8704_v3 = vpop.f32.mrf.mxu1 }
 0x2e2   : > { %v8706_v56 = vpop.f32.mrf.mxu1 }
 0x2e4   : > { %v8708_v53 = vpop.f32.mrf.mxu1 }
 0x2e6   : > { %v8710_v61 = vpop.f32.mrf.mxu1 }
 0x2e8   : > { %v8712_v33 = vpop.f32.mrf.mxu1 }
 0x2ea   : > { %v8714_v32 = vpop.f32.mrf.mxu1 }
 0x2ec   : > { %v8716_v37 = vpop.f32.mrf.mxu1 }
 0x2ee   : > { %v8718_v52 = vpop.f32.mrf.mxu1 }
 0x2f0   : > { %v8720_v11 = vpop.f32.mrf.mxu1 }
 0x2f2   : > { %v8722_v30 = vpop.f32.mrf.mxu1 }
 0x2f4   : > { %v8724_v22 = vpop.f32.mrf.mxu1 }
 0x2f6   : > { %v8726_v38 = vpop.f32.mrf.mxu1 }
 0x2f8   : > { %v8728_v41 = vpop.f32.mrf.mxu1 }
 0x2fa   : > { %v8730_v63 = vpop.f32.mrf.mxu1 }
 0x2fc   : > { %v8738_v27 = vpop.f32.mrf.mxu1 }
 0x2fe   : > { %v8740_v28 = vpop.f32.mrf.mxu1 }
 0x300   : > { %v8745_v31 = vpop.f32.mrf.mxu1 }
 0x302   : > { %v8747_v29 = vpop.f32.mrf.mxu1 }
 0x304   : > { %v8752_v20 = vpop.f32.mrf.mxu1  ;;  %v6731_v21 = vpop.f32.mrf.mxu0 }
 0x305   : > { %v1889_v60 = vadd.f32 %v6731_v21, %v6699_v24  ;;  %v1448_v24 = vpop.xlane.xlu1 %1447 }
 0x306   : > { %v1880_v26 = vpop.f32.mrf.mxu0  ;;  %v6757_v50 = vpop.f32.mrf.mxu1 }
 0x307   : > { %v1881_v23 = vadd.f32 %v1880_v26, %v1715_v57  ;;  %v2007_v16 = vadd.f32 %v1983_v62, %v1889_v60  ;;  %v1982_v57 = vmul.f32 %v8750_v19, %v1418_v15 }
 0x308   : > { %v6732_v10 = vpop.f32.mrf.mxu0  ;;  %v2115_v0 = vpop.f32.mrf.mxu1 }
 0x309   : > { %v2212_v8 = vadd.f32 %v6757_v50, %v2007_v16  ;;  %v1892_v6 = vadd.f32 %v6732_v10, %v6700_v34  ;;  %v2005_v12 = vadd.f32 %v1981_v42, %v1881_v23  ;;  %v1989_v10 = vmul.f32 %v8750_v19, %v1439_v54 }
 0x30a   : > { %v1883_v48 = vpop.f32.mrf.mxu0  ;;  %v6758_v21 = vpop.f32.mrf.mxu1 }
 0x30b   : > { %v8763_v55 = vadd.f32 %v8759_v4, %v2212_v8  ;;  %v2210_v62 = vadd.f32 %v2115_v0, %v2005_v12  ;;  %v1884_v26 = vadd.f32 %v1883_v48, %v1718_v1  ;;  %v2008_v60 = vadd.f32 %v1984_v7, %v1892_v6  ;;  %v1454_v6 = vpop.xlane.xlu1 %1453 }
 0x30c   : > { %v6735_v5 = vpop.f32.mrf.mxu0  ;;  %v2118_v39 = vpop.f32.mrf.mxu1  ;;  %v1986_v8 = vmul.f32 %v8750_v19, %v1430_v17  ;;  %v1987_v12 = vmul.f32 %v8750_v19, %v1433_v25  ;;  %v1988_v48 = vmul.f32 %v8750_v19, %v1436_v51 }
 0x30d   : > { %v2264_v2 = vsub.f32 0.0, %v8763_v55  ;;  %v8769_v23 = vadd.f32 %v8759_v4, %v2210_v62  ;;  %v2213_v50 = vadd.f32 %v6758_v21, %v2008_v60  ;;  %v1905_v16 = vadd.f32 %v6735_v5, %v8702_v58  ;;  %v1457_v21 = vpop.xlane.xlu0 %1456 }
 0x30e   : > { %v2006_v7 = vadd.f32 %v1982_v57, %v1884_v26  ;;  %v1896_v0 = vpop.f32.mrf.mxu0  ;;  %v6761_v34 = vpop.f32.mrf.mxu1  ;;  %v8782_v5 = vmul.f32 %v8750_v19, %v1442_v44  ;;  %v1991_v57 = vmul.f32 %v8750_v19, %v1445_v36 }
 0x30f   : > { %v2290_v18 = vmul.f32 1.442695, %v2264_v2  ;;  %v2262_v1 = vsub.f32 0.0, %v8769_v23  ;;  %v8777_v15 = vadd.f32 %v8759_v4, %v2213_v50  ;;  %v1897_v42 = vadd.f32 %v1896_v0, %v8704_v3 }
 0x310   : > { %v2211_v17 = vadd.f32 %v2118_v39, %v2006_v7  ;;  %v2011_v25 = vadd.f32 %v1987_v12, %v1905_v16  ;;  %v6736_v58 = vpop.f32.mrf.mxu0  ;;  %v2131_v51 = vpop.f32.mrf.mxu1  ;;  %v1992_v7 = vmul.f32 %v8750_v19, %v1448_v24 }
 0x311   : > { %7205 = vpow2.f32 %v2290_v18  ;;  %v2286_v62 = vmul.f32 1.442695, %v2262_v1  ;;  %v2265_v26 = vsub.f32 0.0, %v8777_v15  ;;  %v1908_v60 = vadd.f32 %v6736_v58, %v8706_v56 }
 0x312   : > { %v8788_v3 = vadd.f32 %v8759_v4, %v2211_v17  ;;  %v2216_v54 = vadd.f32 %v6761_v34, %v2011_v25  ;;  %v2009_v44 = vadd.f32 %v1985_v14, %v1897_v42  ;;  %v1899_v2 = vpop.f32.mrf.mxu0  ;;  %v6762_v39 = vpop.f32.mrf.mxu1  ;;  %v8798_v17 = vmul.f32 %v8750_v19, %v1451_v40 }
 0x313   : > { %7207 = vpow2.f32 %v2286_v62  ;;  %v2292_v50 = vmul.f32 1.442695, %v2265_v26  ;;  %v1900_v16 = vadd.f32 %v1899_v2, %v8708_v53  ;;  %v2012_v12 = vadd.f32 %v1988_v48, %v1908_v60  ;;  %v1460_v62 = vpop.xlane.xlu1 %1459 }
 0x314   : > { %v2263_v0 = vsub.f32 0.0, %v8788_v3  ;;  %v8794_v56 = vadd.f32 %v8759_v4, %v2216_v54  ;;  %v2214_v36 = vadd.f32 %v2131_v51, %v2009_v44  ;;  %v6739_v18 = vpop.f32.mrf.mxu0  ;;  %v2134_v1 = vpop.f32.mrf.mxu1  ;;  %v8809_v40 = vmul.f32 %v8750_v19, %v1454_v6 }
 0x315   : > { %7209 = vpow2.f32 %v2292_v50  ;;  %v2217_v34 = vadd.f32 %v6762_v39, %v2012_v12  ;;  %v1921_v14 = vadd.f32 %v6739_v18, %v8710_v61  ;;  %v2010_v42 = vadd.f32 %v1986_v8, %v1900_v16  ;;  %v1463_v51 = vpop.xlane.xlu0 %1462 }
 0x316   : > { %v2288_v53 = vmul.f32 1.442695, %v2263_v0  ;;  %v2268_v48 = vsub.f32 0.0, %v8794_v56  ;;  %v8802_v24 = vadd.f32 %v8759_v4, %v2214_v36  ;;  %v1912_v25 = vpop.f32.mrf.mxu0  ;;  %v6765_v58 = vpop.f32.mrf.mxu1 }
 0x317   : > { %v8805_v26 = vadd.f32 %v8759_v4, %v2217_v34  ;;  %v2215_v60 = vadd.f32 %v2134_v1, %v2010_v42  ;;  %v1913_v61 = vadd.f32 %v1912_v25, %v8712_v33  ;;  %v2015_v8 = vadd.f32 %v1991_v57, %v1921_v14 }
 0x318   : > { %7211 = vpow2.f32 %v2288_v53  ;;  %v2298_v54 = vmul.f32 1.442695, %v2268_v48  ;;  %v2266_v44 = vsub.f32 0.0, %v8802_v24  ;;  %v6740_v2 = vpop.f32.mrf.mxu0  ;;  %v2147_v39 = vpop.f32.mrf.mxu1  ;;  %v1995_v33 = vmul.f32 %v8750_v19, %v1457_v21 }
 0x319   : > { %v2269_v50 = vsub.f32 0.0, %v8805_v26  ;;  %v8814_v16 = vadd.f32 %v8759_v4, %v2215_v60  ;;  %v2220_v12 = vadd.f32 %v6765_v58, %v2015_v8  ;;  %v1924_v0 = vadd.f32 %v6740_v2, %v8714_v32  ;;  %v8824_v58 = vpop.xlane.xlu1 %1465 }
 0x31a   : > { %7213 = vpow2.f32 %v2298_v54  ;;  %v2294_v57 = vmul.f32 1.442695, %v2266_v44  ;;  %v2013_v6 = vadd.f32 %v1989_v10, %v1913_v61  ;;  %v1915_v36 = vpop.f32.mrf.mxu0  ;;  %v6766_v18 = vpop.f32.mrf.mxu1  ;;  %v1996_v53 = vmul.f32 %v8750_v19, %v1460_v62 }
 0x31b   : > { %v2300_v1 = vmul.f32 1.442695, %v2269_v50  ;;  %v2267_v34 = vsub.f32 0.0, %v8814_v16  ;;  %v8820_v14 = vadd.f32 %v8759_v4, %v2220_v12  ;;  %v1916_v42 = vadd.f32 %v1915_v36, %v8716_v37  ;;  %v1469_v10 = vpop.xlane.xlu0 %1468 }
 0x31c   : > { %7215 = vpow2.f32 %v2294_v57  ;;  %v2218_v48 = vadd.f32 %v2147_v39, %v2013_v6  ;;  %v2016_v32 = vadd.f32 %v1992_v7, %v1924_v0  ;;  %v6743_v25 = vpop.f32.mrf.mxu0  ;;  %v2150_v21 = vpop.f32.mrf.mxu1  ;;  %v8829_v44 = vmul.f32 %v8750_v19, %v1463_v51 }
 0x31d   : > { %7217 = vpow2.f32 %v2300_v1  ;;  %v2296_v60 = vmul.f32 1.442695, %v2267_v34  ;;  %v2272_v61 = vsub.f32 0.0, %v8820_v14  ;;  %v1937_v8 = vadd.f32 %v6743_v25, %v8718_v52 }
 0x31e   : > { %v7206_v54 = vpop.eup %7205  ;;  %v8832_v37 = vadd.f32 %v8759_v4, %v2218_v48  ;;  %v2221_v62 = vadd.f32 %v6766_v18, %v2016_v32  ;;  %v2014_v7 = vadd.f32 %v8782_v5, %v1916_v42  ;;  %v1928_v2 = vpop.f32.mrf.mxu0  ;;  %v1999_v18 = vmul.f32 %v8750_v19, %v1469_v10 }
 0x31f   : > { %v6769_v39 = vpop.f32.mrf.mxu1  ;;  %v2336_v50 = vadd.f32 1.0, %v7206_v54  ;;  %7219 = vpow2.f32 %v2296_v60  ;;  %v2306_v12 = vmul.f32 1.442695, %v2272_v61  ;;  %v1929_v0 = vadd.f32 %v1928_v2, %v8720_v11 }
 0x320   : > { %v7208_v57 = vpop.eup %7207  ;;  %v2270_v52 = vsub.f32 0.0, %v8832_v37  ;;  %v8838_v6 = vadd.f32 %v8759_v4, %v2221_v62  ;;  %v2219_v51 = vadd.f32 %v2150_v21, %v2014_v7  ;;  %v2019_v36 = vadd.f32 %v1995_v33, %v1937_v8  ;;  %v6744_v1 = vpop.f32.mrf.mxu0 }
 0x321   : > { %v2163_v34 = vpop.f32.mrf.mxu1  ;;  %v2334_v5 = vadd.f32 1.0, %v7208_v57  ;;  %v1940_v42 = vadd.f32 %v6744_v1, %v8722_v30  ;;  %v2017_v48 = vadd.f32 %v8798_v17, %v1929_v0  ;;  %7221 = vrcp.f32 %v2336_v50  ;;  %v1472_v33 = vpop.xlane.xlu1 %1471 }
 0x322   : > { %v7210_v32 = vpop.eup %7209  ;;  %v2302_v11 = vmul.f32 1.442695, %v2270_v52  ;;  %v2273_v25 = vsub.f32 0.0, %v8838_v6  ;;  %v8845_v60 = vadd.f32 %v8759_v4, %v2219_v51  ;;  %v1931_v61 = vpop.f32.mrf.mxu0  ;;  %7223 = vpow2.f32 %v2306_v12 }
 0x323   : > { %v6770_v21 = vpop.f32.mrf.mxu1  ;;  %v2337_v8 = vadd.f32 1.0, %v7210_v32  ;;  %v2224_v54 = vadd.f32 %v6769_v39, %v2019_v36  ;;  %v2222_v10 = vadd.f32 %v2163_v34, %v2017_v48  ;;  %v1932_v17 = vadd.f32 %v1931_v61, %v8724_v22  ;;  %v1475_v22 = vpop.xlane.xlu0 %1474 }
 0x324   : > { %7225 = vpow2.f32 %v2302_v11  ;;  %v2308_v62 = vmul.f32 1.442695, %v2273_v25  ;;  %v2271_v30 = vsub.f32 0.0, %v8845_v60  ;;  %v6747_v7 = vpop.f32.mrf.mxu0  ;;  %v2020_v52 = vadd.f32 %v1996_v53, %v1940_v42 }
 0x325   : > { %v2166_v2 = vpop.f32.mrf.mxu1  ;;  %v7212_v50 = vpop.eup %7211  ;;  %7227 = vrcp.f32 %v2334_v5  ;;  %v8850_v0 = vadd.f32 %v8759_v4, %v2224_v54  ;;  %v8853_v57 = vadd.f32 %v8759_v4, %v2222_v10  ;;  %v1953_v51 = vadd.f32 %v6747_v7, %v8726_v38 }
 0x326   : > { %v2335_v12 = vadd.f32 1.0, %v7212_v50  ;;  %7229 = vpow2.f32 %v2308_v62  ;;  %v2304_v39 = vmul.f32 1.442695, %v2271_v30  ;;  %v1944_v36 = vpop.f32.mrf.mxu0  ;;  %v2225_v32 = vadd.f32 %v6770_v21, %v2020_v52  ;;  %v1478_v30 = vpop.xlane.xlu1 %1477 }
 0x327   : > { %v6773_v1 = vpop.f32.mrf.mxu1  ;;  %v7214_v34 = vpop.eup %7213  ;;  %v2276_v48 = vsub.f32 0.0, %v8850_v0  ;;  %v2274_v5 = vsub.f32 0.0, %v8853_v57  ;;  %v2018_v11 = vadd.f32 %v8809_v40, %v1932_v17  ;;  %7231 = vrcp.f32 %v2337_v8 }
 0x328   : > { %v2340_v25 = vadd.f32 1.0, %v7214_v34  ;;  %v1945_v53 = vadd.f32 %v1944_v36, %v8728_v41  ;;  %v6748_v42 = vpop.f32.mrf.mxu0  ;;  %v2023_v61 = vadd.f32 %v1999_v18, %v1953_v51  ;;  %v1998_v38 = vmul.f32 %v8750_v19, %v8824_v58 }
 0x329   : > { %v2179_v54 = vpop.f32.mrf.mxu1  ;;  %v7216_v10 = vpop.eup %7215  ;;  %v2000_v62 = vmul.f32 %v8750_v19, %v1472_v33  ;;  %7233 = vpow2.f32 %v2304_v39  ;;  %v8864_v7 = vadd.f32 %v8759_v4, %v2225_v32  ;;  %v2310_v8 = vmul.f32 1.442695, %v2274_v5 }
 0x32a   : > { %v7218_v21 = vpop.eup %7217  ;;  %7235 = vrcp.f32 %v2335_v12  ;;  %v2338_v40 = vadd.f32 1.0, %v7216_v10  ;;  %v2223_v17 = vadd.f32 %v2166_v2, %v2018_v11  ;;  %v1947_v41 = vpop.f32.mrf.mxu0  ;;  %v2314_v18 = vmul.f32 1.442695, %v2276_v48 }
 0x32b   : > { %v6774_v50 = vpop.f32.mrf.mxu1  ;;  %v2277_v52 = vsub.f32 0.0, %v8864_v7  ;;  %v1956_v51 = vadd.f32 %v6748_v42, %v8730_v63  ;;  %v2228_v58 = vadd.f32 %v6773_v1, %v2023_v61  ;;  %7237 = vrcp.f32 %v2340_v25  ;;  %v1481_v5 = vpop.xlane.xlu0 %1480 }
 0x32c   : > { %v7220_v36 = vpop.eup %7219  ;;  %v2341_v33 = vadd.f32 1.0, %v7218_v21  ;;  %v8869_v39 = vadd.f32 %v8759_v4, %v2223_v17  ;;  %v2021_v34 = vadd.f32 %v8829_v44, %v1945_v53  ;;  %v6751_v12 = vpop.f32.mrf.mxu0  ;;  %7239 = vrcp.f32 %v2338_v40 }
 0x32d   : > { %v2182_v32 = vpop.f32.mrf.mxu1  ;;  %v2339_v2 = vadd.f32 1.0, %v7220_v36  ;;  %v2316_v11 = vmul.f32 1.442695, %v2277_v52  ;;  %v8873_v48 = vadd.f32 %v8759_v4, %v2228_v58  ;;  %7241 = vpow2.f32 %v2310_v8  ;;  %v1484_v52 = vpop.xlane.xlu1 %1483 }
 0x32e   : > { %v2275_v63 = vsub.f32 0.0, %v8869_v39  ;;  %v1948_v1 = vadd.f32 %v1947_v41, %v8738_v27  ;;  %v2226_v25 = vadd.f32 %v2179_v54, %v2021_v34  ;;  %v1960_v42 = vpop.f32.mrf.mxu0  ;;  %v7222_v10 = vpop.eup %7221  ;;  %v2001_v44 = vmul.f32 %v8750_v19, %v1475_v22 }
 0x32f   : > { %v6777_v61 = vpop.f32.mrf.mxu1  ;;  %7243 = vrcp.f32 %v2339_v2  ;;  %v2280_v53 = vsub.f32 0.0, %v8873_v48  ;;  %v2024_v21 = vadd.f32 %v2000_v62, %v1956_v51  ;;  %v7224_v40 = vpop.eup %7223  ;;  %v2002_v17 = vmul.f32 %v8750_v19, %v1478_v30 }
 0x330   : > { %7245 = vpow2.f32 %v2316_v11  ;;  %v2312_v8 = vmul.f32 1.442695, %v2275_v63  ;;  %v8881_v58 = vadd.f32 %v8759_v4, %v2226_v25  ;;  %v6752_v27 = vpop.f32.mrf.mxu0  ;;  %v2003_v41 = vmul.f32 %v8750_v19, %v1481_v5 }
 0x331   : > { %v7226_v54 = vpop.eup %7225  ;;  %7247 = vpow2.f32 %v2314_v18  ;;  %v1969_v22 = vadd.f32 %v6751_v12, %v8740_v28  ;;  %v2229_v36 = vadd.f32 %v6774_v50, %v2024_v21  ;;  %v2195_v34 = vpop.f32.mrf.mxu1  ;;  %v2022_v51 = vadd.f32 %v1998_v38, %v1948_v1 }
 0x332   : > { %v7228_v2 = vpop.eup %7227  ;;  %7249 = vrcp.f32 %v2341_v33  ;;  %v2342_v62 = vadd.f32 1.0, %v7226_v54  ;;  %v2278_v30 = vsub.f32 0.0, %v8881_v58  ;;  %v2004_v63 = vmul.f32 %v8750_v19, %v1484_v52  ;;  %v1963_v5 = vpop.f32.mrf.mxu0 }
 0x333   : > { %v7230_v11 = vpop.eup %7229  ;;  %7251 = vpow2.f32 %v2312_v8  ;;  %v2322_v25 = vmul.f32 1.442695, %v2280_v53  ;;  %v8888_v49 = vadd.f32 %v8759_v4, %v2229_v36  ;;  %v1961_v28 = vadd.f32 %v1960_v42, %v8745_v31  ;;  %v6778_v52 = vpop.f32.mrf.mxu1 }
 0x334   : > { %v2318_v18 = vmul.f32 1.442695, %v2278_v30  ;;  %v2227_v50 = vadd.f32 %v2182_v32, %v2022_v51  ;;  %v1972_v12 = vadd.f32 %v6752_v27, %v8747_v29  ;;  %v7232_v33 = vpop.eup %7231  ;;  %v8893_v21 = vmul.f32 %v7222_v10, %v8763_v55 }
 0x335   : > { %v2344_v38 = vadd.f32 1.0, %v7224_v40  ;;  %v2281_v1 = vsub.f32 0.0, %v8888_v49  ;;  %v2027_v19 = vadd.f32 %v2003_v41, %v1969_v22  ;;  %7253 = vrcp.f32 %v2342_v62  ;;  %v2198_v30 = vpop.f32.mrf.mxu1 }
 0x336   : > { %v7234_v53 = vpop.eup %7233  ;;  %v2345_v8 = vadd.f32 1.0, %v7230_v11  ;;  %v8897_v54 = vadd.f32 %v8759_v4, %v2227_v50  ;;  %v1964_v31 = vadd.f32 %v1963_v5, %v8752_v20  ;;  %7255 = vpow2.f32 %v2318_v18 }
 0x337   : > { %v7236_v32 = vpop.eup %7235  ;;  %v2343_v42 = vadd.f32 1.0, %v7234_v53  ;;  %v2324_v29 = vmul.f32 1.442695, %v2281_v1  ;;  %v2232_v27 = vadd.f32 %v6777_v61, %v2027_v19  ;;  %7257 = vpow2.f32 %v2322_v25 }
 0x338   : > { %v2279_v55 = vsub.f32 0.0, %v8897_v54  ;;  %v2025_v10 = vadd.f32 %v2001_v44, %v1961_v28  ;;  %v2028_v40 = vadd.f32 %v2004_v63, %v1972_v12  ;;  %v7238_v41 = vpop.eup %7237  ;;  %v2382_v22 = vmul.f32 %v7228_v2, %v8769_v23 }
 0x339   : > { %7259 = vrcp.f32 %v2343_v42  ;;  %v8903_v36 = vadd.f32 %v8759_v4, %v2232_v27  ;;  %v2026_v62 = vadd.f32 %v2002_v17, %v1964_v31  ;;  %v7240_v20 = vpop.eup %7239  ;;  %v2385_v51 = vmul.f32 %v7232_v33, %v8777_v15 }
 0x33a   : > { %7261 = vpow2.f32 %v2324_v29  ;;  %v2320_v11 = vmul.f32 1.442695, %v2279_v55  ;;  %v2230_v61 = vadd.f32 %v2195_v34, %v2025_v10  ;;  %v7242_v25 = vpop.eup %7241  ;;  %v2383_v5 = vmul.f32 %v7236_v32, %v8788_v3 }
 0x33b   : > { %7263 = vrcp.f32 %v2345_v8  ;;  %v2284_v44 = vsub.f32 0.0, %v8903_v36  ;;  %v2233_v63 = vadd.f32 %v6778_v52, %v2028_v40  ;;  %v2346_v2 = vadd.f32 1.0, %v7242_v25 }
 0x33c   : > { %v7244_v23 = vpop.eup %7243  ;;  %7265 = vpow2.f32 %v2320_v11  ;;  %v8909_v18 = vadd.f32 %v8759_v4, %v2230_v61  ;;  %v2231_v17 = vadd.f32 %v2198_v30, %v2026_v62  ;;  %v2386_v15 = vmul.f32 %v7240_v20, %v8802_v24 }
 0x33d   : > { %v7246_v28 = vpop.eup %7245  ;;  %v2387_v50 = vmul.f32 %v7244_v23, %v8814_v16  ;;  %v2330_v34 = vmul.f32 1.442695, %v2284_v44  ;;  %v8914_v12 = vadd.f32 %v8759_v4, %v2233_v63  ;;  %7267 = vrcp.f32 %v2344_v38 }
 0x33e   : > { %v7248_v3 = vpop.eup %7247  ;;  %v2349_v33 = vadd.f32 1.0, %v7246_v28  ;;  %v2282_v1 = vsub.f32 0.0, %v8909_v18  ;;  %v8918_v19 = vadd.f32 %v8759_v4, %v2231_v17  ;;  %7269 = vrcp.f32 %v2346_v2 }
 0x33f   : > { %v7250_v52 = vpop.eup %7249  ;;  %v2285_v53 = vsub.f32 0.0, %v8914_v12  ;;  %v2406_v8 = vpack.c.bf16 %v2383_v5, %v2382_v22  ;;  %v2408_v24 = vpack.c.bf16 %v2387_v50, %v2386_v15  ;;  %v2407_v16 = vpack.c.bf16 %v2385_v51, %v8893_v21 }
 0x340   : > { %v7252_v31 = vpop.eup %7251  ;;  %7271 = vpow2.f32 %v2330_v34  ;;  %v2326_v32 = vmul.f32 1.442695, %v2282_v1  ;;  %v2283_v42 = vsub.f32 0.0, %v8918_v19  ;;  %v2348_v38 = vadd.f32 1.0, %v7248_v3 }
 0x341   : > { %7273 = vrcp.f32 %v2349_v33  ;;  %v2347_v29 = vadd.f32 1.0, %v7252_v31  ;;  %v2332_v27 = vmul.f32 1.442695, %v2285_v53  ;;  %6781 = vmatprep.mubr.msk.bf16.mxu0 %vm1486_vm8, %v2406_v8  ;;  %v2389_v21 = vmul.f32 %v7250_v52, %v8805_v26 }
 0x342   : > { %7275 = vpow2.f32 %v2326_v32  ;;  %v2328_v4 = vmul.f32 1.442695, %v2283_v42  ;;  %6782 = vmatmul.mubr.msk.bf16.vlgmr.msra.gmra.mxu0 %vm1486_vm8, %v2407_v16  ;;  %v7254_v55 = vpop.eup %7253  ;;  %v2388_v62 = vmul.f32 %v7238_v41, %v8794_v56 }
 0x343   : > { %7277 = vrcp.f32 %v2347_v29  ;;  %6785 = vmatprep.mubr.msk.bf16.mxu0 %vm1486_vm8, %v2408_v24  ;;  %v7256_v10 = vpop.eup %7255  ;;  %v2390_v51 = vmul.f32 %v7254_v55, %v8832_v37 }
 0x344   : > { %7279 = vpow2.f32 %v2332_v27  ;;  %v7258_v40 = vpop.eup %7257  ;;  %v2350_v30 = vadd.f32 1.0, %v7256_v10  ;;  %v2409_v25 = vpack.c.bf16 %v2389_v21, %v2388_v62 }
 0x345   : > { %7281 = vrcp.f32 %v2348_v38  ;;  %v2352_v23 = vadd.f32 1.0, %v7258_v40 }
 0x346   : > { %v7260_v22 = vpop.eup %7259  ;;  %7283 = vpow2.f32 %v2328_v4 }
 0x347   : > { %v7262_v20 = vpop.eup %7261  ;;  %v2391_v11 = vmul.f32 %v7260_v22, %v8845_v60  ;;  %7285 = vrcp.f32 %v2350_v30 }
 0x348   : > { %v7264_v61 = vpop.eup %7263  ;;  %v2353_v5 = vadd.f32 1.0, %v7262_v20  ;;  %v7196_v20 = vld [vmem:[%s10532_s5 + $0x18] sm:$0x7c]  }
 0x349   : > { %v7266_v44 = vpop.eup %7265  ;;  %v2410_v63 = vpack.c.bf16 %v2391_v11, %v2390_v51  ;;  %v2393_v41 = vmul.f32 %v7264_v61, %v8838_v6  ;;  %v2773_v51 = vshrl.u32 %v7196_v20, 16  ;;  %v2776_v11 = vshll.u32 %v7196_v20, 16 }
 0x34a   : > { %v2351_v26 = vadd.f32 1.0, %v7266_v44  ;;  %6786 = vmatmul.mubr.msk.bf16.gmra.mxu0 %vm1486_vm8, %v2409_v25  ;;  %v7268_v2 = vpop.eup %7267  ;;  %7287 = vrcp.f32 %v2353_v5  ;;  %v816_v25 = vld [vmem:[%s387_s27] sm:$0x3]  ;;  %v8965_v5 = vadd.s32 8, %v8733_v46  ;;  %s7779_s27 = scalar_lea.vmem %s7778_s26, 2048 }
 0x34b   : > { %6789 = vmatprep.mubr.msk.bf16.mxu0 %vm1486_vm8, %v2410_v63  ;;  %v7270_v56 = vpop.eup %7269  ;;  %v2392_v17 = vmul.f32 %v7268_v2, %v8820_v14  ;;  %v2778_v61 = vrot.slane %v2776_v11, 3  ;;  %v10767_v63 = vmov 0.0   ;;  %v8980_v2 = vrot.slane %v816_v25, %v8743_v13 }
 0x34c   : > { %7289 = vrcp.f32 %v2351_v26  ;;  %v2394_v33 = vmul.f32 %v7270_v56, %v8853_v57  ;;  %10766 = vst [vmem:[#allocation91_spill] sm:$0xff] %v8965_v5 }
 0x34d   : > { %v7272_v37 = vpop.eup %7271  ;;  %7291 = vrcp.f32 %v2352_v23  ;;  %v2411_v50 = vpack.c.bf16 %v2393_v41, %v2392_v17  ;;  %vm827_vm15 = vcmp.eq.s32.totalorder %v8965_v5, %v8980_v2  ;;  %v8993_v41 = vld [vmem:[%s10533_s6 + $0x2] ss:$0 sm:$0xff]  ;;  %vm825_vm2 = vcmp.eq.s32.totalorder %v8733_v46, %v8980_v2 }
 0x34e   : > { %v7274_v60 = vpop.eup %7273  ;;  %v2356_v52 = vadd.f32 1.0, %v7272_v37  ;;  %vm9186_vm3 = vmpackc.low %vm827_vm15, %vm825_vm2 }
 0x34f   : > { %v7276_v28 = vpop.eup %7275  ;;  %v2397_v14 = vmul.f32 %v7274_v60, %v8864_v7 }
 0x350   : > { %v7278_v15 = vpop.eup %7277  ;;  %v2354_v34 = vadd.f32 1.0, %v7276_v28 }
 0x351   : > { %v7280_v3 = vpop.eup %7279  ;;  %v2395_v1 = vmul.f32 %v7278_v15, %v8869_v39 }
 0x352   : > { %v7282_v53 = vpop.eup %7281  ;;  %v2357_v8 = vadd.f32 1.0, %v7280_v3  ;;  %6790 = vmatmul.mubr.msk.bf16.gmra.mxu0 %vm1486_vm8, %v2411_v50  ;;  %7293 = vrcp.f32 %v2354_v34 }
 0x353   : > { %v7284_v6 = vpop.eup %7283  ;;  %v2412_v24 = vpack.c.bf16 %v2395_v1, %v2394_v33  ;;  %v2396_v16 = vmul.f32 %v7282_v53, %v8850_v0 }
 0x354   : > { %7295 = vrcp.f32 %v2357_v8  ;;  %v2355_v31 = vadd.f32 1.0, %v7284_v6  ;;  %v7286_v57 = vpop.eup %7285 }
 0x355   : > { %7297 = vrcp.f32 %v2356_v52  ;;  %6793 = vmatprep.mubr.msk.bf16.mxu0 %vm1486_vm8, %v2412_v24  ;;  %v2413_v32 = vpack.c.bf16 %v2397_v14, %v2396_v16  ;;  %v2398_v38 = vmul.f32 %v7286_v57, %v8881_v58 }
 0x356   : > { %7299 = vrcp.f32 %v2355_v31 }
 0x357   : > { %v7288_v39 = vpop.eup %7287 }
 0x358   : > { %v2401_v7 = vmul.f32 %v7288_v39, %v8888_v49 }
 0x359   : > { %v7290_v42 = vpop.eup %7289 }
 0x35a   : > { %v2399_v29 = vmul.f32 %v7290_v42, %v8897_v54  ;;  %6794 = vmatmul.mubr.msk.bf16.gmra.mxu0 %vm1486_vm8, %v2413_v32  ;;  %v7292_v27 = vpop.eup %7291 }
 0x35b   : > { %v2400_v55 = vmul.f32 %v7292_v27, %v8873_v48 }
 0x35c   : > { %v2414_v4 = vpack.c.bf16 %v2399_v29, %v2398_v38 }
 0x35d   : > { %v2415_v10 = vpack.c.bf16 %v2401_v7, %v2400_v55 }
 0x35e   : > { %6797 = vmatprep.mubr.msk.bf16.mxu0 %vm1486_vm8, %v2414_v4 }
 0x35f   : > { %v7294_v0 = vpop.eup %7293 }
 0x360   : > { %v2402_v58 = vmul.f32 %v7294_v0, %v8909_v18  ;;  %v2775_v18 = vrot.slane %v2773_v51, 2 }
 0x361   : > { %v7296_v21 = vpop.eup %7295 }
 0x362   : > { %v7298_v40 = vpop.eup %7297  ;;  %6798 = vmatmul.mubr.msk.bf16.gmra.mxu0 %vm1486_vm8, %v2415_v10  ;;  %v2405_v54 = vmul.f32 %v7296_v21, %v8914_v12  ;;  %v2779_v12 = vor.u32 %v2778_v61, %v2775_v18 }
 0x363   : > { %v7300_v22 = vpop.eup %7299  ;;  %v2404_v49 = vmul.f32 %v7298_v40, %v8903_v36  ;;  %v823_v36 = vsub.s32 1, %v8733_v46 }
 0x364   : > { %v2403_v62 = vmul.f32 %v7300_v22, %v8918_v19  ;;  %7105 = vmatprep.subr.msk.bf16.mxu1 %vm1499_vm9, %v2779_v12  ;;  %v2817_v19 = vsel %vm1499_vm9, %v2779_v12, 0 }
 0x365   : > { %v2417_v48 = vpack.c.bf16 %v2405_v54, %v2404_v49  ;;  %6806 = vmatpush3.bf16.msra.mxu1 %v2817_v19  ;;  %v8967_v44 = vrot.slane %v816_v25, %v823_v36 }
 0x366   : > { %v2416_v30 = vpack.c.bf16 %v2403_v62, %v2402_v58  ;;  %3355 = vmatprep.subr.bf16.mxu1 %v10762_v45 }
 0x367   : > { %vm826_vm13 = vcmp.eq.s32.totalorder %v8733_v46, %v8967_v44  ;;  %vm828_vm14 = vcmp.eq.s32.totalorder %v8965_v5, %v8967_v44 }
 0x368   : > { %6801 = vmatprep.mubr.msk.bf16.mxu0 %vm1486_vm8, %v2416_v30  ;;  %v8974_v23 = vsel %vm826_vm13, 1.0, %v10767_v63  ;;  %v8977_v26 = vsel %vm828_vm14, 1.0, %v10767_v63 }
 0x369   : > { %10768 = vst [vmem:[#allocation92_spill] sm:$0xff] %v8974_v23  ;;  %10769 = vst [vmem:[#allocation93_spill] sm:$0xff] %v8977_v26  ;;  %v8984_v56 = vpack.c.bf16 %v8977_v26, %v8974_v23 }
 0x36a   : > { %6802 = vmatmul.mubr.msk.bf16.gmra.mxu0 %vm1486_vm8, %v2417_v48 }
 0x36b   : > { %10770 = vst [vmem:[#allocation94_spill] sm:$0xff] %v8984_v56  ;;  %6164 = vmatprep.mubr.msk.bf16.mxu0 %vm873_vm6, %v8984_v56 }
 0x402   : > { %v6783_v37 = vpop.f32.mrf.mxu0 }
 0x403   : > { %v8996_v60 = vadd.f32 %v6783_v37, %v8993_v41 }
 0x404   : > { %v2510_v17 = vpop.f32.mrf.mxu0 }
 0x405   : > { %v2607_v28 = vsub.f32 0.0, %v8996_v60  ;;  %v9000_v15 = vadd.f32 %v8993_v41, %v2510_v17 }
 0x406   : > { %v6784_v50 = vpop.f32.mrf.mxu0 }
 0x407   : > { %v2633_v34 = vmul.f32 1.442695, %v2607_v28  ;;  %v2605_v3 = vsub.f32 0.0, %v9000_v15  ;;  %v9004_v33 = vadd.f32 %v6784_v50, %v8993_v41 }
 0x408   : > { %v2513_v1 = vpop.f32.mrf.mxu0 }
 0x409   : > { %7301 = vpow2.f32 %v2633_v34  ;;  %v2629_v52 = vmul.f32 1.442695, %v2605_v3  ;;  %v2608_v53 = vsub.f32 0.0, %v9004_v33  ;;  %v9008_v8 = vadd.f32 %v8993_v41, %v2513_v1 }
 0x40a   : > { %v6787_v6 = vpop.f32.mrf.mxu0 }
 0x40b   : > { %7303 = vpow2.f32 %v2629_v52  ;;  %v2635_v24 = vmul.f32 1.442695, %v2608_v53  ;;  %v2606_v14 = vsub.f32 0.0, %v9008_v8  ;;  %v9012_v31 = vadd.f32 %v6787_v6, %v8993_v41 }
 0x40c   : > { %v2526_v16 = vpop.f32.mrf.mxu0 }
 0x40d   : > { %7305 = vpow2.f32 %v2635_v24  ;;  %v2631_v57 = vmul.f32 1.442695, %v2606_v14  ;;  %v2611_v39 = vsub.f32 0.0, %v9012_v31  ;;  %v9016_v32 = vadd.f32 %v8993_v41, %v2526_v16 }
 0x40e   : > { %v6788_v42 = vpop.f32.mrf.mxu0 }
 0x40f   : > { %7307 = vpow2.f32 %v2631_v57  ;;  %v2641_v38 = vmul.f32 1.442695, %v2611_v39  ;;  %v2609_v29 = vsub.f32 0.0, %v9016_v32  ;;  %v9020_v27 = vadd.f32 %v6788_v42, %v8993_v41 }
 0x410   : > { %v2529_v7 = vpop.f32.mrf.mxu0 }
 0x411   : > { %7309 = vpow2.f32 %v2641_v38  ;;  %v2637_v4 = vmul.f32 1.442695, %v2609_v29  ;;  %v2612_v55 = vsub.f32 0.0, %v9020_v27  ;;  %v9024_v0 = vadd.f32 %v8993_v41, %v2529_v7 }
 0x412   : > { %v6791_v10 = vpop.f32.mrf.mxu0 }
 0x413   : > { %7311 = vpow2.f32 %v2637_v4  ;;  %v2643_v21 = vmul.f32 1.442695, %v2612_v55  ;;  %v2610_v40 = vsub.f32 0.0, %v9024_v0  ;;  %v9028_v22 = vadd.f32 %v6791_v10, %v8993_v41 }
 0x414   : > { %v2542_v58 = vpop.f32.mrf.mxu0 }
 0x415   : > { %7313 = vpow2.f32 %v2643_v21  ;;  %v2639_v54 = vmul.f32 1.442695, %v2610_v40  ;;  %v2615_v62 = vsub.f32 0.0, %v9028_v22  ;;  %v9032_v49 = vadd.f32 %v8993_v41, %v2542_v58 }
 0x416   : > { %v7302_v30 = vpop.eup %7301  ;;  %v6792_v48 = vpop.f32.mrf.mxu0 }
 0x417   : > { %v2679_v20 = vadd.f32 1.0, %v7302_v30  ;;  %7315 = vpow2.f32 %v2639_v54  ;;  %v2649_v51 = vmul.f32 1.442695, %v2615_v62  ;;  %v2613_v11 = vsub.f32 0.0, %v9032_v49 }
 0x418   : > { %v7304_v18 = vpop.eup %7303  ;;  %v9036_v61 = vadd.f32 %v6792_v48, %v8993_v41  ;;  %v2545_v12 = vpop.f32.mrf.mxu0 }
 0x419   : > { %7317 = vrcp.f32 %v2679_v20  ;;  %v2677_v19 = vadd.f32 1.0, %v7304_v18  ;;  %v2645_v36 = vmul.f32 1.442695, %v2613_v11  ;;  %v9039_v25 = vadd.f32 %v8993_v41, %v2545_v12 }
 0x41a   : > { %v7306_v37 = vpop.eup %7305  ;;  %7319 = vpow2.f32 %v2649_v51  ;;  %v2616_v17 = vsub.f32 0.0, %v9036_v61  ;;  %v6795_v28 = vpop.f32.mrf.mxu0 }
 0x41b   : > { %7321 = vrcp.f32 %v2677_v19  ;;  %v2680_v50 = vadd.f32 1.0, %v7306_v37  ;;  %v2614_v34 = vsub.f32 0.0, %v9039_v25  ;;  %v9044_v3 = vadd.f32 %v6795_v28, %v8993_v41 }
 0x41c   : > { %v7308_v1 = vpop.eup %7307  ;;  %7323 = vpow2.f32 %v2645_v36  ;;  %v2651_v52 = vmul.f32 1.442695, %v2616_v17  ;;  %v2558_v53 = vpop.f32.mrf.mxu0 }
 0x41d   : > { %7325 = vrcp.f32 %v2680_v50  ;;  %v2678_v6 = vadd.f32 1.0, %v7308_v1  ;;  %v2647_v24 = vmul.f32 1.442695, %v2614_v34  ;;  %v2619_v14 = vsub.f32 0.0, %v9044_v3 }
 0x41e   : > { %v7310_v16 = vpop.eup %7309  ;;  %7327 = vpow2.f32 %v2651_v52  ;;  %v9048_v57 = vadd.f32 %v8993_v41, %v2558_v53  ;;  %v6796_v39 = vpop.f32.mrf.mxu0 }
 0x41f   : > { %7329 = vrcp.f32 %v2678_v6  ;;  %v2683_v42 = vadd.f32 1.0, %v7310_v16  ;;  %v2657_v38 = vmul.f32 1.442695, %v2619_v14  ;;  %v9051_v29 = vadd.f32 %v6796_v39, %v8993_v41 }
 0x420   : > { %v7312_v7 = vpop.eup %7311  ;;  %7331 = vpow2.f32 %v2647_v24  ;;  %v2617_v4 = vsub.f32 0.0, %v9048_v57  ;;  %v2561_v55 = vpop.f32.mrf.mxu0 }
 0x421   : > { %7333 = vrcp.f32 %v2683_v42  ;;  %v2681_v10 = vadd.f32 1.0, %v7312_v7  ;;  %v2620_v21 = vsub.f32 0.0, %v9051_v29  ;;  %v9056_v40 = vadd.f32 %v8993_v41, %v2561_v55 }
 0x422   : > { %v7314_v58 = vpop.eup %7313  ;;  %7335 = vpow2.f32 %v2657_v38  ;;  %v2653_v54 = vmul.f32 1.442695, %v2617_v4  ;;  %v6799_v62 = vpop.f32.mrf.mxu0 }
 0x423   : > { %7337 = vrcp.f32 %v2681_v10  ;;  %v2684_v30 = vadd.f32 1.0, %v7314_v58  ;;  %v2659_v48 = vmul.f32 1.442695, %v2620_v21  ;;  %v2618_v20 = vsub.f32 0.0, %v9056_v40 }
 0x424   : > { %v7316_v51 = vpop.eup %7315  ;;  %7339 = vpow2.f32 %v2653_v54  ;;  %v9060_v11 = vadd.f32 %v6799_v62, %v8993_v41  ;;  %v2574_v18 = vpop.f32.mrf.mxu0 }
 0x425   : > { %7341 = vrcp.f32 %v2684_v30  ;;  %v2682_v12 = vadd.f32 1.0, %v7316_v51  ;;  %v2655_v19 = vmul.f32 1.442695, %v2618_v20  ;;  %v9063_v36 = vadd.f32 %v8993_v41, %v2574_v18 }
 0x426   : > { %v7318_v37 = vpop.eup %7317  ;;  %7343 = vpow2.f32 %v2659_v48  ;;  %v2623_v17 = vsub.f32 0.0, %v9060_v11  ;;  %v6800_v28 = vpop.f32.mrf.mxu0 }
 0x427   : > { %v7320_v50 = vpop.eup %7319  ;;  %7345 = vrcp.f32 %v2682_v12  ;;  %v2621_v34 = vsub.f32 0.0, %v9063_v36  ;;  %v9068_v1 = vadd.f32 %v6800_v28, %v8993_v41  ;;  %v2727_v62 = vmul.f32 %v7318_v37, %v8996_v60 }
 0x428   : > { %v7322_v52 = vpop.eup %7321  ;;  %v2687_v53 = vadd.f32 1.0, %v7320_v50  ;;  %7347 = vpow2.f32 %v2655_v19  ;;  %v2665_v6 = vmul.f32 1.442695, %v2623_v17  ;;  %v2577_v24 = vpop.f32.mrf.mxu0 }
 0x429   : > { %v7324_v14 = vpop.eup %7323  ;;  %v2661_v16 = vmul.f32 1.442695, %v2621_v34  ;;  %v2624_v39 = vsub.f32 0.0, %v9068_v1  ;;  %v9072_v42 = vadd.f32 %v8993_v41, %v2577_v24  ;;  %v2725_v18 = vmul.f32 %v7322_v52, %v9000_v15 }
 0x42a   : > { %v7326_v38 = vpop.eup %7325  ;;  %7349 = vrcp.f32 %v2687_v53  ;;  %v2685_v7 = vadd.f32 1.0, %v7324_v14  ;;  %v6803_v4 = vpop.f32.mrf.mxu0 }
 0x42b   : > { %v7328_v55 = vpop.eup %7327  ;;  %v2728_v10 = vmul.f32 %v7326_v38, %v9004_v33  ;;  %7351 = vpow2.f32 %v2665_v6  ;;  %v2667_v21 = vmul.f32 1.442695, %v2624_v39  ;;  %v2622_v58 = vsub.f32 0.0, %v9072_v42 }
 0x42c   : > { %v7330_v54 = vpop.eup %7329  ;;  %7353 = vrcp.f32 %v2685_v7  ;;  %v2688_v30 = vadd.f32 1.0, %v7328_v55  ;;  %v9078_v48 = vadd.f32 %v6803_v4, %v8993_v41  ;;  %v2590_v20 = vpop.f32.mrf.mxu0 }
 0x42d   : > { %v7332_v51 = vpop.eup %7331  ;;  %v2726_v12 = vmul.f32 %v7330_v54, %v9008_v8  ;;  %7355 = vpow2.f32 %v2661_v16  ;;  %v2663_v33 = vmul.f32 1.442695, %v2622_v58  ;;  %v9084_v60 = vadd.f32 %v8993_v41, %v2590_v20 }
 0x42e   : > { %v7334_v19 = vpop.eup %7333  ;;  %7357 = vrcp.f32 %v2688_v30  ;;  %v2686_v17 = vadd.f32 1.0, %v7332_v51  ;;  %v2627_v28 = vsub.f32 0.0, %v9078_v48  ;;  %v6804_v37 = vpop.f32.mrf.mxu0  ;;  %v9086_v34 = vpack.c.bf16 %v2728_v10, %v2727_v62 }
 0x42f   : > { %v7336_v50 = vpop.eup %7335  ;;  %v9088_v53 = vpack.c.bf16 %v2726_v12, %v2725_v18  ;;  %7359 = vpow2.f32 %v2667_v21  ;;  %v9091_v15 = vadd.f32 %v6804_v37, %v8993_v41  ;;  %v2625_v24 = vsub.f32 0.0, %v9084_v60 }
 0x430   : > { %v7338_v8 = vpop.eup %7337  ;;  %7361 = vrcp.f32 %v2686_v17  ;;  %v2691_v52 = vadd.f32 1.0, %v7336_v50  ;;  %v2673_v6 = vmul.f32 1.442695, %v2627_v28  ;;  %v2593_v14 = vpop.f32.mrf.mxu0  ;;  %v2731_v12 = vmul.f32 %v7334_v19, %v9012_v31 }
 0x431   : > { %v7340_v16 = vpop.eup %7339  ;;  %7363 = vpow2.f32 %v2663_v33  ;;  %v2628_v39 = vsub.f32 0.0, %v9091_v15  ;;  %v9096_v38 = vadd.f32 %v8993_v41, %v2593_v14  ;;  %6807 = vmatprep.mubr.msk.bf16.mxu1 %vm1486_vm8, %v9088_v53  ;;  %v2669_v55 = vmul.f32 1.442695, %v2625_v24 }
 0x432   : > { %v7342_v7 = vpop.eup %7341  ;;  %7365 = vrcp.f32 %v2691_v52  ;;  %v2689_v4 = vadd.f32 1.0, %v7340_v16  ;;  %6808 = vmatmul.mubr.msk.bf16.vlgmr.msra.gmra.mxu1 %vm1486_vm8, %v9086_v34  ;;  %v2729_v20 = vmul.f32 %v7338_v8, %v9016_v32 }
 0x433   : > { %v7344_v10 = vpop.eup %7343  ;;  %7367 = vpow2.f32 %v2673_v6  ;;  %v2675_v21 = vmul.f32 1.442695, %v2628_v39  ;;  %v2626_v58 = vsub.f32 0.0, %v9096_v38  ;;  %v2732_v62 = vmul.f32 %v7342_v7, %v9020_v27 }
 0x434   : > { %v7346_v54 = vpop.eup %7345  ;;  %7369 = vrcp.f32 %v2689_v4  ;;  %v2692_v41 = vadd.f32 1.0, %v7344_v10 }
 0x435   : > { %v7348_v30 = vpop.eup %7347  ;;  %v2730_v51 = vmul.f32 %v7346_v54, %v9024_v0  ;;  %7371 = vpow2.f32 %v2669_v55  ;;  %v2671_v18 = vmul.f32 1.442695, %v2626_v58  ;;  %v9109_v50 = vpack.c.bf16 %v2732_v62, %v2731_v12 }
 0x436   : > { %7373 = vrcp.f32 %v2692_v41  ;;  %v2690_v33 = vadd.f32 1.0, %v7348_v30 }
 0x437   : > { %v7350_v17 = vpop.eup %7349  ;;  %v9107_v28 = vpack.c.bf16 %v2730_v51, %v2729_v20  ;;  %7375 = vpow2.f32 %v2675_v21 }
 0x438   : > { %v7352_v37 = vpop.eup %7351  ;;  %7377 = vrcp.f32 %v2690_v33  ;;  %v2735_v4 = vmul.f32 %v7350_v17, %v9028_v22 }
 0x439   : > { %v7354_v27 = vpop.eup %7353  ;;  %7379 = vpow2.f32 %v2671_v18  ;;  %6811 = vmatprep.mubr.msk.bf16.mxu1 %vm1486_vm8, %v9107_v28  ;;  %v2695_v8 = vadd.f32 1.0, %v7352_v37 }
 0x43a   : > { %v7356_v32 = vpop.eup %7355  ;;  %6812 = vmatmul.mubr.msk.bf16.gmra.mxu1 %vm1486_vm8, %v9109_v50  ;;  %v2733_v16 = vmul.f32 %v7354_v27, %v9032_v49 }
 0x43b   : > { %v7358_v31 = vpop.eup %7357  ;;  %v2693_v0 = vadd.f32 1.0, %v7356_v32 }
 0x43c   : > { %v7360_v19 = vpop.eup %7359  ;;  %v2736_v6 = vmul.f32 %v7358_v31, %v9036_v61 }
 0x43d   : > { %v7362_v52 = vpop.eup %7361  ;;  %v2696_v24 = vadd.f32 1.0, %v7360_v19  ;;  %7381 = vrcp.f32 %v2693_v0 }
 0x43e   : > { %v7364_v14 = vpop.eup %7363  ;;  %v2734_v39 = vmul.f32 %v7362_v52, %v9039_v25  ;;  %v2754_v54 = vpack.c.bf16 %v2736_v6, %v2735_v4  ;;  %v10634_v4 = vmov 1.0|1.0  }
 0x43f   : > { %v7366_v7 = vpop.eup %7365  ;;  %7383 = vrcp.f32 %v2696_v24  ;;  %v2694_v55 = vadd.f32 1.0, %v7364_v14 }
 0x440   : > { %v7368_v10 = vpop.eup %7367  ;;  %v2753_v21 = vpack.c.bf16 %v2734_v39, %v2733_v16  ;;  %7385 = vrcp.f32 %v2695_v8  ;;  %v2739_v25 = vmul.f32 %v7366_v7, %v9044_v3 }
 0x441   : > { %v7370_v58 = vpop.eup %7369  ;;  %7387 = vrcp.f32 %v2694_v55  ;;  %v2699_v30 = vadd.f32 1.0, %v7368_v10 }
 0x442   : > { %v7372_v62 = vpop.eup %7371  ;;  %6815 = vmatprep.mubr.msk.bf16.mxu1 %vm1486_vm8, %v2753_v21  ;;  %v2737_v12 = vmul.f32 %v7370_v58, %v9048_v57  ;;  %v9217_v58 = vadd.s32 56, %v8733_v46 }
 0x443   : > { %v7374_v61 = vpop.eup %7373  ;;  %v2697_v41 = vadd.f32 1.0, %v7372_v62  ;;  %6816 = vmatmul.mubr.msk.bf16.gmra.mxu1 %vm1486_vm8, %v2754_v54 }
 0x444   : > { %v7376_v49 = vpop.eup %7375  ;;  %v2740_v22 = vmul.f32 %v7374_v61, %v9051_v29 }
 0x445   : > { %v7378_v20 = vpop.eup %7377  ;;  %v2700_v51 = vadd.f32 1.0, %v7376_v49  ;;  %7389 = vrcp.f32 %v2697_v41 }
 0x446   : > { %v7380_v18 = vpop.eup %7379  ;;  %v2756_v33 = vpack.c.bf16 %v2740_v22, %v2739_v25  ;;  %v2738_v17 = vmul.f32 %v7378_v20, %v9056_v40  ;;  %v10783_v25 = vmov 0 }
 0x447   : > { %7391 = vrcp.f32 %v2700_v51  ;;  %v2698_v37 = vadd.f32 1.0, %v7380_v18 }
 0x448   : > { %v2755_v27 = vpack.c.bf16 %v2738_v17, %v2737_v12  ;;  %7393 = vrcp.f32 %v2699_v30  ;;  %3356 = vmatpush1.bf16.msra.mxu1 %v2756_v33 }
 0x449   : > { %7395 = vrcp.f32 %v2698_v37  ;;  %3357 = vmatprep.subr.bf16.mxu1 %v10762_v45  ;;  %v9293_v37 = vld [vmem:[%s10533_s6 + $0x5] ss:$0 sm:$0xff] }
 0x44a   : > { %6819 = vmatprep.mubr.msk.bf16.mxu1 %vm1486_vm8, %v2755_v27  ;;  %v7382_v3 = vpop.eup %7381 }
 0x44b   : > { %6820 = vmatmul.mubr.msk.bf16.gmra.mxu1 %vm1486_vm8, %v2756_v33  ;;  %v2741_v31 = vmul.f32 %v7382_v3, %v9063_v36 }
 0x44c   : > { %v7384_v29 = vpop.eup %7383  ;;  %3358 = vmatpush1.bf16.msra.mxu1 %v2755_v27 }
 0x44d   : > { %v7386_v57 = vpop.eup %7385  ;;  %3359 = vmatprep.subr.bf16.mxu1 %v10762_v45  ;;  %v2744_v32 = vmul.f32 %v7384_v29, %v9068_v1 }
 0x44e   : > { %v7388_v40 = vpop.eup %7387  ;;  %v2743_v19 = vmul.f32 %v7386_v57, %v9060_v11 }
 0x44f   : > { %v2742_v0 = vmul.f32 %v7388_v40, %v9072_v42 }
 0x450   : > { %3360 = vmatpush1.bf16.msra.mxu1 %v2754_v54  ;;  %v2758_v52 = vpack.c.bf16 %v2744_v32, %v2743_v19  ;;  %v10775_v54 = vmov 0 }
 0x451   : > { %v2757_v8 = vpack.c.bf16 %v2742_v0, %v2741_v31  ;;  %3361 = vmatprep.subr.bf16.mxu1 %v10762_v45 }
 0x452   : > { %v7390_v6 = vpop.eup %7389 }
 0x453   : > { %6823 = vmatprep.mubr.msk.bf16.mxu1 %vm1486_vm8, %v2757_v8  ;;  %v2745_v11 = vmul.f32 %v7390_v6, %v9084_v60  ;;  %v9158_v60 = vadd.s32 24, %v8733_v46 }
 0x454   : > { %v7392_v24 = vpop.eup %7391  ;;  %6824 = vmatmul.mubr.msk.bf16.gmra.mxu1 %vm1486_vm8, %v2758_v52 }
 0x455   : > { %v7394_v14 = vpop.eup %7393  ;;  %3362 = vmatpush1.bf16.msra.mxu1 %v2753_v21  ;;  %v2748_v36 = vmul.f32 %v7392_v24, %v9091_v15  ;;  %vm832_vm1 = vcmp.eq.s32.totalorder %v9158_v60, %v8967_v44  ;;  %v9175_v15 = vadd.s32 32, %v8733_v46  ;;  %vm831_vm13 = vcmp.eq.s32.totalorder %v9158_v60, %v8980_v2 }
 0x456   : > { %v7396_v1 = vpop.eup %7395  ;;  %3363 = vmatprep.subr.bf16.mxu1 %v10762_v45  ;;  %v2747_v16 = vmul.f32 %v7394_v14, %v9078_v48  ;;  %v9155_v48 = vadd.s32 16, %v8733_v46  ;;  %v9214_v21 = vadd.s32 48, %v8733_v46 }
 0x457   : > { %v2746_v42 = vmul.f32 %v7396_v1, %v9096_v38  ;;  %v9178_v38 = vadd.s32 40, %v8733_v46  ;;  %vm834_vm4 = vcmp.eq.s32.totalorder %v9175_v15, %v8967_v44 }
 0x458   : > { %v2760_v7 = vpack.c.bf16 %v2748_v36, %v2747_v16  ;;  %vm830_vm0 = vcmp.eq.s32.totalorder %v9155_v48, %v8967_v44  ;;  %vm829_vm7 = vcmp.eq.s32.totalorder %v9155_v48, %v8980_v2  ;;  %v9208_v55 = vsel %vm834_vm4, 1.0, %v10767_v63 }
 0x459   : > { %v2759_v39 = vpack.c.bf16 %v2746_v42, %v2745_v11  ;;  %3364 = vmatpush1.bf16.msra.mxu1 %v9109_v50  ;;  %vm836_vm5 = vcmp.eq.s32.totalorder %v9178_v38, %v8967_v44  ;;  %vm9225_vm14 = vmpackc.low %vm831_vm13, %vm829_vm7  ;;  %vm833_vm4 = vcmp.eq.s32.totalorder %v9175_v15, %v8980_v2  ;;  %v6044_v48 = vsel %vm825_vm2, 1.0, %v10767_v63 }
 0x45a   : > { %3365 = vmatprep.subr.bf16.mxu1 %v10762_v45  ;;  %v9211_v10 = vsel %vm836_vm5, 1.0, %v10767_v63  ;;  %v10776_v54 = vsel %vm9225_vm14, 4294967295, %v10775_v54  ;;  %vm835_vm5 = vcmp.eq.s32.totalorder %v9178_v38, %v8980_v2  ;;  %vm10883_vm2 = vcmask 31744  }
 0x45b   : > { %6827 = vmatprep.mubr.msk.bf16.mxu1 %vm1486_vm8, %v2759_v39  ;;  %10777 = vst [vmem:[#allocation97_spill] sm:$0xff] %v10776_v54  ;;  %v9231_v62 = vpack.c.bf16 %v9211_v10, %v9208_v55  ;;  %vm9258_vm12 = vmpackc.low %vm835_vm5, %vm833_vm4  ;;  %v6054_v15 = vsel %vm835_vm5, 1.0, %v10767_v63 }
 0x45c   : > { %6828 = vmatmul.mubr.msk.bf16.gmra.mxu1 %vm1486_vm8, %v2760_v7  ;;  %vm10894_vm5 = vmmov %vm10883_vm2 }
 0x45d   : > { %3366 = vmatpush1.bf16.msra.mxu1 %v9107_v28  ;;  %6176 = vmatprep.mubr.msk.bf16.mxu1 %vm873_vm6, %v8984_v56  ;;  %v10771_v28 = vmov 0  ;;  %10778 = vst [vmem:[#allocation98_spill] sm:$0xff] %v9231_v62 }
 0x45e   : > { %3367 = vmatprep.subr.bf16.mxu1 %v10762_v45  ;;  %v10772_v28 = vsel %vm9186_vm3, 4294967295, %v10771_v28 }
 0x45f   : > { %10773 = vst [vmem:[#allocation95_spill] sm:$0xff] %v10772_v28 }
 0x461   : > { %3368 = vmatpush1.bf16.msra.mxu1 %v9086_v34  ;;  %v9169_v34 = vsel %vm830_vm0, 1.0, %v10767_v63  ;;  %vm838_vm0 = vcmp.eq.s32.totalorder %v9214_v21, %v8967_v44 }
 0x462   : > { %3369 = vmatprep.subr.bf16.mxu1 %v10762_v45  ;;  %v9247_v61 = vsel %vm838_vm0, 1.0, %v10767_v63  ;;  %vm837_vm0 = vcmp.eq.s32.totalorder %v9214_v21, %v8980_v2  ;;  %v890_v21 = vsel %vm873_vm6, %v9208_v55, 0.0  ;;  %v894_v55 = vsel %vm873_vm6, %v9211_v10, 0.0 }
 0x465   : > { %3370 = vmatpush1.bf16.msra.mxu1 %v9088_v53  ;;  %v9172_v53 = vsel %vm832_vm1, 1.0, %v10767_v63  ;;  %vm840_vm1 = vcmp.eq.s32.totalorder %v9217_v58, %v8967_v44  ;;  %v10779_v44 = vmov 0 }
 0x466   : > { %3379 = vmatprep.subr.bf16.mxu1 %v10762_v45  ;;  %v9192_v50 = vpack.c.bf16 %v9172_v53, %v9169_v34  ;;  %v9250_v41 = vsel %vm840_vm1, 1.0, %v10767_v63  ;;  %v10780_v44 = vsel %vm9258_vm12, 4294967295, %v10779_v44  ;;  %vm839_vm1 = vcmp.eq.s32.totalorder %v9217_v58, %v8980_v2 }
 0x467   : > { %10781 = vst [vmem:[#allocation99_spill] sm:$0xff] %v10780_v44  ;;  %v9264_v49 = vpack.c.bf16 %v9250_v41, %v9247_v61  ;;  %vm9281_vm11 = vmpackc.low %vm839_vm1, %vm837_vm0  ;;  %v886_v38 = vsel %vm873_vm6, %v9172_v53, 0.0 }
 0x468   : > { %10774 = vst [vmem:[#allocation96_spill] sm:$0xff] %v9192_v50  ;;  %v10784_v25 = vsel %vm9281_vm11, 4294967295, %v10783_v25 }
 0x469   : > { %3380 = vmatpush2.bf16.msra.mxu1 %v2760_v7  ;;  %10782 = vst [vmem:[#allocation100_spill] sm:$0xff] %v9264_v49  ;;  %10785 = vst [vmem:[#allocation101_spill] sm:$0xff] %v10784_v25 }
 0x46a   : > { %3381 = vmatprep.subr.bf16.mxu1 %v10762_v45 }
 0x46d   : > { %3382 = vmatpush2.bf16.msra.mxu1 %v2759_v39 }
 0x46e   : > { %3383 = vmatprep.subr.bf16.mxu1 %v10762_v45 }
 0x471   : > { %3384 = vmatpush2.bf16.msra.mxu1 %v2758_v52 }
 0x472   : > { %3385 = vmatprep.subr.bf16.mxu1 %v10762_v45 }
 0x475   : > { %3386 = vmatpush2.bf16.msra.mxu1 %v2757_v8 }
 0x478   : > { %6178 = vmatmul.mubr.msk.bf16.vlgmr.msra.gmra.mxu1 %vm9186_vm3, %v10634_v4 }
 0x479   : > { %6179 = vmatprep.mubr.msk.bf16.mxu1 %vm873_vm6, %v9192_v50 }
 0x480   : > { %6181 = vmatmul.mubr.msk.bf16.gmra.mxu1 %vm9225_vm14, %v10634_v4 }
 0x481   : > { %6182 = vmatprep.mubr.msk.bf16.mxu1 %vm873_vm6, %v9231_v62 }
 0x488   : > { %6184 = vmatmul.mubr.msk.bf16.gmra.mxu1 %vm9258_vm12, %v10634_v4 }
 0x489   : > { %6185 = vmatprep.mubr.msk.bf16.mxu1 %vm873_vm6, %v9264_v49 }
 0x490   : > { %6187 = vmatmul.mubr.msk.bf16.gmra.mxu1 %vm9281_vm11, %v10634_v4 }
 0x491   : > { %6869 = vmatprep.mubr.msk.bf16.mxu1 %vm873_vm6, %v8104_v9 }
 0x4f2   : > { %v6809_v22 = vpop.f32.mrf.mxu1 }
 0x4f4   : > { %v2853_v30 = vpop.f32.mrf.mxu1 }
 0x4f6   : > { %v6810_v20 = vpop.f32.mrf.mxu1 }
 0x4f8   : > { %v2856_v51 = vpop.f32.mrf.mxu1 }
 0x4f9   : > { %v9352_v13 = vadd.f32 %v9293_v37, %v2856_v51 }
 0x4fa   : > { %v6813_v18 = vpop.f32.mrf.mxu1 }
 0x4fb   : > { %v9303_v32 = vadd.f32 %v6813_v18, %v9293_v37  ;;  %v2949_v51 = vsub.f32 0.0, %v9352_v13 }
 0x4fc   : > { %v2869_v12 = vpop.f32.mrf.mxu1 }
 0x4fd   : > { %v2954_v14 = vsub.f32 0.0, %v9303_v32  ;;  %v9315_v11 = vadd.f32 %v9293_v37, %v2869_v12  ;;  %v9332_v12 = vadd.f32 %v9293_v37, %v2853_v30 }
 0x4fe   : > { %v6814_v33 = vpop.f32.mrf.mxu1 }
 0x4ff   : > { %v9321_v16 = vadd.f32 %v6814_v33, %v9293_v37 }
 0x500   : > { %v2872_v17 = vpop.f32.mrf.mxu1 }
 0x503   : > { %v6817_v27 = vpop.f32.mrf.mxu1 }
 0x504   : > { %v9296_v3 = vadd.f32 %v6817_v27, %v9293_v37 }
 0x505   : > { %v2885_v29 = vpop.f32.mrf.mxu1 }
 0x506   : > { %v2958_v57 = vsub.f32 0.0, %v9296_v3  ;;  %v9300_v40 = vadd.f32 %v9293_v37, %v2885_v29 }
 0x507   : > { %v6818_v31 = vpop.f32.mrf.mxu1 }
 0x508   : > { %v2956_v0 = vsub.f32 0.0, %v9300_v40  ;;  %v9307_v19 = vadd.f32 %v6818_v31, %v9293_v37  ;;  %v2992_v8 = vmul.f32 1.442695, %v2958_v57  ;;  %v9329_v57 = vadd.f32 %v6809_v22, %v9293_v37 }
 0x509   : > { %v2888_v52 = vpop.f32.mrf.mxu1  ;;  %v2984_v31 = vmul.f32 1.442695, %v2954_v14 }
 0x50a   : > { %v2959_v6 = vsub.f32 0.0, %v9307_v19  ;;  %v9311_v24 = vadd.f32 %v9293_v37, %v2888_v52  ;;  %v2988_v1 = vmul.f32 1.442695, %v2956_v0  ;;  %7397 = vpow2.f32 %v2992_v8 }
 0x50b   : > { %v6821_v36 = vpop.f32.mrf.mxu1  ;;  %v2952_v0 = vsub.f32 0.0, %v9315_v11 }
 0x50c   : > { %v9318_v42 = vadd.f32 %v6821_v36, %v9293_v37  ;;  %v2994_v39 = vmul.f32 1.442695, %v2959_v6  ;;  %v2957_v7 = vsub.f32 0.0, %v9311_v24  ;;  %7399 = vpow2.f32 %v2988_v1 }
 0x50d   : > { %v2901_v18 = vpop.f32.mrf.mxu1  ;;  %v2955_v36 = vsub.f32 0.0, %v9321_v16 }
 0x50e   : > { %v2962_v27 = vsub.f32 0.0, %v9318_v42  ;;  %v9326_v29 = vadd.f32 %v9293_v37, %v2901_v18  ;;  %v9341_v18 = vadd.f32 %v9293_v37, %v2872_v17  ;;  %7401 = vpow2.f32 %v2994_v39 }
 0x50f   : > { %v6822_v33 = vpop.f32.mrf.mxu1  ;;  %v2990_v22 = vmul.f32 1.442695, %v2957_v7 }
 0x510   : > { %v3000_v8 = vmul.f32 1.442695, %v2962_v27  ;;  %v2960_v52 = vsub.f32 0.0, %v9326_v29  ;;  %v9337_v6 = vadd.f32 %v6822_v33, %v9293_v37  ;;  %v2950_v27 = vsub.f32 0.0, %v9329_v57 }
 0x511   : > { %v2904_v30 = vpop.f32.mrf.mxu1  ;;  %v9349_v33 = vadd.f32 %v6810_v20, %v9293_v37  ;;  %v2953_v56 = vsub.f32 0.0, %v9341_v18 }
 0x512   : > { %7403 = vpow2.f32 %v3000_v8  ;;  %v2996_v14 = vmul.f32 1.442695, %v2960_v52  ;;  %v2963_v1 = vsub.f32 0.0, %v9337_v6  ;;  %v9345_v4 = vadd.f32 %v9293_v37, %v2904_v30 }
 0x513   : > { %7405 = vpow2.f32 %v2984_v31  ;;  %v2948_v8 = vsub.f32 0.0, %v9332_v12  ;;  %v2980_v52 = vmul.f32 1.442695, %v2952_v0  ;;  %v2986_v30 = vmul.f32 1.442695, %v2955_v36 }
 0x514   : > { %7407 = vpow2.f32 %v2996_v14  ;;  %v3002_v17 = vmul.f32 1.442695, %v2963_v1  ;;  %v2961_v39 = vsub.f32 0.0, %v9345_v4  ;;  %v6825_v7 = vpop.f32.mrf.mxu1  ;;  %v2951_v31 = vsub.f32 0.0, %v9349_v33 }
 0x515   : > { %7409 = vpow2.f32 %v2990_v22  ;;  %v2976_v25 = vmul.f32 1.442695, %v2950_v27  ;;  %v2972_v1 = vmul.f32 1.442695, %v2948_v8  ;;  %v2982_v44 = vmul.f32 1.442695, %v2953_v56 }
 0x516   : > { %7411 = vpow2.f32 %v3002_v17  ;;  %v2998_v9 = vmul.f32 1.442695, %v2961_v39  ;;  %v2917_v20 = vpop.f32.mrf.mxu1  ;;  %v2978_v36 = vmul.f32 1.442695, %v2951_v31  ;;  %v2974_v17 = vmul.f32 1.442695, %v2949_v51 }
 0x517   : > { %v7398_v49 = vpop.eup %7397  ;;  %v9372_v28 = vadd.f32 %v6825_v7, %v9293_v37 }
 0x518   : > { %7413 = vpow2.f32 %v2998_v9  ;;  %v6826_v14 = vpop.f32.mrf.mxu1  ;;  %v3030_v62 = vadd.f32 1.0, %v7398_v49 }
 0x519   : > { %7415 = vpow2.f32 %v2980_v52  ;;  %v7400_v22 = vpop.eup %7399  ;;  %v2966_v7 = vsub.f32 0.0, %v9372_v28 }
 0x51a   : > { %7417 = vpow2.f32 %v2986_v30  ;;  %v9359_v0 = vpop.f32.mrf.mxu1  ;;  %v3028_v52 = vadd.f32 1.0, %v7400_v22 }
 0x51b   : > { %7419 = vpow2.f32 %v2976_v25  ;;  %v7402_v54 = vpop.eup %7401 }
 0x51c   : > { %v6829_v39 = vpop.f32.mrf.mxu1  ;;  %7421 = vpow2.f32 %v2972_v1  ;;  %v3031_v49 = vadd.f32 1.0, %v7402_v54 }
 0x51d   : > { %v9362_v27 = vadd.f32 %v6829_v39, %v9293_v37  ;;  %7423 = vpow2.f32 %v2982_v44 }
 0x51e   : > { %v2933_v9 = vpop.f32.mrf.mxu1  ;;  %7425 = vpow2.f32 %v2978_v36 }
 0x51f   : > { %v7404_v8 = vpop.eup %7403  ;;  %v2970_v56 = vsub.f32 0.0, %v9362_v27  ;;  %v9366_v30 = vadd.f32 %v9293_v37, %v2933_v9  ;;  %7427 = vpow2.f32 %v2974_v17 }
 0x520   : > { %v7406_v31 = vpop.eup %7405  ;;  %v3034_v25 = vadd.f32 1.0, %v7404_v8  ;;  %v6830_v51 = vpop.f32.mrf.mxu1  ;;  %7429 = vrcp.f32 %v3030_v62 }
 0x521   : > { %v7408_v1 = vpop.eup %7407  ;;  %v9369_v39 = vadd.f32 %v6830_v51, %v9293_v37  ;;  %v3016_v9 = vmul.f32 1.442695, %v2970_v56  ;;  %v2968_v17 = vsub.f32 0.0, %v9366_v30  ;;  %v3026_v45 = vadd.f32 1.0, %v7406_v31 }
 0x522   : > { %v7410_v44 = vpop.eup %7409  ;;  %7431 = vrcp.f32 %v3034_v25  ;;  %v3032_v50 = vadd.f32 1.0, %v7408_v1  ;;  %v2936_v36 = vpop.f32.mrf.mxu1  ;;  %v9381_v56 = vadd.f32 %v9293_v37, %v2917_v20  ;;  %v9387_v31 = vadd.f32 %v6826_v14, %v9293_v37 }
 0x523   : > { %v7412_v22 = vpop.eup %7411  ;;  %7433 = vrcp.f32 %v3028_v52  ;;  %v2971_v62 = vsub.f32 0.0, %v9369_v39  ;;  %v9377_v54 = vadd.f32 %v9293_v37, %v2936_v36  ;;  %v3029_v1 = vadd.f32 1.0, %v7410_v44  ;;  %v3092_v36 = vld [vmem:[%s10532_s5 + $0x1c] sm:$0x4] }
 0x524   : > { %7435 = vrcp.f32 %v3032_v50  ;;  %v3035_v8 = vadd.f32 1.0, %v7412_v22  ;;  %v3012_v50 = vmul.f32 1.442695, %v2968_v17  ;;  %v3093_v20 = vunpack.c.l.bf16 %v3092_v36 }
 0x525   : > { %v7414_v51 = vpop.eup %7413  ;;  %7437 = vrcp.f32 %v3031_v49  ;;  %v3018_v49 = vmul.f32 1.442695, %v2971_v62  ;;  %v2969_v44 = vsub.f32 0.0, %v9377_v54  ;;  %v3008_v17 = vmul.f32 1.442695, %v2966_v7 }
 0x526   : > { %v7416_v25 = vpop.eup %7415  ;;  %7439 = vrcp.f32 %v3035_v8  ;;  %v3033_v52 = vadd.f32 1.0, %v7414_v51  ;;  %v2964_v35 = vsub.f32 0.0, %v9381_v56  ;;  %v2967_v62 = vsub.f32 0.0, %v9387_v31 }
 0x527   : > { %v7418_v59 = vpop.eup %7417  ;;  %7441 = vpow2.f32 %v3016_v9  ;;  %v3024_v8 = vadd.f32 1.0, %v7416_v25  ;;  %v3014_v47 = vmul.f32 1.442695, %v2969_v44 }
 0x528   : > { %7443 = vrcp.f32 %v3033_v52  ;;  %v7420_v22 = vpop.eup %7419  ;;  %v3027_v43 = vadd.f32 1.0, %v7418_v59  ;;  %v9393_v52 = vadd.f32 %v9293_v37, %v9359_v0  ;;  %v3004_v26 = vmul.f32 1.442695, %v2964_v35 }
 0x529   : > { %7445 = vrcp.f32 %v3026_v45  ;;  %v7422_v51 = vpop.eup %7421  ;;  %v3096_v45 = vsub.s32 5, %v8733_v46  ;;  %v3022_v59 = vadd.f32 1.0, %v7420_v22  ;;  %v3010_v5 = vmul.f32 1.442695, %v2967_v62 }
 0x52a   : > { %7447 = vrcp.f32 %v3029_v1  ;;  %v7424_v9 = vpop.eup %7423  ;;  %v2965_v37 = vsub.f32 0.0, %v9393_v52  ;;  %v3020_v23 = vadd.f32 1.0, %v7422_v51 }
 0x52b   : > { %7449 = vpow2.f32 %v3012_v50  ;;  %v7426_v14 = vpop.eup %7425  ;;  %v3025_v7 = vadd.f32 1.0, %v7424_v9 }
 0x52c   : > { %7451 = vpow2.f32 %v3018_v49  ;;  %v7428_v25 = vpop.eup %7427  ;;  %v9399_v49 = vrot.slane %v3093_v20, %v3096_v45  ;;  %v3006_v46 = vmul.f32 1.442695, %v2965_v37 }
 0x52d   : > { %7453 = vrcp.f32 %v3024_v8  ;;  %v7430_v1 = vpop.eup %7429  ;;  %v3023_v8 = vadd.f32 1.0, %v7426_v14 }
 0x52e   : > { %7455 = vrcp.f32 %v3027_v43 }
 0x52f   : > { %v7432_v36 = vpop.eup %7431  ;;  %7457 = vpow2.f32 %v3008_v17  ;;  %v3078_v17 = vmul.f32 %v7430_v1, %v9296_v3 }
 0x530   : > { %v7434_v0 = vpop.eup %7433  ;;  %v3082_v50 = vmul.f32 %v7432_v36, %v9318_v42  ;;  %7459 = vpow2.f32 %v3014_v47 }
 0x531   : > { %v7436_v44 = vpop.eup %7435  ;;  %7461 = vrcp.f32 %v3022_v59  ;;  %v3076_v59 = vmul.f32 %v7434_v0, %v9300_v40 }
 0x532   : > { %v7438_v22 = vpop.eup %7437  ;;  %7463 = vrcp.f32 %v3025_v7  ;;  %v3080_v43 = vmul.f32 %v7436_v44, %v9326_v29  ;;  %v3112_v9 = vmul.f32 %v9399_v49, %v3082_v50  ;;  %v3021_v29 = vadd.f32 1.0, %v7428_v25 }
 0x533   : > { %v7440_v35 = vpop.eup %7439  ;;  %7465 = vpow2.f32 %v3004_v26  ;;  %v3106_v44 = vmul.f32 %v9399_v49, %v3076_v59 }
 0x534   : > { %v7442_v42 = vpop.eup %7441  ;;  %v3083_v47 = vmul.f32 %v7440_v35, %v9337_v6  ;;  %7467 = vpow2.f32 %v3010_v5  ;;  %v3164_v20 = vsel %vm1486_vm8, %v3112_v9, 0.0  ;;  %v3110_v51 = vmul.f32 %v9399_v49, %v3080_v43 }
 0x535   : > { %v7444_v62 = vpop.eup %7443  ;;  %7469 = vrcp.f32 %v3020_v23  ;;  %3165 = vadd.xlane.f32.xlu0 %v3164_v20  ;;  %v3079_v6 = vmul.f32 %v7438_v22, %v9307_v19  ;;  %v3108_v5 = vmul.f32 %v9399_v49, %v3078_v17  ;;  %v3042_v7 = vadd.f32 1.0, %v7442_v42 }
 0x536   : > { %v7446_v14 = vpop.eup %7445  ;;  %7471 = vrcp.f32 %v3023_v8  ;;  %v3081_v45 = vmul.f32 %v7444_v62, %v9345_v4  ;;  %v3113_v3 = vmul.f32 %v9399_v49, %v3083_v47  ;;  %v3158_v36 = vsel %vm1486_vm8, %v3110_v51, 0.0 }
 0x537   : > { %v7448_v26 = vpop.eup %7447  ;;  %7473 = vpow2.f32 %v3006_v46  ;;  %v3074_v40 = vmul.f32 %v7446_v14, %v9303_v32  ;;  %v3152_v50 = vsel %vm1486_vm8, %v3108_v5, 0.0  ;;  %v3109_v9 = vmul.f32 %v9399_v49, %v3079_v6 }
 0x538   : > { %v7450_v1 = vpop.eup %7449  ;;  %v3167_v23 = vsel %vm1486_vm8, %v3113_v3, 0.0  ;;  %v3111_v25 = vmul.f32 %v9399_v49, %v3081_v45  ;;  %7475 = vrcp.f32 %v3021_v29  ;;  %v3077_v46 = vmul.f32 %v7448_v26, %v9311_v24 }
 0x539   : > { %v7452_v37 = vpop.eup %7451  ;;  %3168 = vadd.xlane.f32.xlu1 %v3167_v23  ;;  %3159 = vadd.xlane.f32.xlu0 %v3158_v36  ;;  %v3040_v19 = vadd.f32 1.0, %v7450_v1  ;;  %7477 = vrcp.f32 %v3042_v7  ;;  %v3104_v24 = vmul.f32 %v9399_v49, %v3074_v40  ;;  %v3146_v51 = vsel %vm1486_vm8, %v3106_v44, 0.0 }
 0x53a   : > { %v7454_v4 = vpop.eup %7453  ;;  %v3043_v8 = vadd.f32 1.0, %v7452_v37  ;;  %v3161_v43 = vsel %vm1486_vm8, %v3111_v25, 0.0  ;;  %v3155_v29 = vsel %vm1486_vm8, %v3109_v9, 0.0  ;;  %v3107_v45 = vmul.f32 %v9399_v49, %v3077_v46 }
 0x53b   : > { %v7456_v0 = vpop.eup %7455  ;;  %v3072_v32 = vmul.f32 %v7454_v4, %v9315_v11  ;;  %7479 = vrcp.f32 %v3040_v19  ;;  %v3140_v59 = vsel %vm1486_vm8, %v3104_v24, 0.0 }
 0x53c   : > { %v7458_v22 = vpop.eup %7457  ;;  %v3075_v47 = vmul.f32 %v7456_v0, %v9321_v16  ;;  %7481 = vrcp.f32 %v3043_v8  ;;  %v3149_v36 = vsel %vm1486_vm8, %v3107_v45, 0.0 }
 0x53d   : > { %v7460_v35 = vpop.eup %7459  ;;  %3162 = vadd.xlane.f32.xlu1 %v3161_v43  ;;  %3153 = vadd.xlane.f32.xlu0 %v3152_v50  ;;  %v3038_v20 = vadd.f32 1.0, %v7458_v22  ;;  %v3102_v25 = vmul.f32 %v9399_v49, %v3072_v32 }
 0x53e   : > { %v7462_v17 = vpop.eup %7461  ;;  %v3041_v14 = vadd.f32 1.0, %v7460_v35  ;;  %v3105_v1 = vmul.f32 %v9399_v49, %v3075_v47 }
 0x53f   : > { %v7464_v42 = vpop.eup %7463  ;;  %v3070_v26 = vmul.f32 %v7462_v17, %v9329_v57  ;;  %7483 = vrcp.f32 %v3038_v20  ;;  %v3134_v46 = vsel %vm1486_vm8, %v3102_v25, 0.0 }
 0x540   : > { %v7466_v62 = vpop.eup %7465  ;;  %v3073_v6 = vmul.f32 %v7464_v42, %v9341_v18  ;;  %7485 = vrcp.f32 %v3041_v14  ;;  %v3143_v18 = vsel %vm1486_vm8, %v3105_v1, 0.0 }
 0x541   : > { %v7468_v3 = vpop.eup %7467  ;;  %3156 = vadd.xlane.f32.xlu1 %v3155_v29  ;;  %3147 = vadd.xlane.f32.xlu0 %v3146_v51  ;;  %v3036_v5 = vadd.f32 1.0, %v7466_v62  ;;  %v3100_v40 = vmul.f32 %v9399_v49, %v3070_v26 }
 0x542   : > { %v7470_v11 = vpop.eup %7469  ;;  %v3039_v23 = vadd.f32 1.0, %v7468_v3  ;;  %v3103_v19 = vmul.f32 %v9399_v49, %v3073_v6 }
 0x543   : > { %v7472_v16 = vpop.eup %7471  ;;  %v3068_v57 = vmul.f32 %v7470_v11, %v9332_v12  ;;  %7487 = vrcp.f32 %v3036_v5  ;;  %v3128_v12 = vsel %vm1486_vm8, %v3100_v40, 0.0 }
 0x544   : > { %v7474_v7 = vpop.eup %7473  ;;  %v3071_v4 = vmul.f32 %v7472_v16, %v9349_v33  ;;  %7489 = vrcp.f32 %v3039_v23  ;;  %v3137_v43 = vsel %vm1486_vm8, %v3103_v19, 0.0 }
 0x545   : > { %3150 = vadd.xlane.f32.xlu1 %v3149_v36  ;;  %3141 = vadd.xlane.f32.xlu0 %v3140_v59  ;;  %v7476_v37 = vpop.eup %7475  ;;  %v3037_v0 = vadd.f32 1.0, %v7474_v7  ;;  %v3098_v9 = vmul.f32 %v9399_v49, %v3068_v57 }
 0x546   : > { %v7478_v50 = vpop.eup %7477  ;;  %v3069_v44 = vmul.f32 %v7476_v37, %v9352_v13  ;;  %v3101_v33 = vmul.f32 %v9399_v49, %v3071_v4 }
 0x547   : > { %7491 = vrcp.f32 %v3037_v0  ;;  %v3090_v8 = vmul.f32 %v7478_v50, %v9362_v27  ;;  %v3122_v47 = vsel %vm1486_vm8, %v3098_v9, 0.0 }
 0x548   : > { %v7480_v22 = vpop.eup %7479  ;;  %v3131_v17 = vsel %vm1486_vm8, %v3101_v33, 0.0  ;;  %v3099_v32 = vmul.f32 %v9399_v49, %v3069_v44  ;;  %v898_v33 = vsel %vm873_vm6, %v9247_v61, 0.0 }
 0x549   : > { %3144 = vadd.xlane.f32.xlu1 %v3143_v18  ;;  %3135 = vadd.xlane.f32.xlu0 %v3134_v46  ;;  %v7482_v35 = vpop.eup %7481  ;;  %v3088_v24 = vmul.f32 %v7480_v22, %v9366_v30  ;;  %v3120_v27 = vmul.f32 %v9399_v49, %v3090_v8  ;;  %v6058_v22 = vsel %vm839_vm1, 1.0, %v10767_v63  ;;  %v902_v8 = vsel %vm873_vm6, %v9250_v41, 0.0 }
 0x54a   : > { %v3091_v42 = vmul.f32 %v7482_v35, %v9369_v39  ;;  %v3125_v62 = vsel %vm1486_vm8, %v3099_v32, 0.0  ;;  %v903_v9 = vadd.f32 %v6058_v22, %v902_v8  ;;  %v6052_v35 = vsel %vm833_vm4, 1.0, %v10767_v63  ;;  %vm10892_vm4 = vmmov %vm10883_vm2 }
 0x54b   : > { %v3188_v45 = vsel %vm1486_vm8, %v3120_v27, 0.0  ;;  %v3118_v39 = vmul.f32 %v9399_v49, %v3088_v24  ;;  %v891_v61 = vadd.f32 %v6052_v35, %v890_v21  ;;  %v6048_v24 = vsel %vm829_vm7, 1.0, %v10767_v63  ;;  %v10798_v21 = vld [vmem:[#allocation64_spill] sm:$0xff]  ;;  %vm10887_vm7 = vmmov %vm10883_vm2 }
 0x54c   : > { %v7484_v13 = vpop.eup %7483  ;;  %v3121_v30 = vmul.f32 %v9399_v49, %v3091_v42  ;;  %v895_v42 = vadd.f32 %v6054_v15, %v894_v55  ;;  %v6050_v27 = vsel %vm831_vm13, 1.0, %v10767_v63  ;;  %v10799_v55 = vld [vmem:[#allocation58_spill] sm:$0xff]  ;;  %vm10889_vm13 = vmmov %vm10883_vm2 }
 0x54d   : > { %3138 = vadd.xlane.f32.xlu1 %v3137_v43  ;;  %3129 = vadd.xlane.f32.xlu0 %v3128_v12  ;;  %v7486_v20 = vpop.eup %7485  ;;  %v3086_v51 = vmul.f32 %v7484_v13, %v9372_v28  ;;  %v3182_v16 = vsel %vm1486_vm8, %v3118_v39, 0.0  ;;  %v6056_v12 = vsel %vm837_vm0, 1.0, %v10767_v63  ;;  %v6046_v39 = vsel %vm827_vm15, 1.0, %v10767_v63  ;;  %vm10896_vm0 = vmmov %vm10883_vm2 }
 0x54e   : > { %v3089_v29 = vmul.f32 %v7486_v20, %v9377_v54  ;;  %v3191_v59 = vsel %vm1486_vm8, %v3121_v30, 0.0  ;;  %v899_v43 = vadd.f32 %v6056_v12, %v898_v33  ;;  %v10794_v63 = vmov 0   ;;  %v10796_v12 = vld [vmem:[#allocation63_spill] sm:$0xff]  ;;  %vm10898_vm1 = vmmov %vm10896_vm0 }
 0x54f   : > { %v3116_v26 = vmul.f32 %v9399_v49, %v3086_v51  ;;  %vm10861_vm15 = vcmask 1041408  }
 0x550   : > { %v7488_v14 = vpop.eup %7487  ;;  %v3119_v54 = vmul.f32 %v9399_v49, %v3089_v29 }
 0x551   : > { %3132 = vadd.xlane.f32.xlu1 %v3131_v17  ;;  %3123 = vadd.xlane.f32.xlu0 %v3122_v47  ;;  %v7490_v3 = vpop.eup %7489  ;;  %v3084_v11 = vmul.f32 %v7488_v14, %v9381_v56  ;;  %v3176_v5 = vsel %vm1486_vm8, %v3116_v26, 0.0  ;;  %v882_v47 = vsel %vm873_vm6, %v9169_v34, 0.0  ;;  %v887_v34 = vadd.f32 %v6050_v27, %v886_v38 }
 0x552   : > { %v3087_v28 = vmul.f32 %v7490_v3, %v9387_v31  ;;  %v3185_v7 = vsel %vm1486_vm8, %v3119_v54, 0.0  ;;  %v883_v51 = vadd.f32 %v6048_v24, %v882_v47  ;;  %v10789_v3 = vld [vmem:[#allocation93_spill] sm:$0xff]  ;;  %v10790_v54 = vld [vmem:[#allocation66_spill] sm:$0xff] }
 0x553   : > { %v3114_v23 = vmul.f32 %v9399_v49, %v3084_v11  ;;  %v878_v11 = vsel %vm873_vm6, %v10789_v3, 0.0 }
 0x554   : > { %v7492_v6 = vpop.eup %7491  ;;  %v3117_v56 = vmul.f32 %v9399_v49, %v3087_v28  ;;  %v879_v26 = vadd.f32 %v6046_v39, %v878_v11  ;;  %v10804_v39 = vld [vmem:[#allocation54_spill] sm:$0xff] }
 0x555   : > { %3126 = vadd.xlane.f32.xlu1 %v3125_v62  ;;  %3189 = vadd.xlane.f32.xlu0 %v3188_v45  ;;  %v3085_v1 = vmul.f32 %v7492_v6, %v9393_v52  ;;  %v3170_v36 = vsel %vm1486_vm8, %v3114_v23, 0.0  ;;  %v9472_v52 = vpop.f32.mrf.mxu1  ;;  %v10787_v62 = vld [vmem:[#allocation92_spill] sm:$0xff] }
 0x556   : > { %v3179_v31 = vsel %vm1486_vm8, %v3117_v56, 0.0  ;;  %v874_v14 = vsel %vm873_vm6, %v10787_v62, 0.0 }
 0x557   : > { %v3115_v25 = vmul.f32 %v9399_v49, %v3085_v1  ;;  %v3391_v37 = vpop.f32.mrf.mxu1  ;;  %v875_v60 = vadd.f32 %v6044_v48, %v874_v14  ;;  %v10802_v48 = vld [vmem:[#allocation60_spill] sm:$0xff] }
 0x559   : > { %3192 = vadd.xlane.f32.xlu1 %v3191_v59  ;;  %3183 = vadd.xlane.f32.xlu0 %v3182_v16  ;;  %v3173_v57 = vsel %vm1486_vm8, %v3115_v25, 0.0  ;;  %v9474_v4 = vpop.f32.mrf.mxu1  ;;  %v10793_v25 = vld [vmem:[#allocation68_spill] sm:$0xff] }
 0x55a   : > { %v3422_v18 = vpack.c.bf16 %v9474_v4, %v9472_v52  ;;  %v10823_v52 = vld [vmem:[#allocation42_spill] sm:$0xff]  ;;  %v10824_v4 = vld [vmem:[#allocation49_spill] sm:$0xff] }
 0x55b   : > { %v3394_v40 = vpop.f32.mrf.mxu1 }
 0x55d   : > { %3186 = vadd.xlane.f32.xlu1 %v3185_v7  ;;  %3177 = vadd.xlane.f32.xlu0 %v3176_v5  ;;  %v9478_v0 = vpop.f32.mrf.mxu1  ;;  %v10791_v5 = vld [vmem:[#allocation67_spill] sm:$0xff] }
 0x55f   : > { %v3399_v46 = vpop.f32.mrf.mxu1 }
 0x560   : > { %v10795_v46 = vld [vmem:[#allocation62_spill] sm:$0xff] }
 0x561   : > { %3180 = vadd.xlane.f32.xlu1 %v3179_v31  ;;  %3171 = vadd.xlane.f32.xlu0 %v3170_v36  ;;  %v9480_v19 = vpop.f32.mrf.mxu1  ;;  %v10792_v31 = vld [vmem:[#allocation65_spill] sm:$0xff] }
 0x562   : > { %v3423_v49 = vpack.c.bf16 %v9480_v19, %v9478_v0  ;;  %v10826_v0 = vld [vmem:[#allocation52_spill] sm:$0xff] }
 0x563   : > { %v3402_v50 = vpop.f32.mrf.mxu1  ;;  %v7199_v19 = vld [vmem:[%s10532_s5 + $0x14] sm:$0x7c]  }
 0x565   : > { %3174 = vadd.xlane.f32.xlu1 %v3173_v57  ;;  %v9484_v44 = vpop.f32.mrf.mxu1  ;;  %900 = vadd.xlane.f32.xlu0 %v899_v43 }
 0x567   : > { %v3407_v17 = vpop.f32.mrf.mxu1 }
 0x569   : > { %904 = vadd.xlane.f32.xlu1 %v903_v9  ;;  %v9504_v32 = vpop.f32.mrf.mxu1  ;;  %892 = vadd.xlane.f32.xlu0 %v891_v61  ;;  %v10797_v9 = vld [vmem:[#allocation61_spill] sm:$0xff] }
 0x56a   : > { %v3424_v58 = vpack.c.bf16 %v9504_v32, %v9484_v44  ;;  %v3681_v44 = vshll.u32 %v7199_v19, 16 }
 0x56b   : > { %v3410_v41 = vpop.f32.mrf.mxu1 }
 0x56d   : > { %v9508_v13 = vpop.f32.mrf.mxu1  ;;  %896 = vadd.xlane.f32.xlu1 %v895_v42  ;;  %884 = vadd.xlane.f32.xlu0 %v883_v51  ;;  %v10800_v42 = vld [vmem:[#allocation59_spill] sm:$0xff]  ;;  %v10801_v51 = vld [vmem:[#allocation57_spill] sm:$0xff] }
 0x56f   : > { %v3415_v20 = vpop.f32.mrf.mxu1 }
 0x571   : > { %v9534_v29 = vpop.f32.mrf.mxu1  ;;  %888 = vadd.xlane.f32.xlu1 %v887_v34  ;;  %876 = vadd.xlane.f32.xlu0 %v875_v60 }
 0x572   : > { %v3425_v45 = vpack.c.bf16 %v9534_v29, %v9508_v13 }
 0x573   : > { %v3418_v53 = vpop.f32.mrf.mxu1 }
 0x574   : > { %v10803_v53 = vld [vmem:[#allocation55_spill] sm:$0xff] }
 0x575   : > { %880 = vadd.xlane.f32.xlu1 %v879_v26 }
 0x5be   : > { %v3166_v28 = vpop.xlane.xlu0 %3165 }
 0x5bf   : > { %v3208_v6 = vmul.f32 %v3166_v28, %v10790_v54  ;;  %v10806_v54 = vld [vmem:[#allocation56_spill] sm:$0xff] }
 0x5c2   : > { %v3169_v59 = vpop.xlane.xlu1 %3168  ;;  %v3160_v16 = vpop.xlane.xlu0 %3159 }
 0x5c3   : > { %v3209_v1 = vmul.f32 %v3169_v59, %v10791_v5  ;;  %v3206_v36 = vmul.f32 %v3160_v16, %v10792_v31  ;;  %v10805_v59 = vld [vmem:[#allocation53_spill] sm:$0xff]  ;;  %v10808_v31 = vld [vmem:[#allocation75_spill] sm:$0xff] }
 0x5c5   : > { %v3225_v7 = vpack.c.bf16 %v3209_v1, %v3208_v6 }
 0x5c6   : > { %v3163_v56 = vpop.xlane.xlu1 %3162  ;;  %v3154_v23 = vpop.xlane.xlu0 %3153 }
 0x5c7   : > { %v3207_v2 = vmul.f32 %v3163_v56, %v10793_v25  ;;  %3243 = vmatpush1.bf16.msra.mxu0 %v3225_v7  ;;  %v3204_v50 = vmul.f32 %v3154_v23, %v10795_v46  ;;  %v10807_v56 = vld [vmem:[#allocation74_spill] sm:$0xff]  ;;  %v7197_v25 = vld [vmem:[%s10532_s5 + $0x10] sm:$0x7c]  }
 0x5c8   : > { %3244 = vmatprep.subr.bf16.mxu0 %v10794_v63 }
 0x5c9   : > { %v3224_v57 = vpack.c.bf16 %v3207_v2, %v3206_v36 }
 0x5ca   : > { %v3157_v37 = vpop.xlane.xlu1 %3156  ;;  %v3148_v40 = vpop.xlane.xlu0 %3147 }
 0x5cb   : > { %v3205_v33 = vmul.f32 %v3157_v37, %v10796_v12  ;;  %3245 = vmatpush1.bf16.msra.mxu0 %v3224_v57  ;;  %v3202_v35 = vmul.f32 %v3148_v40, %v10797_v9  ;;  %v10809_v40 = vld [vmem:[#allocation73_spill] sm:$0xff] }
 0x5cc   : > { %3246 = vmatprep.subr.bf16.mxu0 %v10794_v63 }
 0x5cd   : > { %v3223_v22 = vpack.c.bf16 %v3205_v33, %v3204_v50  ;;  %v10810_v50 = vld [vmem:[#allocation76_spill] sm:$0xff]  ;;  %v3434_v33 = vshrl.u32 %v7197_v25, 16 }
 0x5ce   : > { %v3151_v8 = vpop.xlane.xlu1 %3150  ;;  %v3142_v43 = vpop.xlane.xlu0 %3141 }
 0x5cf   : > { %v3203_v17 = vmul.f32 %v3151_v8, %v10798_v21  ;;  %3247 = vmatpush1.bf16.msra.mxu0 %v3223_v22  ;;  %v3200_v24 = vmul.f32 %v3142_v43, %v10799_v55  ;;  %v3437_v22 = vshll.u32 %v7197_v25, 16  ;;  %v7198_v8 = vld [vmem:[%s10532_s5 + $0xc] sm:$0x7c]  }
 0x5d0   : > { %3248 = vmatprep.subr.bf16.mxu0 %v10794_v63 }
 0x5d1   : > { %v3222_v61 = vpack.c.bf16 %v3203_v17, %v3202_v35  ;;  %v10811_v35 = vld [vmem:[#allocation70_spill] sm:$0xff]  ;;  %v10812_v17 = vld [vmem:[#allocation71_spill] sm:$0xff]  ;;  %v3439_v55 = vrot.slane %v3437_v22, 3 }
 0x5d2   : > { %v3145_v41 = vpop.xlane.xlu1 %3144  ;;  %v3136_v15 = vpop.xlane.xlu0 %3135 }
 0x5d3   : > { %v3201_v47 = vmul.f32 %v3145_v41, %v10800_v42  ;;  %3249 = vmatpush1.bf16.msra.mxu0 %v3222_v61  ;;  %v3198_v10 = vmul.f32 %v3136_v15, %v10801_v51  ;;  %v3436_v15 = vrot.slane %v3434_v33, 2  ;;  %v3530_v42 = vshll.u32 %v7198_v8, 16  ;;  %v10814_v51 = vld [vmem:[#allocation72_spill] sm:$0xff] }
 0x5d4   : > { %3250 = vmatprep.subr.bf16.mxu0 %v10794_v63 }
 0x5d5   : > { %v3221_v27 = vpack.c.bf16 %v3201_v47, %v3200_v24  ;;  %v3527_v24 = vshrl.u32 %v7198_v8, 16 }
 0x5d6   : > { %v3139_v38 = vpop.xlane.xlu1 %3138  ;;  %v3130_v20 = vpop.xlane.xlu0 %3129 }
 0x5d7   : > { %v3199_v62 = vmul.f32 %v3139_v38, %v10802_v48  ;;  %3251 = vmatpush1.bf16.msra.mxu0 %v3221_v27  ;;  %v3196_v30 = vmul.f32 %v3130_v20, %v10803_v53  ;;  %v10813_v38 = vld [vmem:[#allocation69_spill] sm:$0xff]  ;;  %v3440_v48 = vor.u32 %v3439_v55, %v3436_v15 }
 0x5d8   : > { %3252 = vmatprep.subr.bf16.mxu0 %v10794_v63 }
 0x5d9   : > { %v3220_v14 = vpack.c.bf16 %v3199_v62, %v3198_v10  ;;  %v3529_v62 = vrot.slane %v3527_v24, 2 }
 0x5da   : > { %v3133_v34 = vpop.xlane.xlu1 %3132  ;;  %v3124_v60 = vpop.xlane.xlu0 %3123 }
 0x5db   : > { %v3197_v3 = vmul.f32 %v3133_v34, %v10804_v39  ;;  %3253 = vmatpush1.bf16.msra.mxu0 %v3220_v14  ;;  %v3194_v16 = vmul.f32 %v3124_v60, %v10805_v59  ;;  %v3532_v14 = vrot.slane %v3530_v42, 3  ;;  %v3454_v60 = vsel %vm1499_vm9, %v3440_v48, 0  ;;  %v10821_v59 = vld [vmem:[#allocation100_spill] sm:$0xff] }
 0x5dc   : > { %3254 = vmatprep.subr.bf16.mxu0 %v10794_v63 }
 0x5dd   : > { %v3219_v11 = vpack.c.bf16 %v3197_v3, %v3196_v30  ;;  %v3533_v53 = vor.u32 %v3532_v14, %v3529_v62  ;;  %v10815_v30 = vmov 1.0|1.0   ;;  %v10817_v3 = vld [vmem:[#allocation96_spill] sm:$0xff] }
 0x5de   : > { %v3127_v26 = vpop.xlane.xlu1 %3126  ;;  %v3190_v28 = vpop.xlane.xlu0 %3189 }
 0x5df   : > { %v3195_v6 = vmul.f32 %v3127_v26, %v10806_v54  ;;  %3255 = vmatpush1.bf16.msra.mxu0 %v3219_v11  ;;  %v3216_v23 = vmul.f32 %v3190_v28, %v10807_v56  ;;  %v10819_v26 = vld [vmem:[#allocation98_spill] sm:$0xff]  ;;  %v3535_v54 = vsel %vm1499_vm9, %v3533_v53, 0 }
 0x5e0   : > { %3256 = vmatprep.subr.bf16.mxu0 %v10794_v63 }
 0x5e1   : > { %v3218_v5 = vpack.c.bf16 %v3195_v6, %v3194_v16  ;;  %v10914_v16 = vld [vmem:[#allocation90_spill] sm:$0xff] }
 0x5e2   : > { %v3193_v1 = vpop.xlane.xlu1 %3192  ;;  %v3184_v7 = vpop.xlane.xlu0 %3183 }
 0x5e3   : > { %v3217_v36 = vmul.f32 %v3193_v1, %v10808_v31  ;;  %3257 = vmatpush1.bf16.msra.mxu0 %v3218_v5  ;;  %v3214_v46 = vmul.f32 %v3184_v7, %v10809_v40 }
 0x5e4   : > { %3266 = vmatprep.subr.bf16.mxu0 %v10794_v63 }
 0x5e5   : > { %v3229_v2 = vpack.c.bf16 %v3217_v36, %v3216_v23 }
 0x5e6   : > { %v3187_v57 = vpop.xlane.xlu1 %3186  ;;  %v3178_v37 = vpop.xlane.xlu0 %3177 }
 0x5e7   : > { %v3215_v12 = vmul.f32 %v3187_v57, %v10810_v50  ;;  %3267 = vmatpush2.bf16.msra.mxu0 %v3229_v2  ;;  %v3212_v21 = vmul.f32 %v3178_v37, %v10811_v35 }
 0x5e8   : > { %3268 = vmatprep.subr.bf16.mxu0 %v10794_v63 }
 0x5e9   : > { %v3228_v43 = vpack.c.bf16 %v3215_v12, %v3214_v46 }
 0x5ea   : > { %v3181_v9 = vpop.xlane.xlu1 %3180  ;;  %v3172_v41 = vpop.xlane.xlu0 %3171 }
 0x5eb   : > { %v3213_v61 = vmul.f32 %v3181_v9, %v10812_v17  ;;  %3269 = vmatpush2.bf16.msra.mxu0 %v3228_v43  ;;  %v3210_v20 = vmul.f32 %v3172_v41, %v10813_v38 }
 0x5ec   : > { %3270 = vmatprep.subr.bf16.mxu0 %v10794_v63 }
 0x5ed   : > { %v3227_v47 = vpack.c.bf16 %v3213_v61, %v3212_v21 }
 0x5ee   : > { %v3175_v27 = vpop.xlane.xlu1 %3174  ;;  %v901_v6 = vpop.xlane.xlu0 %900 }
 0x5ef   : > { %v3211_v10 = vmul.f32 %v3175_v27, %v10814_v51  ;;  %3271 = vmatpush2.bf16.msra.mxu0 %v3227_v47  ;;  %v912_v23 = vmax.f32 %v901_v6, 1.0  ;;  %v6198_v6 = vld [vmem:[%s10533_s6 + $0x3] ss:$0 sm:$0xff] }
 0x5f0   : > { %3272 = vmatprep.subr.bf16.mxu0 %v10794_v63 }
 0x5f1   : > { %v3226_v34 = vpack.c.bf16 %v3211_v10, %v3210_v20  ;;  %7493 = vrcp.f32 %v912_v23 }
 0x5f2   : > { %v893_v31 = vpop.xlane.xlu0 %892 }
 0x5f3   : > { %3273 = vmatpush2.bf16.msra.mxu0 %v3226_v34  ;;  %v910_v46 = vmax.f32 %v893_v31, 1.0 }
 0x5f4   : > { %7106 = vmatprep.subr.msk.bf16.mxu0 %vm1499_vm9, %v3440_v48 }
 0x5f6   : > { %6166 = vmatmul.mubr.msk.bf16.vlgmr.msra.gmra.mxu0 %vm9186_vm3, %v10815_v30  ;;  %v885_v50 = vpop.xlane.xlu0 %884 }
 0x5f7   : > { %6167 = vmatprep.mubr.msk.bf16.mxu0 %vm873_vm6, %v10817_v3  ;;  %6832 = vmatpush3.bf16.msra.mxu0 %v3454_v60  ;;  %v908_v43 = vmax.f32 %v885_v50, 1.0 }
 0x5f8   : > { %7107 = vmatprep.subr.msk.bf16.mxu0 %vm1499_vm9, %v3533_v53 }
 0x5fa   : > { %v877_v21 = vpop.xlane.xlu0 %876 }
 0x5fb   : > { %v906_v41 = vmax.f32 %v877_v21, 1.0 }
 0x5fe   : > { %6169 = vmatmul.mubr.msk.bf16.gmra.mxu0 %vm9225_vm14, %v10815_v30  ;;  %v7494_v15 = vpop.eup %7493 }
 0x5ff   : > { %6170 = vmatprep.mubr.msk.bf16.mxu0 %vm873_vm6, %v10819_v26 }
 0x606   : > { %6172 = vmatmul.mubr.msk.bf16.gmra.mxu0 %vm9258_vm12, %v10815_v30 }
 0x607   : > { %6173 = vmatprep.mubr.msk.bf16.mxu0 %vm873_vm6, %v10821_v59 }
 0x60e   : > { %6175 = vmatmul.mubr.msk.bf16.gmra.mxu0 %vm9281_vm11, %v10815_v30 }
 0x60f   : > { %6833 = vmatprep.mubr.msk.bf16.mxu0 %vm1486_vm8, %v3422_v18  ;;  %v10825_v18 = vld [vmem:[#allocation48_spill] sm:$0xff] }
 0x616   : > { %6834 = vmatmul.mubr.msk.bf16.vlgmr.msra.gmra.mxu0 %vm1486_vm8, %v3423_v49  ;;  %v3678_v49 = vshrl.u32 %v7199_v19, 16 }
 0x617   : > { %6837 = vmatprep.mubr.msk.bf16.mxu0 %vm1486_vm8, %v3424_v58  ;;  %6842 = vmatpush3.bf16.msra.mxu0 %v3535_v54  ;;  %v3683_v58 = vrot.slane %v3681_v44, 3 }
 0x618   : > { %v3680_v32 = vrot.slane %v3678_v49, 2 }
 0x61a   : > { %v3684_v13 = vor.u32 %v3683_v58, %v3680_v32 }
 0x61c   : > { %7108 = vmatprep.subr.msk.bf16.mxu0 %vm1499_vm9, %v3684_v13  ;;  %v3698_v29 = vsel %vm1499_vm9, %v3684_v13, 0 }
 0x61e   : > { %6838 = vmatmul.mubr.msk.bf16.gmra.mxu0 %vm1486_vm8, %v3425_v45  ;;  %v905_v45 = vpop.xlane.xlu1 %904 }
 0x61f   : > { %6843 = vmatprep.mubr.msk.bf16.mxu0 %vm1486_vm8, %v10823_v52  ;;  %v913_v25 = vmax.f32 %v905_v45, 1.0 }
 0x621   : > { %7495 = vrcp.f32 %v913_v25 }
 0x622   : > { %v897_v1 = vpop.xlane.xlu1 %896 }
 0x623   : > { %v911_v37 = vmax.f32 %v897_v1, 1.0 }
 0x625   : > { %7497 = vrcp.f32 %v911_v37 }
 0x626   : > { %6844 = vmatmul.mubr.msk.bf16.vlgmr.msra.gmra.mxu0 %vm1486_vm8, %v10824_v4  ;;  %v889_v2 = vpop.xlane.xlu1 %888  ;;  %7499 = vrcp.f32 %v910_v46 }
 0x627   : > { %6847 = vmatprep.mubr.msk.bf16.mxu0 %vm1486_vm8, %v10825_v18  ;;  %6852 = vmatpush3.bf16.msra.mxu0 %v3698_v29  ;;  %v909_v33 = vmax.f32 %v889_v2, 1.0 }
 0x629   : > { %7501 = vrcp.f32 %v909_v33 }
 0x62a   : > { %v881_v22 = vpop.xlane.xlu1 %880  ;;  %7503 = vrcp.f32 %v908_v43 }
 0x62b   : > { %v907_v35 = vmax.f32 %v881_v22, 1.0 }
 0x62d   : > { %7505 = vrcp.f32 %v907_v35 }
 0x62e   : > { %6848 = vmatmul.mubr.msk.bf16.gmra.mxu0 %vm1486_vm8, %v10826_v0  ;;  %v7496_v42 = vpop.eup %7495  ;;  %7507 = vrcp.f32 %v906_v41 }
 0x632   : > { %v7498_v27 = vpop.eup %7497 }
 0x633   : > { %v7500_v51 = vpop.eup %7499 }
 0x636   : > { %v7502_v62 = vpop.eup %7501 }
 0x637   : > { %v7504_v60 = vpop.eup %7503 }
 0x63a   : > { %v7506_v52 = vpop.eup %7505 }
 0x63b   : > { %v7508_v49 = vpop.eup %7507 }
 0x6b6   : > { %v9636_v5 = vpop.f32.mrf.mxu0 }
 0x6b7   : > { %v3307_v58 = vmul.f32 %v7508_v49, %v9636_v5 }
 0x6b8   : > { %v3278_v7 = vpop.f32.mrf.mxu0 }
 0x6ba   : > { %v3279_v56 = vpop.f32.mrf.mxu0 }
 0x6bb   : > { %v3308_v0 = vmul.f32 %v7506_v52, %v3279_v56 }
 0x6bc   : > { %v3281_v36 = vpop.f32.mrf.mxu0 }
 0x6be   : > { %v3284_v57 = vpop.f32.mrf.mxu0 }
 0x6bf   : > { %v3309_v19 = vmul.f32 %v7504_v60, %v3284_v57 }
 0x6c0   : > { %v3286_v40 = vpop.f32.mrf.mxu0 }
 0x6c2   : > { %v3287_v12 = vpop.f32.mrf.mxu0 }
 0x6c3   : > { %v3310_v53 = vmul.f32 %v7502_v62, %v3287_v12 }
 0x6c4   : > { %v3289_v8 = vpop.f32.mrf.mxu0 }
 0x6c6   : > { %v3292_v9 = vpop.f32.mrf.mxu0 }
 0x6c7   : > { %v3311_v54 = vmul.f32 %v7500_v51, %v3292_v9 }
 0x6c8   : > { %v3294_v17 = vpop.f32.mrf.mxu0 }
 0x6ca   : > { %v3295_v61 = vpop.f32.mrf.mxu0 }
 0x6cb   : > { %v3312_v10 = vmul.f32 %v7498_v27, %v3295_v61 }
 0x6cc   : > { %v3297_v55 = vpop.f32.mrf.mxu0 }
 0x6ce   : > { %v3300_v24 = vpop.f32.mrf.mxu0 }
 0x6cf   : > { %v3313_v47 = vmul.f32 %v7494_v15, %v3300_v24 }
 0x6d0   : > { %v3302_v38 = vpop.f32.mrf.mxu0 }
 0x6d1   : > { %3335 = vrot.lane.b32.xlu0 %v3313_v47, %s7840_s14 }
 0x6d2   : > { %v3303_v20 = vpop.f32.mrf.mxu0 }
 0x6d3   : > { %v3314_v48 = vmul.f32 %v7496_v42, %v3303_v20 }
 0x6d4   : > { %v3305_v14 = vpop.f32.mrf.mxu0 }
 0x6d5   : > { %3337 = vrot.lane.b32.xlu1 %v3314_v48, %s7840_s14  ;;  %3333 = vrot.lane.b32.xlu0 %v3312_v10, %s7840_s14 }
 0x6d6   : > { %v6835_v34 = vpop.f32.mrf.mxu0 }
 0x6d8   : > { %v3490_v4 = vpop.f32.mrf.mxu0 }
 0x6d9   : > { %3329 = vrot.lane.b32.xlu0 %v3310_v53, %s7840_s14  ;;  %3331 = vrot.lane.b32.xlu1 %v3311_v54, %s7840_s14 }
 0x6da   : > { %v6836_v18 = vpop.f32.mrf.mxu0 }
 0x6dc   : > { %v3493_v44 = vpop.f32.mrf.mxu0 }
 0x6dd   : > { %3325 = vrot.lane.b32.xlu0 %v3308_v0, %s7840_s14  ;;  %3327 = vrot.lane.b32.xlu1 %v3309_v19, %s7840_s14 }
 0x6de   : > { %v6839_v32 = vpop.f32.mrf.mxu0 }
 0x6e0   : > { %v3506_v13 = vpop.f32.mrf.mxu0 }
 0x6e1   : > { %3323 = vrot.lane.b32.xlu1 %v3307_v58, %s7840_s14  ;;  %s6341_s14 = sshll.u32 %s7915_s13, 10  ;;  %s10487_s13 = scalar_lea.sflag [#allocation3], %s366_s24 }
 0x6e2   : > { %v6840_v29 = vpop.f32.mrf.mxu0  ;;  %s10481_s22 = scalar_lea.hbm %s10536_s9, %s6341_s14 }
 0x6e4   : > { %v3509_v45 = vpop.f32.mrf.mxu0 }
 0x6e6   : > { %v6845_v1 = vpop.f32.mrf.mxu0 }
 0x6e7   : > { %v3580_v7 = vadd.f32 %v6845_v1, %v6835_v34 }
 0x6e8   : > { %v3571_v23 = vpop.f32.mrf.mxu0 }
 0x6e9   : > { %v9642_v56 = vadd.f32 %v6198_v6, %v3580_v7  ;;  %v3572_v31 = vadd.f32 %v3571_v23, %v3490_v4 }
 0x6ea   : > { %v6846_v36 = vpop.f32.mrf.mxu0 }
 0x6eb   : > { %v3616_v25 = vsub.f32 0.0, %v9642_v56  ;;  %v9645_v2 = vadd.f32 %v6198_v6, %v3572_v31  ;;  %v3583_v5 = vadd.f32 %v6846_v36, %v6836_v18 }
 0x6ec   : > { %v3574_v57 = vpop.f32.mrf.mxu0 }
 0x6ed   : > { %v3626_v37 = vmul.f32 1.442695, %v3616_v25  ;;  %v3614_v40 = vsub.f32 0.0, %v9645_v2  ;;  %v9648_v46 = vadd.f32 %v6198_v6, %v3583_v5  ;;  %v3575_v50 = vadd.f32 %v3574_v57, %v3493_v44 }
 0x6ee   : > { %v6849_v12 = vpop.f32.mrf.mxu0 }
 0x6ef   : > { %v3622_v33 = vmul.f32 1.442695, %v3614_v40  ;;  %v3617_v22 = vsub.f32 0.0, %v9648_v46  ;;  %v3607_v8 = vadd.f32 %v6198_v6, %v3575_v50  ;;  %7509 = vpow2.f32 %v3626_v37 }
 0x6f0   : > { %v3596_v43 = vadd.f32 %v6849_v12, %v6839_v32  ;;  %v3587_v9 = vpop.f32.mrf.mxu0 }
 0x6f1   : > { %7511 = vpow2.f32 %v3622_v33  ;;  %v3628_v35 = vmul.f32 1.442695, %v3617_v22  ;;  %v3615_v21 = vsub.f32 0.0, %v3607_v8  ;;  %v3588_v17 = vadd.f32 %v3587_v9, %v3506_v13 }
 0x6f2   : > { %v9651_v61 = vadd.f32 %v6198_v6, %v3596_v43  ;;  %v6850_v41 = vpop.f32.mrf.mxu0 }
 0x6f3   : > { %7513 = vpow2.f32 %v3628_v35  ;;  %v3624_v15 = vmul.f32 1.442695, %v3615_v21  ;;  %v3610_v55 = vadd.f32 %v6198_v6, %v3588_v17  ;;  %v3599_v24 = vadd.f32 %v6850_v41, %v6840_v29  ;;  %v10827_v21 = vld [vmem:[#allocation7_spill] sm:$0xff] }
 0x6f4   : > { %v3620_v42 = vsub.f32 0.0, %v9651_v61  ;;  %v3590_v47 = vpop.f32.mrf.mxu0 }
 0x6f5   : > { %7515 = vpow2.f32 %v3624_v15  ;;  %v3618_v27 = vsub.f32 0.0, %v3610_v55  ;;  %v3613_v38 = vadd.f32 %v6198_v6, %v3599_v24  ;;  %v3591_v20 = vadd.f32 %v3590_v47, %v3509_v45  ;;  %v7765_v24 = vld [vmem:[%s7956_s28 + $0x30] sm:$0xff] }
 0x6f6   : > { %v3634_v51 = vmul.f32 1.442695, %v3620_v42  ;;  %v7766_v42 = vld [vmem:[%s7956_s28 + $0x38] sm:$0xff] }
 0x6f7   : > { %v3630_v10 = vmul.f32 1.442695, %v3618_v27  ;;  %v3621_v48 = vsub.f32 0.0, %v3613_v38  ;;  %v3611_v62 = vadd.f32 %v6198_v6, %v3591_v20  ;;  %v7767_v20 = vld [vmem:[%s7956_s28 + $0x28] sm:$0xff] }
 0x6f8   : > { %7517 = vpow2.f32 %v3634_v51 }
 0x6f9   : > { %7519 = vpow2.f32 %v3630_v10  ;;  %v3636_v14 = vmul.f32 1.442695, %v3621_v48  ;;  %v3619_v34 = vsub.f32 0.0, %v3611_v62  ;;  %v7768_v10 = vld [vmem:[%s7956_s28 + $0x20] sm:$0xff] }
 0x6fb   : > { %7521 = vpow2.f32 %v3636_v14  ;;  %v3632_v60 = vmul.f32 1.442695, %v3619_v34 }
 0x6fc   : > { %v7510_v53 = vpop.eup %7509 }
 0x6fd   : > { %7523 = vpow2.f32 %v3632_v60  ;;  %v3640_v18 = vadd.f32 1.0, %v7510_v53  ;;  %v7769_v53 = vld [vmem:[%s7956_s28 + $0x18] sm:$0xff] }
 0x6fe   : > { %v7512_v54 = vpop.eup %7511 }
 0x6ff   : > { %v3638_v52 = vadd.f32 1.0, %v7512_v54 }
 0x700   : > { %v7514_v4 = vpop.eup %7513 }
 0x701   : > { %v3641_v0 = vadd.f32 1.0, %v7514_v4  ;;  %7525 = vrcp.f32 %v3638_v52  ;;  %v7770_v52 = vld [vmem:[%s7956_s28 + $0x10] sm:$0xff] }
 0x702   : > { %v7516_v19 = vpop.eup %7515 }
 0x703   : > { %7527 = vrcp.f32 %v3641_v0  ;;  %v3639_v49 = vadd.f32 1.0, %v7516_v19 }
 0x704   : > { %7529 = vrcp.f32 %v3640_v18 }
 0x705   : > { %v7518_v44 = vpop.eup %7517  ;;  %7531 = vrcp.f32 %v3639_v49 }
 0x706   : > { %v7520_v32 = vpop.eup %7519  ;;  %v3644_v29 = vadd.f32 1.0, %v7518_v44 }
 0x707   : > { %v3642_v58 = vadd.f32 1.0, %v7520_v32 }
 0x708   : > { %v7522_v13 = vpop.eup %7521 }
 0x709   : > { %v3645_v45 = vadd.f32 1.0, %v7522_v13  ;;  %7533 = vrcp.f32 %v3642_v58 }
 0x70a   : > { %v7524_v6 = vpop.eup %7523 }
 0x70b   : > { %7535 = vrcp.f32 %v3645_v45  ;;  %v3643_v1 = vadd.f32 1.0, %v7524_v6  ;;  %v7771_v45 = vld [vmem:[%s7956_s28 + $0x8] sm:$0xff] }
 0x70c   : > { %7537 = vrcp.f32 %v3644_v29 }
 0x70d   : > { %7539 = vrcp.f32 %v3643_v1  ;;  %v7772_v1 = vld [vmem:[%s7956_s28] sm:$0xff] }
 0x70e   : > { %v7526_v7 = vpop.eup %7525 }
 0x70f   : > { %v3654_v5 = vmul.f32 %v7526_v7, %v9645_v2 }
 0x710   : > { %v7528_v23 = vpop.eup %7527 }
 0x711   : > { %v7530_v31 = vpop.eup %7529  ;;  %v3657_v25 = vmul.f32 %v7528_v23, %v9648_v46 }
 0x712   : > { %v7532_v36 = vpop.eup %7531  ;;  %v3656_v37 = vmul.f32 %v7530_v31, %v9642_v56 }
 0x713   : > { %v3655_v57 = vmul.f32 %v7532_v36, %v3607_v8 }
 0x714   : > { %v3663_v50 = vpack.c.bf16 %v3657_v25, %v3656_v37 }
 0x715   : > { %v3662_v40 = vpack.c.bf16 %v3655_v57, %v3654_v5 }
 0x716   : > { %v7534_v12 = vpop.eup %7533 }
 0x717   : > { %6853 = vmatprep.mubr.msk.bf16.mxu0 %vm1486_vm8, %v3662_v40  ;;  %v3658_v35 = vmul.f32 %v7534_v12, %v3610_v55 }
 0x718   : > { %v7536_v33 = vpop.eup %7535  ;;  %6854 = vmatmul.mubr.msk.bf16.vlgmr.msra.gmra.mxu0 %vm1486_vm8, %v3663_v50 }
 0x719   : > { %v7538_v22 = vpop.eup %7537  ;;  %v3661_v9 = vmul.f32 %v7536_v33, %v3613_v38 }
 0x71a   : > { %v7540_v43 = vpop.eup %7539  ;;  %v3660_v2 = vmul.f32 %v7538_v22, %v9651_v61 }
 0x71b   : > { %v3659_v46 = vmul.f32 %v7540_v43, %v3611_v62 }
 0x71c   : > { %v3665_v56 = vpack.c.bf16 %v3661_v9, %v3660_v2 }
 0x71d   : > { %v3664_v8 = vpack.c.bf16 %v3659_v46, %v3658_v35 }
 0x71f   : > { %6857 = vmatprep.mubr.msk.bf16.mxu0 %vm1486_vm8, %v3664_v8 }
 0x720   : > { %6858 = vmatmul.mubr.msk.bf16.gmra.mxu0 %vm1486_vm8, %v3665_v56  ;;  %v6234_v56 = vld [vmem:[%s10532_s5 + $0x24] sm:$0xf] }
 0x721   : > { %6901 = vmatprep.mubr.msk.bf16.mxu0 %vm873_vm6, %v10827_v21 }
 0x743   : > { %v3336_v17 = vpop.permute.xlu0 %3335 }
 0x744   : > { %v3353_v55 = vadd.f32 %v7765_v24, %v3336_v17  ;;  %v4275_v17 = vsel %vm1499_vm9, %v6234_v56, 0  ;;  %v10829_v24 = vld [vmem:[#allocation13_spill] sm:$0xff] }
 0x747   : > { %v3338_v41 = vpop.permute.xlu1 %3337  ;;  %v3334_v15 = vpop.permute.xlu0 %3333 }
 0x748   : > { %v3354_v61 = vadd.f32 %v7766_v42, %v3338_v41  ;;  %v3352_v51 = vadd.f32 %v7767_v20, %v3334_v15  ;;  %v10828_v41 = vld [vmem:[#allocation11_spill] sm:$0xff]  ;;  %v6229_v42 = vld [vmem:[%s10532_s5 + $0x20] sm:$0xf] }
 0x74a   : > { %v3784_v47 = vpack.c.bf16 %v3354_v61, %v3353_v55 }
 0x74b   : > { %v3332_v27 = vpop.permute.xlu1 %3331  ;;  %v3330_v38 = vpop.permute.xlu0 %3329 }
 0x74c   : > { %v3351_v48 = vadd.f32 %v7768_v10, %v3332_v27  ;;  %3960 = vrot.lane.b32.xlu1 %v3784_v47, %s7837_s17  ;;  %v3791_v62 = vunpack.c.l.bf16 %v3784_v47  ;;  %v3792_v14 = vunpack.c.h.bf16 %v3784_v47  ;;  %v3350_v54 = vadd.f32 %v7769_v53, %v3330_v38  ;;  %v10831_v27 = vld [vmem:[#allocation19_spill] sm:$0xff]  ;;  %v10832_v10 = vld [vmem:[#allocation22_spill] sm:$0xff] }
 0x74d   : > { %v4206_v38 = vsel %vm1499_vm9, %v6229_v42, 0 }
 0x74e   : > { %v3783_v34 = vpack.c.bf16 %v3352_v51, %v3351_v48  ;;  %v3799_v18 = vsub.f32 %v3353_v55, %v3791_v62  ;;  %v3800_v0 = vsub.f32 %v3354_v61, %v3792_v14  ;;  %v10830_v61 = vld [vmem:[#allocation16_spill] sm:$0xff] }
 0x74f   : > { %v3328_v60 = vpop.permute.xlu1 %3327  ;;  %v3326_v49 = vpop.permute.xlu0 %3325 }
 0x750   : > { %v3349_v4 = vadd.f32 %v7770_v52, %v3328_v60  ;;  %3958 = vrot.lane.b32.xlu0 %v3783_v34, %s7837_s17  ;;  %v3789_v19 = vunpack.c.l.bf16 %v3783_v34  ;;  %v3790_v44 = vunpack.c.h.bf16 %v3783_v34  ;;  %v3348_v6 = vadd.f32 %v7771_v45, %v3326_v49  ;;  %v10834_v34 = vld [vmem:[#allocation28_spill] sm:$0xff]  ;;  %v10835_v60 = vld [vmem:[#allocation31_spill] sm:$0xff] }
 0x751   : > { %v3804_v23 = vpack.c.bf16 %v3800_v0, %v3799_v18  ;;  %v10836_v18 = vld [vmem:[#allocation34_spill] sm:$0xff]  ;;  %v10838_v49 = vld [vmem:[#allocation40_spill] sm:$0xff] }
 0x752   : > { %v3782_v32 = vpack.c.bf16 %v3350_v54, %v3349_v4  ;;  %v3797_v31 = vsub.f32 %v3351_v48, %v3789_v19  ;;  %v3798_v36 = vsub.f32 %v3352_v51, %v3790_v44  ;;  %v10833_v48 = vld [vmem:[#allocation25_spill] sm:$0xff] }
 0x753   : > { %v3324_v58 = vpop.permute.xlu1 %3323  ;;  %v10837_v19 = vld [vmem:[#allocation37_spill] sm:$0xff] }
 0x754   : > { %v3787_v13 = vunpack.c.l.bf16 %v3782_v32  ;;  %v3788_v29 = vunpack.c.h.bf16 %v3782_v32  ;;  %v3347_v7 = vadd.f32 %v7772_v1, %v3324_v58  ;;  %3956 = vrot.lane.b32.xlu1 %v3782_v32, %s7837_s17  ;;  %v3803_v50 = vpack.c.bf16 %v3798_v36, %v3797_v31  ;;  %v10840_v58 = vld [vmem:[#allocation39_spill] sm:$0xff] }
 0x755   : > { %v10844_v31 = vld [vmem:[#allocation47_spill] sm:$0xff] }
 0x756   : > { %v3795_v25 = vsub.f32 %v3349_v4, %v3787_v13  ;;  %v3796_v5 = vsub.f32 %v3350_v54, %v3788_v29  ;;  %v3781_v57 = vpack.c.bf16 %v3348_v6, %v3347_v7  ;;  %v6199_v54 = vld [vmem:[%s10533_s6 + $0x4] ss:$0 sm:$0xff] }
 0x758   : > { %v3785_v37 = vunpack.c.l.bf16 %v3781_v57  ;;  %v3786_v40 = vunpack.c.h.bf16 %v3781_v57  ;;  %3815 = vrot.lane.b32.xlu1 %v3804_v23, %s7837_s17  ;;  %3954 = vrot.lane.b32.xlu0 %v3781_v57, %s7837_s17  ;;  %v3802_v12 = vpack.c.bf16 %v3796_v5, %v3795_v25  ;;  %v10846_v25 = vld [vmem:[#allocation45_spill] sm:$0xff]  ;;  %v10848_v57 = vld [vmem:[#allocation46_spill] sm:$0xff] }
 0x75a   : > { %v3793_v33 = vsub.f32 %v3347_v7, %v3785_v37  ;;  %v3794_v22 = vsub.f32 %v3348_v6, %v3786_v40  ;;  %v10843_v7 = vld [vmem:[#allocation43_spill] sm:$0xff]  ;;  %v10850_v40 = vld [vmem:[#allocation44_spill] sm:$0xff] }
 0x75c   : > { %3811 = vrot.lane.b32.xlu1 %v3802_v12, %s7837_s17  ;;  %3813 = vrot.lane.b32.xlu0 %v3803_v50, %s7837_s17  ;;  %v3801_v43 = vpack.c.bf16 %v3794_v22, %v3793_v33 }
 0x760   : > { %3809 = vrot.lane.b32.xlu0 %v3801_v43, %s7837_s17  ;;  %s7773_s17 = scalar_lea.vmem %s10483_s16, 1024 }
 0x761   : > { %p7774_p11 = scmp.ne.s32.totalorder %s10483_s16, %s7773_s17  ;;  %p7781_p1 = scmp.lt.s32.totalorder %s7779_s27, %s7773_s17 }
 0x763   : > { %p7775_p12 = pnand %p7774_p11, %p7932_p5  ;;  %p7782_p2 = por %p7781_p1, %p7780_p0 }
 0x765   : > { %p7776_p13 = pneg %p7775_p12 }
 0x767   : > { %p7783_p3 = pnand %p7782_p2, %p7776_p13 }
 0x7be   : > { %v3961_v9 = vpop.permute.xlu1 %3960 }
 0x7bf   : > { %6893 = vmatprep.subr.bf16.mxu0 %v3961_v9 }
 0x7c0   : > { %6894 = vmatpush3.bf16.msra.mxu0 %v3961_v9  ;;  %v10854_v9 = vld [vmem:[#allocation51_spill] sm:$0xff] }
 0x7c2   : > { %v3959_v35 = vpop.permute.xlu0 %3958 }
 0x7c3   : > { %6895 = vmatprep.subr.bf16.mxu0 %v3959_v35 }
 0x7c4   : > { %6896 = vmatpush3.bf16.msra.mxu0 %v3959_v35 }
 0x7c6   : > { %v3957_v46 = vpop.permute.xlu1 %3956 }
 0x7c7   : > { %6897 = vmatprep.subr.bf16.mxu0 %v3957_v46 }
 0x7c8   : > { %6898 = vmatpush3.bf16.msra.mxu0 %v3957_v46  ;;  %v10856_v46 = vld [vmem:[#allocation50_spill] sm:$0xff] }
 0x7ca   : > { %v3816_v2 = vpop.permute.xlu1 %3815  ;;  %v3955_v8 = vpop.permute.xlu0 %3954 }
 0x7cb   : > { %6861 = vmatprep.subr.bf16.mxu1 %v3816_v2  ;;  %6899 = vmatprep.subr.bf16.mxu0 %v3955_v8 }
 0x7cc   : > { %6862 = vmatpush3.bf16.msra.mxu1 %v3816_v2  ;;  %6900 = vmatpush3.bf16.msra.mxu0 %v3955_v8 }
 0x7cd   : > { %7110 = vmatprep.subr.msk.bf16.mxu0 %vm1499_vm9, %v6234_v56  ;;  %v10859_v56 = vld [vmem:[#allocation5_spill] sm:$0xff] }
 0x7ce   : > { %v3814_v21 = vpop.permute.xlu0 %3813  ;;  %v3812_v15 = vpop.permute.xlu1 %3811 }
 0x7cf   : > { %6863 = vmatprep.subr.bf16.mxu1 %v3814_v21  ;;  %6902 = vmatmul.mubr.msk.bf16.vlgmr.msra.gmra.mxu0 %vm873_vm6, %v10828_v41 }
 0x7d0   : > { %6864 = vmatpush3.bf16.msra.mxu1 %v3814_v21  ;;  %6905 = vmatprep.mubr.msk.bf16.mxu0 %vm873_vm6, %v10829_v24  ;;  %v10860_v21 = vld [vmem:[#allocation6_spill] sm:$0xff] }
 0x7d1   : > { %6936 = vmatpush3.bf16.msra.mxu0 %v4275_v17  ;;  %6865 = vmatprep.subr.bf16.mxu1 %v3812_v15 }
 0x7d2   : > { %v3810_v55 = vpop.permute.xlu0 %3809 }
 0x7d4   : > { %6866 = vmatpush3.bf16.msra.mxu1 %v3812_v15 }
 0x7d5   : > { %6867 = vmatprep.subr.bf16.mxu1 %v3810_v55 }
 0x7d7   : > { %6906 = vmatmul.mubr.msk.bf16.gmra.mxu0 %vm873_vm6, %v10830_v61 }
 0x7d8   : > { %v6855_v47 = vpop.f32.mrf.mxu0  ;;  %6868 = vmatpush3.bf16.msra.mxu1 %v3810_v55  ;;  %6909 = vmatprep.mubr.msk.bf16.mxu0 %vm873_vm6, %v10831_v27 }
 0x7d9   : > { %7109 = vmatprep.subr.msk.bf16.mxu1 %vm1499_vm9, %v6229_v42  ;;  %v3743_v1 = vadd.f32 %v6855_v47, %v6199_v54 }
 0x7da   : > { %v3734_v20 = vpop.f32.mrf.mxu0 }
 0x7db   : > { %6870 = vmatmul.mubr.msk.bf16.vlgmr.msra.gmra.mxu1 %vm873_vm6, %v10828_v41  ;;  %v3735_v0 = vadd.f32 %v6199_v54, %v3734_v20  ;;  %v9750_v37 = vadd.f32 %v3743_v1, %v10848_v57 }
 0x7dc   : > { %6873 = vmatprep.mubr.msk.bf16.mxu1 %vm873_vm6, %v10829_v24  ;;  %6926 = vmatpush3.bf16.msra.mxu1 %v4206_v38  ;;  %v6856_v51 = vpop.f32.mrf.mxu0 }
 0x7dd   : > { %v9731_v13 = vadd.f32 %v3735_v0, %v10840_v58  ;;  %v3746_v29 = vadd.f32 %v6856_v51, %v6199_v54  ;;  %10849 = vst [vmem:[#allocation67_spill] sm:$0xff] %v9750_v37 }
 0x7de   : > { %v3737_v62 = vpop.f32.mrf.mxu0 }
 0x7df   : > { %6910 = vmatmul.mubr.msk.bf16.gmra.mxu0 %vm873_vm6, %v10832_v10  ;;  %v3738_v52 = vadd.f32 %v6199_v54, %v3737_v62  ;;  %10841 = vst [vmem:[#allocation92_spill] sm:$0xff] %v9731_v13  ;;  %v9744_v36 = vadd.f32 %v3746_v29, %v10844_v31 }
 0x7e0   : > { %6913 = vmatprep.mubr.msk.bf16.mxu0 %vm873_vm6, %v10833_v48  ;;  %v6859_v14 = vpop.f32.mrf.mxu0 }
 0x7e1   : > { %v9726_v44 = vadd.f32 %v3738_v52, %v10838_v49  ;;  %10845 = vst [vmem:[#allocation93_spill] sm:$0xff] %v9744_v36  ;;  %v9761_v12 = vpack.c.bf16 %v9744_v36, %v9750_v37  ;;  %v3759_v43 = vadd.f32 %v6859_v14, %v6199_v54 }
 0x7e2   : > { %v3750_v53 = vpop.f32.mrf.mxu0 }
 0x7e3   : > { %6874 = vmatmul.mubr.msk.bf16.gmra.mxu1 %vm873_vm6, %v10830_v61  ;;  %10839 = vst [vmem:[#allocation89_spill] sm:$0xff] %v9726_v44  ;;  %v9737_v45 = vpack.c.bf16 %v9726_v44, %v9731_v13  ;;  %v3751_v23 = vadd.f32 %v6199_v54, %v3750_v53  ;;  %10852 = vst [vmem:[#allocation68_spill] sm:$0xff] %v9761_v12  ;;  %v9775_v2 = vadd.f32 %v3759_v43, %v10856_v46 }
 0x7e4   : > { %6877 = vmatprep.mubr.msk.bf16.mxu1 %vm873_vm6, %v10831_v27  ;;  %v6860_v4 = vpop.f32.mrf.mxu0 }
 0x7e5   : > { %10842 = vst [vmem:[#allocation91_spill] sm:$0xff] %v9737_v45  ;;  %v9755_v50 = vadd.f32 %v3751_v23, %v10850_v40  ;;  %v3762_v33 = vadd.f32 %v6860_v4, %v6199_v54  ;;  %10857 = vst [vmem:[#allocation61_spill] sm:$0xff] %v9775_v2 }
 0x7e6   : > { %v3753_v32 = vpop.f32.mrf.mxu0 }
 0x7e7   : > { %6914 = vmatmul.mubr.msk.bf16.gmra.mxu0 %vm873_vm6, %v10834_v34  ;;  %v3754_v6 = vadd.f32 %v6199_v54, %v3753_v32  ;;  %10851 = vst [vmem:[#allocation65_spill] sm:$0xff] %v9755_v50  ;;  %v9772_v35 = vadd.f32 %v3762_v33, %v10854_v9 }
 0x7e8   : > { %6917 = vmatprep.mubr.msk.bf16.mxu0 %vm873_vm6, %v10835_v60 }
 0x7e9   : > { %v9747_v5 = vadd.f32 %v3754_v6, %v10846_v25  ;;  %10855 = vst [vmem:[#allocation63_spill] sm:$0xff] %v9772_v35  ;;  %v9783_v8 = vpack.c.bf16 %v9772_v35, %v9775_v2 }
 0x7eb   : > { %6878 = vmatmul.mubr.msk.bf16.gmra.mxu1 %vm873_vm6, %v10832_v10  ;;  %10847 = vst [vmem:[#allocation66_spill] sm:$0xff] %v9747_v5  ;;  %v9765_v22 = vpack.c.bf16 %v9747_v5, %v9755_v50  ;;  %10858 = vst [vmem:[#allocation64_spill] sm:$0xff] %v9783_v8  ;;  %v6263_v5 = vld [vmem:[%s10532_s5 + $0x28] sm:$0x1] }
 0x7ec   : > { %6881 = vmatprep.mubr.msk.bf16.mxu1 %vm873_vm6, %v10833_v48  ;;  %v4609_v13 = vunpack.c.l.bf16 %v6263_v5 }
 0x7ed   : > { %10853 = vst [vmem:[#allocation62_spill] sm:$0xff] %v9765_v22 }
 0x7ee   : > { %v4613_v59 = vrot.slane %v4609_v13, %v10914_v16 }
 0x7ef   : > { %6918 = vmatmul.mubr.msk.bf16.gmra.mxu0 %vm873_vm6, %v10836_v18 }
 0x7f0   : > { %6921 = vmatprep.mubr.msk.bf16.mxu0 %vm873_vm6, %v10837_v19 }
 0x7f3   : > { %6882 = vmatmul.mubr.msk.bf16.gmra.mxu1 %vm873_vm6, %v10834_v34 }
 0x7f4   : > { %6885 = vmatprep.mubr.msk.bf16.mxu1 %vm873_vm6, %v10835_v60 }
 0x7f7   : > { %6922 = vmatmul.mubr.msk.bf16.gmra.mxu0 %vm873_vm6, %v10843_v7 }
 0x7f8   : > { %6937 = vmatprep.mubr.msk.bf16.mxu0 %vm1486_vm8, %v9737_v45 }
 0x7fb   : > { %6886 = vmatmul.mubr.msk.bf16.gmra.mxu1 %vm873_vm6, %v10836_v18 }
 0x7fc   : > { %6889 = vmatprep.mubr.msk.bf16.mxu1 %vm873_vm6, %v10837_v19 }
 0x7ff   : > { %6938 = vmatmul.mubr.msk.bf16.vlgmr.msra.gmra.mxu0 %vm1486_vm8, %v9761_v12 }
 0x800   : > { %6941 = vmatprep.mubr.msk.bf16.mxu0 %vm1486_vm8, %v9765_v22 }
 0x803   : > { %6890 = vmatmul.mubr.msk.bf16.gmra.mxu1 %vm873_vm6, %v10843_v7 }
 0x804   : > { %6927 = vmatprep.mubr.msk.bf16.mxu1 %vm1486_vm8, %v9737_v45 }
 0x807   : > { %6942 = vmatmul.mubr.msk.bf16.gmra.mxu0 %vm1486_vm8, %v9783_v8 }
 0x808   : > { %6985 = vmatprep.mubr.msk.bf16.mxu0 %vm873_vm6, %v10859_v56 }
 0x80b   : > { %6928 = vmatmul.mubr.msk.bf16.vlgmr.msra.gmra.mxu1 %vm1486_vm8, %v9761_v12 }
 0x80c   : > { %6931 = vmatprep.mubr.msk.bf16.mxu1 %vm1486_vm8, %v9765_v22 }
 0x813   : > { %6932 = vmatmul.mubr.msk.bf16.gmra.mxu1 %vm1486_vm8, %v9783_v8 }
 0x814   : > { %6953 = vmatprep.mubr.msk.bf16.mxu1 %vm873_vm6, %v10860_v21 }
 0x88f   : > { %v6903_v17 = vpop.f32.mrf.mxu0 }
 0x891   : > { %v4000_v41 = vpop.f32.mrf.mxu0 }
 0x893   : > { %v6904_v15 = vpop.f32.mrf.mxu0 }
 0x895   : > { %v4003_v24 = vpop.f32.mrf.mxu0 }
 0x897   : > { %v6907_v55 = vpop.f32.mrf.mxu0 }
 0x899   : > { %v4016_v42 = vpop.f32.mrf.mxu0 }
 0x89b   : > { %v6871_v61 = vpop.f32.mrf.mxu1  ;;  %v6908_v47 = vpop.f32.mrf.mxu0 }
 0x89c   : > { %v4009_v60 = vadd.f32 %v6903_v17, %v6871_v61 }
 0x89d   : > { %v3855_v27 = vpop.f32.mrf.mxu1  ;;  %v4019_v38 = vpop.f32.mrf.mxu0 }
 0x89e   : > { %v4001_v20 = vadd.f32 %v4000_v41, %v3855_v27  ;;  %v4097_v32 = vmul.f32 %v4009_v60, %v4009_v60 }
 0x89f   : > { %v6872_v51 = vpop.f32.mrf.mxu1  ;;  %v6911_v10 = vpop.f32.mrf.mxu0 }
 0x8a0   : > { %v4095_v48 = vmul.f32 %v4001_v20, %v4001_v20  ;;  %v4012_v62 = vadd.f32 %v6904_v15, %v6872_v51  ;;  %v4125_v43 = vsel %vm1412_vm10, %v4097_v32, 0.0 }
 0x8a1   : > { %v3858_v14 = vpop.f32.mrf.mxu1  ;;  %v4032_v34 = vpop.f32.mrf.mxu0 }
 0x8a2   : > { %v4098_v53 = vmul.f32 %v4012_v62, %v4012_v62  ;;  %v4004_v54 = vadd.f32 %v4003_v24, %v3858_v14  ;;  %v4119_v52 = vsel %vm1412_vm10, %v4095_v48, 0.0 }
 0x8a3   : > { %v6912_v4 = vpop.f32.mrf.mxu0  ;;  %4120 = vadd.xlane.f32.xlu1 %v4119_v52  ;;  %v6875_v18 = vpop.f32.mrf.mxu1 }
 0x8a4   : > { %v4096_v0 = vmul.f32 %v4004_v54, %v4004_v54  ;;  %v4128_v29 = vsel %vm1412_vm10, %v4098_v53, 0.0  ;;  %v4025_v23 = vadd.f32 %v6907_v55, %v6875_v18 }
 0x8a5   : > { %v3871_v19 = vpop.f32.mrf.mxu1  ;;  %v4035_v49 = vpop.f32.mrf.mxu0 }
 0x8a6   : > { %v4017_v58 = vadd.f32 %v4016_v42, %v3871_v19  ;;  %v4122_v6 = vsel %vm1412_vm10, %v4096_v0, 0.0  ;;  %v4101_v21 = vmul.f32 %v4025_v23, %v4025_v23 }
 0x8a7   : > { %v6915_v1 = vpop.f32.mrf.mxu0  ;;  %4129 = vadd.xlane.f32.xlu1 %v4128_v29  ;;  %4123 = vadd.xlane.f32.xlu0 %v4122_v6  ;;  %v6876_v7 = vpop.f32.mrf.mxu1 }
 0x8a8   : > { %v4099_v57 = vmul.f32 %v4017_v58, %v4017_v58  ;;  %v4028_v40 = vadd.f32 %v6908_v47, %v6876_v7  ;;  %v4137_v51 = vsel %vm1412_vm10, %v4101_v21, 0.0 }
 0x8a9   : > { %v3874_v31 = vpop.f32.mrf.mxu1  ;;  %v4048_v25 = vpop.f32.mrf.mxu0 }
 0x8aa   : > { %v4020_v33 = vadd.f32 %v4019_v38, %v3874_v31  ;;  %v4102_v15 = vmul.f32 %v4028_v40, %v4028_v40  ;;  %v4131_v42 = vsel %vm1412_vm10, %v4099_v57, 0.0 }
 0x8ab   : > { %v6916_v9 = vpop.f32.mrf.mxu0  ;;  %4126 = vadd.xlane.f32.xlu0 %v4125_v43  ;;  %v6879_v46 = vpop.f32.mrf.mxu1 }
 0x8ac   : > { %v4100_v56 = vmul.f32 %v4020_v33, %v4020_v33  ;;  %v4041_v27 = vadd.f32 %v6911_v10, %v6879_v46  ;;  %v4140_v60 = vsel %vm1412_vm10, %v4102_v15, 0.0 }
 0x8ad   : > { %v3887_v17 = vpop.f32.mrf.mxu1  ;;  %v4051_v41 = vpop.f32.mrf.mxu0 }
 0x8ae   : > { %v4033_v24 = vadd.f32 %v4032_v34, %v3887_v17  ;;  %v4134_v55 = vsel %vm1412_vm10, %v4100_v56, 0.0  ;;  %v4105_v52 = vmul.f32 %v4041_v27, %v4041_v27 }
 0x8af   : > { %v6919_v61 = vpop.f32.mrf.mxu0  ;;  %4132 = vadd.xlane.f32.xlu0 %v4131_v42  ;;  %4135 = vadd.xlane.f32.xlu1 %v4134_v55  ;;  %v6880_v47 = vpop.f32.mrf.mxu1 }
 0x8b0   : > { %v4103_v48 = vmul.f32 %v4033_v24, %v4033_v24  ;;  %v4044_v62 = vadd.f32 %v6912_v4, %v6880_v47  ;;  %v4149_v23 = vsel %vm1412_vm10, %v4105_v52, 0.0 }
 0x8b1   : > { %v3890_v38 = vpop.f32.mrf.mxu1  ;;  %v4064_v20 = vpop.f32.mrf.mxu0 }
 0x8b2   : > { %v4036_v14 = vadd.f32 %v4035_v49, %v3890_v38  ;;  %v4106_v19 = vmul.f32 %v4044_v62, %v4044_v62  ;;  %v4143_v10 = vsel %vm1412_vm10, %v4103_v48, 0.0 }
 0x8b3   : > { %v6920_v53 = vpop.f32.mrf.mxu0  ;;  %4138 = vadd.xlane.f32.xlu0 %v4137_v51  ;;  %4141 = vadd.xlane.f32.xlu1 %v4140_v60  ;;  %v6883_v34 = vpop.f32.mrf.mxu1 }
 0x8b4   : > { %v4104_v54 = vmul.f32 %v4036_v14, %v4036_v14  ;;  %v4057_v49 = vadd.f32 %v6915_v1, %v6883_v34  ;;  %v4152_v33 = vsel %vm1412_vm10, %v4106_v19, 0.0 }
 0x8b5   : > { %v3903_v18 = vpop.f32.mrf.mxu1  ;;  %v4067_v0 = vpop.f32.mrf.mxu0 }
 0x8b6   : > { %v4049_v32 = vadd.f32 %v4048_v25, %v3903_v18  ;;  %v4146_v58 = vsel %vm1412_vm10, %v4104_v54, 0.0  ;;  %v4109_v56 = vmul.f32 %v4057_v49, %v4057_v49 }
 0x8b7   : > { %v6923_v29 = vpop.f32.mrf.mxu0  ;;  %4144 = vadd.xlane.f32.xlu0 %v4143_v10  ;;  %4147 = vadd.xlane.f32.xlu1 %v4146_v58  ;;  %v6884_v4 = vpop.f32.mrf.mxu1 }
 0x8b8   : > { %v4107_v31 = vmul.f32 %v4049_v32, %v4049_v32  ;;  %v4060_v57 = vadd.f32 %v6916_v9, %v6884_v4  ;;  %v4161_v38 = vsel %vm1412_vm10, %v4109_v56, 0.0  ;;  %v7200_v56 = vld [vmem:[%s10532_s5 + $0x28] ss:$0 sps:$4 sm:$0x77]  }
 0x8b9   : > { %v3906_v6 = vpop.f32.mrf.mxu1  ;;  %v4080_v7 = vpop.f32.mrf.mxu0 }
 0x8ba   : > { %v4052_v40 = vadd.f32 %v4051_v41, %v3906_v6  ;;  %v4110_v15 = vmul.f32 %v4060_v57, %v4060_v57  ;;  %v4155_v1 = vsel %vm1412_vm10, %v4107_v31, 0.0 }
 0x8bb   : > { %v6924_v43 = vpop.f32.mrf.mxu0  ;;  %4150 = vadd.xlane.f32.xlu0 %v4149_v23  ;;  %4153 = vadd.xlane.f32.xlu1 %v4152_v33  ;;  %v6887_v25 = vpop.f32.mrf.mxu1 }
 0x8bc   : > { %v4108_v46 = vmul.f32 %v4052_v40, %v4052_v40  ;;  %v4073_v41 = vadd.f32 %v6919_v61, %v6887_v25  ;;  %v4164_v14 = vsel %vm1412_vm10, %v4110_v15, 0.0 }
 0x8bd   : > { %v3919_v21 = vpop.f32.mrf.mxu1  ;;  %v4083_v17 = vpop.f32.mrf.mxu0 }
 0x8be   : > { %v4065_v24 = vadd.f32 %v4064_v20, %v3919_v21  ;;  %v4158_v42 = vsel %vm1412_vm10, %v4108_v46, 0.0  ;;  %v4113_v54 = vmul.f32 %v4073_v41, %v4073_v41 }
 0x8bf   : > { %v6939_v55 = vpop.f32.mrf.mxu0  ;;  %4156 = vadd.xlane.f32.xlu0 %v4155_v1  ;;  %4159 = vadd.xlane.f32.xlu1 %v4158_v42  ;;  %v6888_v9 = vpop.f32.mrf.mxu1 }
 0x8c0   : > { %v4111_v51 = vmul.f32 %v4065_v24, %v4065_v24  ;;  %v4076_v48 = vadd.f32 %v6920_v53, %v6888_v9  ;;  %v4173_v49 = vsel %vm1412_vm10, %v4113_v54, 0.0  ;;  %v4669_v9 = vshll.u32 %v7200_v56, 16 }
 0x8c1   : > { %v3922_v47 = vpop.f32.mrf.mxu1  ;;  %v9811_v27 = vpop.f32.mrf.mxu0 }
 0x8c2   : > { %v4068_v62 = vadd.f32 %v4067_v0, %v3922_v47  ;;  %v4114_v19 = vmul.f32 %v4076_v48, %v4076_v48  ;;  %v4167_v32 = vsel %vm1412_vm10, %v4111_v51, 0.0 }
 0x8c3   : > { %v6940_v20 = vpop.f32.mrf.mxu0  ;;  %4162 = vadd.xlane.f32.xlu0 %v4161_v38  ;;  %4165 = vadd.xlane.f32.xlu1 %v4164_v14  ;;  %v6891_v60 = vpop.f32.mrf.mxu1  ;;  %v4671_v14 = vrot.slane %v4669_v9, 1  ;;  %v10891_v9 = vld [vmem:[#allocation80_spill] sm:$0xff] }
 0x8c4   : > { %v4112_v34 = vmul.f32 %v4068_v62, %v4068_v62  ;;  %v4089_v6 = vadd.f32 %v6923_v29, %v6891_v60  ;;  %v4176_v57 = vsel %vm1412_vm10, %v4114_v19, 0.0  ;;  %v4347_v47 = vpack.c.bf16 %v6940_v20, %v6939_v55 }
 0x8c5   : > { %v3935_v52 = vpop.f32.mrf.mxu1  ;;  %v4314_v18 = vpop.f32.mrf.mxu0  ;;  %v4667_v62 = vshrl.u32 %v7200_v56, 16  ;;  %v10879_v56 = vld [vmem:[#allocation26_spill] sm:$0xff] }
 0x8c6   : > { %v4081_v61 = vadd.f32 %v4080_v7, %v3935_v52  ;;  %v4170_v10 = vsel %vm1412_vm10, %v4112_v34, 0.0  ;;  %v4117_v24 = vmul.f32 %v4089_v6, %v4089_v6  ;;  %v4346_v34 = vpack.c.bf16 %v4314_v18, %v9811_v27  ;;  %v10864_v27 = vld [vmem:[#allocation12_spill] sm:$0xff] }
 0x8c7   : > { %v6943_v58 = vpop.f32.mrf.mxu0  ;;  %4168 = vadd.xlane.f32.xlu0 %v4167_v32  ;;  %4171 = vadd.xlane.f32.xlu1 %v4170_v10  ;;  %v6892_v53 = vpop.f32.mrf.mxu1  ;;  %v4672_v19 = vor.u32 %v4671_v14, %v4667_v62  ;;  %v10863_v10 = vld [vmem:[#allocation10_spill] sm:$0xff]  ;;  %v10870_v6 = vld [vmem:[#allocation24_spill] sm:$0xff]  ;;  %v10905_v14 = vld [vmem:[#allocation87_spill] sm:$0xff] }
 0x8c8   : > { %v4115_v23 = vmul.f32 %v4081_v61, %v4081_v61  ;;  %v4092_v40 = vadd.f32 %v6924_v43, %v6892_v53  ;;  %v4185_v38 = vsel %vm1412_vm10, %v4117_v24, 0.0  ;;  %v10866_v53 = vld [vmem:[#allocation18_spill] sm:$0xff]  ;;  %v10882_v24 = vld [vmem:[#allocation77_spill] sm:$0xff] }
 0x8c9   : > { %v3938_v0 = vpop.f32.mrf.mxu1  ;;  %v4327_v4 = vpop.f32.mrf.mxu0  ;;  %v10903_v62 = vld [vmem:[#allocation86_spill] sm:$0xff] }
 0x8ca   : > { %v4084_v31 = vadd.f32 %v4083_v17, %v3938_v0  ;;  %v4179_v29 = vsel %vm1412_vm10, %v4115_v23, 0.0  ;;  %v4118_v43 = vmul.f32 %v4092_v40, %v4092_v40  ;;  %v10867_v0 = vld [vmem:[#allocation8_spill] sm:$0xff]  ;;  %v10871_v23 = vld [vmem:[#allocation14_spill] sm:$0xff] }
 0x8cb   : > { %v6944_v33 = vpop.f32.mrf.mxu0  ;;  %4174 = vadd.xlane.f32.xlu0 %v4173_v49  ;;  %4177 = vadd.xlane.f32.xlu1 %v4176_v57  ;;  %v6929_v7 = vpop.f32.mrf.mxu1  ;;  %v10869_v49 = vld [vmem:[#allocation21_spill] sm:$0xff]  ;;  %v10873_v57 = vld [vmem:[#allocation27_spill] sm:$0xff]  ;;  %v10874_v40 = vld [vmem:[#allocation30_spill] sm:$0xff] }
 0x8cc   : > { %v4116_v25 = vmul.f32 %v4084_v31, %v4084_v31  ;;  %v4349_v46 = vpack.c.bf16 %v6944_v33, %v6943_v58  ;;  %v4188_v48 = vsel %vm1412_vm10, %v4118_v43, 0.0  ;;  %v10865_v58 = vld [vmem:[#allocation15_spill] sm:$0xff]  ;;  %v10872_v31 = vld [vmem:[#allocation17_spill] sm:$0xff]  ;;  %v10875_v33 = vld [vmem:[#allocation20_spill] sm:$0xff] }
 0x8cd   : > { %v4242_v21 = vpop.f32.mrf.mxu1  ;;  %v4330_v15 = vpop.f32.mrf.mxu0  ;;  %v10888_v43 = vld [vmem:[#allocation79_spill] sm:$0xff] }
 0x8ce   : > { %v4348_v1 = vpack.c.bf16 %v4330_v15, %v4327_v4  ;;  %6945 = vmatprep.subr.bf16.mxu1 %v4349_v46  ;;  %v4182_v17 = vsel %vm1412_vm10, %v4116_v25, 0.0  ;;  %vm10862_vm10 = vmmov %vm10861_vm15  ;;  %v10868_v4 = vld [vmem:[#allocation9_spill] sm:$0xff] }
 0x8cf   : > { %6946 = vmatpush3.bf16.msra.mxu1 %v4349_v46  ;;  %4180 = vadd.xlane.f32.xlu0 %v4179_v29  ;;  %v6930_v42 = vpop.f32.mrf.mxu1  ;;  %v4674_v61 = vsel %vm10862_vm10, %v4672_v19, 0  ;;  %v10877_v25 = vld [vmem:[#allocation33_spill] sm:$0xff]  ;;  %v10878_v46 = vld [vmem:[#allocation36_spill] sm:$0xff]  ;;  %v10885_v29 = vld [vmem:[#allocation35_spill] sm:$0xff] }
 0x8d0   : > { %4183 = vadd.xlane.f32.xlu1 %v4182_v17  ;;  %6947 = vmatprep.subr.bf16.mxu1 %v4348_v1  ;;  %v4343_v32 = vpack.c.bf16 %v6930_v42, %v6929_v7  ;;  %v10876_v7 = vld [vmem:[#allocation23_spill] sm:$0xff]  ;;  %v10881_v15 = vld [vmem:[#allocation41_spill] sm:$0xff]  ;;  %v10886_v17 = vld [vmem:[#allocation78_spill] sm:$0xff] }
 0x8d1   : > { %v4245_v41 = vpop.f32.mrf.mxu1  ;;  %v10890_v42 = vld [vmem:[#allocation38_spill] sm:$0xff]  ;;  %vm10902_vm10 = vmmov %vm10896_vm0 }
 0x8d2   : > { %v4342_v18 = vpack.c.bf16 %v4245_v41, %v4242_v21  ;;  %v10880_v21 = vld [vmem:[#allocation29_spill] sm:$0xff] }
 0x8d3   : > { %6948 = vmatpush3.bf16.msra.mxu1 %v4348_v1  ;;  %4186 = vadd.xlane.f32.xlu0 %v4185_v38  ;;  %v6933_v51 = vpop.f32.mrf.mxu1  ;;  %v10884_v1 = vld [vmem:[#allocation32_spill] sm:$0xff]  ;;  %v10893_v41 = vld [vmem:[#allocation81_spill] sm:$0xff]  ;;  %v10897_v38 = vld [vmem:[#allocation83_spill] sm:$0xff] }
 0x8d4   : > { %4189 = vadd.xlane.f32.xlu1 %v4188_v48  ;;  %6949 = vmatprep.subr.bf16.mxu1 %v4347_v47  ;;  %v10901_v48 = vld [vmem:[#allocation85_spill] sm:$0xff] }
 0x8d5   : > { %v4258_v60 = vpop.f32.mrf.mxu1 }
 0x8d7   : > { %v6934_v54 = vpop.f32.mrf.mxu1  ;;  %6950 = vmatpush3.bf16.msra.mxu1 %v4347_v47  ;;  %v10895_v47 = vld [vmem:[#allocation82_spill] sm:$0xff] }
 0x8d8   : > { %v4345_v52 = vpack.c.bf16 %v6934_v54, %v6933_v51  ;;  %6951 = vmatprep.subr.bf16.mxu1 %v4346_v34  ;;  %v10899_v51 = vld [vmem:[#allocation84_spill] sm:$0xff]  ;;  %v7201_v54 = vld [vmem:[%s10532_s5 + $0x28] sm:$0x7c]  }
 0x8d9   : > { %v4261_v55 = vpop.f32.mrf.mxu1 }
 0x8da   : > { %v4344_v20 = vpack.c.bf16 %v4261_v55, %v4258_v60  ;;  %6977 = vmatprep.subr.bf16.mxu0 %v4345_v52  ;;  %v10907_v60 = vld [vmem:[#allocation88_spill] sm:$0xff] }
 0x8db   : > { %6952 = vmatpush3.bf16.msra.mxu1 %v4346_v34  ;;  %6978 = vmatpush3.bf16.msra.mxu0 %v4345_v52  ;;  %v10909_v34 = vld [vmem:[#allocation94_spill] sm:$0xff]  ;;  %v5025_v52 = vshrl.u32 %v7201_v54, 16 }
 0x8dc   : > { %6979 = vmatprep.subr.bf16.mxu0 %v4344_v20  ;;  %7111 = vmatprep.subr.msk.bf16.mxu1 %vm10861_vm15, %v4672_v19  ;;  %vm10900_vm15 = vmmov %vm10896_vm0  ;;  %v5028_v19 = vshll.u32 %v7201_v54, 16 }
 0x8dd   : > { %v5027_v55 = vrot.slane %v5025_v52, 2 }
 0x8de   : > { %6954 = vmatmul.mubr.msk.bf16.vlgmr.msra.gmra.mxu1 %vm873_vm6, %v10863_v10 }
 0x8df   : > { %6957 = vmatprep.mubr.msk.bf16.mxu1 %vm873_vm6, %v10864_v27  ;;  %6980 = vmatpush3.bf16.msra.mxu0 %v4344_v20  ;;  %v5030_v20 = vrot.slane %v5028_v19, 3 }
 0x8e0   : > { %7010 = vmatpush3.bf16.msra.mxu1 %v4674_v61  ;;  %6981 = vmatprep.subr.bf16.mxu0 %v4343_v32 }
 0x8e1   : > { %5356 = vmatprep.subr.bf16.mxu1 %v10794_v63  ;;  %v5031_v61 = vor.u32 %v5030_v20, %v5027_v55 }
 0x8e3   : > { %6982 = vmatpush3.bf16.msra.mxu0 %v4343_v32  ;;  %v5069_v32 = vsel %vm1499_vm9, %v5031_v61, 0 }
 0x8e4   : > { %6983 = vmatprep.subr.bf16.mxu0 %v4342_v18 }
 0x8e6   : > { %6958 = vmatmul.mubr.msk.bf16.gmra.mxu1 %vm873_vm6, %v10865_v58 }
 0x8e7   : > { %6961 = vmatprep.mubr.msk.bf16.mxu1 %vm873_vm6, %v10866_v53  ;;  %6984 = vmatpush3.bf16.msra.mxu0 %v4342_v18 }
 0x8e8   : > { %7112 = vmatprep.subr.msk.bf16.mxu0 %vm1499_vm9, %v5031_v61 }
 0x8ea   : > { %6986 = vmatmul.mubr.msk.bf16.vlgmr.msra.gmra.mxu0 %vm873_vm6, %v10867_v0 }
 0x8eb   : > { %6989 = vmatprep.mubr.msk.bf16.mxu0 %vm873_vm6, %v10868_v4  ;;  %7036 = vmatpush3.bf16.msra.mxu0 %v5069_v32 }
 0x8ee   : > { %6962 = vmatmul.mubr.msk.bf16.gmra.mxu1 %vm873_vm6, %v10869_v49 }
 0x8ef   : > { %6965 = vmatprep.mubr.msk.bf16.mxu1 %vm873_vm6, %v10870_v6 }
 0x8f2   : > { %6990 = vmatmul.mubr.msk.bf16.gmra.mxu0 %vm873_vm6, %v10871_v23 }
 0x8f3   : > { %6993 = vmatprep.mubr.msk.bf16.mxu0 %vm873_vm6, %v10872_v31 }
 0x8f6   : > { %6966 = vmatmul.mubr.msk.bf16.gmra.mxu1 %vm873_vm6, %v10873_v57 }
 0x8f7   : > { %6969 = vmatprep.mubr.msk.bf16.mxu1 %vm873_vm6, %v10874_v40 }
 0x8fa   : > { %6994 = vmatmul.mubr.msk.bf16.gmra.mxu0 %vm873_vm6, %v10875_v33 }
 0x8fb   : > { %6997 = vmatprep.mubr.msk.bf16.mxu0 %vm873_vm6, %v10876_v7 }
 0x8fe   : > { %6970 = vmatmul.mubr.msk.bf16.gmra.mxu1 %vm873_vm6, %v10877_v25 }
 0x8ff   : > { %6973 = vmatprep.mubr.msk.bf16.mxu1 %vm873_vm6, %v10878_v46 }
 0x902   : > { %6998 = vmatmul.mubr.msk.bf16.gmra.mxu0 %vm873_vm6, %v10879_v56 }
 0x903   : > { %7001 = vmatprep.mubr.msk.bf16.mxu0 %vm873_vm6, %v10880_v21 }
 0x906   : > { %6974 = vmatmul.mubr.msk.bf16.gmra.mxu1 %vm873_vm6, %v10881_v15 }
 0x907   : > { %7011 = vmatprep.mubr.msk.bf16.mxu1 %vm10883_vm2, %v10882_v24  ;;  %vm10904_vm2 = vmmov %vm10896_vm0 }
 0x90a   : > { %7002 = vmatmul.mubr.msk.bf16.gmra.mxu0 %vm873_vm6, %v10884_v1 }
 0x90b   : > { %7005 = vmatprep.mubr.msk.bf16.mxu0 %vm873_vm6, %v10885_v29 }
 0x90e   : > { %7012 = vmatmul.mubr.msk.bf16.vlgmr.msra.gmra.mxu1 %vm10887_vm7, %v10886_v17  ;;  %vm10906_vm7 = vmmov %vm10896_vm0 }
 0x90f   : > { %7015 = vmatprep.mubr.msk.bf16.mxu1 %vm10889_vm13, %v10888_v43  ;;  %vm10908_vm13 = vmmov %vm10896_vm0 }
 0x912   : > { %7006 = vmatmul.mubr.msk.bf16.gmra.mxu0 %vm873_vm6, %v10890_v42 }
 0x916   : > { %7016 = vmatmul.mubr.msk.bf16.gmra.mxu1 %vm10892_vm4, %v10891_v9 }
 0x917   : > { %7019 = vmatprep.mubr.msk.bf16.mxu1 %vm10894_vm5, %v10893_v41 }
 0x91e   : > { %7020 = vmatmul.mubr.msk.bf16.gmra.mxu1 %vm10896_vm0, %v10895_v47 }
 0x91f   : > { %7023 = vmatprep.mubr.msk.bf16.mxu1 %vm10898_vm1, %v10897_v38 }
 0x926   : > { %7024 = vmatmul.mubr.msk.bf16.gmra.mxu1 %vm10900_vm15, %v10899_v51 }
 0x927   : > { %7027 = vmatprep.mubr.msk.bf16.mxu1 %vm10902_vm10, %v10901_v48 }
 0x92c   : > { %v4121_v27 = vpop.xlane.xlu1 %4120 }
 0x92d   : > { %v4614_v39 = vmul.f32 %v4613_v59, %v4121_v27 }
 0x92e   : > { %7028 = vmatmul.mubr.msk.bf16.gmra.mxu1 %vm10904_vm2, %v10903_v62 }
 0x92f   : > { %7031 = vmatprep.mubr.msk.bf16.mxu1 %vm10906_vm7, %v10905_v14 }
 0x930   : > { %v9905_v10 = vpop.xlane.xlu0 %4123  ;;  %v4130_v58 = vpop.xlane.xlu1 %4129 }
 0x931   : > { %v4617_v63 = vmul.f32 %v4613_v59, %v4130_v58 }
 0x934   : > { %v9907_v18 = vpop.xlane.xlu0 %4126 }
 0x936   : > { %7032 = vmatmul.mubr.msk.bf16.gmra.mxu1 %vm10908_vm13, %v10907_v60 }
 0x937   : > { %6295 = vmatprep.mubr.msk.bf16.mxu1 %vm873_vm6, %v10909_v34 }
 0x938   : > { %v9909_v53 = vpop.xlane.xlu0 %4132  ;;  %v9911_v0 = vpop.xlane.xlu1 %4135 }
 0x939   : > { %v4618_v13 = vmul.f32 %v4613_v59, %v9909_v53 }
 0x93c   : > { %v9913_v6 = vpop.xlane.xlu0 %4138  ;;  %v9915_v23 = vpop.xlane.xlu1 %4141 }
 0x93d   : > { %v4621_v27 = vmul.f32 %v4613_v59, %v9915_v23  ;;  %v10015_v23 = vld [vmem:[%s10533_s6 + $0x6] ss:$0 sm:$0xff] }
 0x940   : > { %v4145_v33 = vpop.xlane.xlu0 %4144  ;;  %v4148_v7 = vpop.xlane.xlu1 %4147 }
 0x941   : > { %v9999_v58 = vmul.f32 %v4613_v59, %v4148_v7 }
 0x944   : > { %v4151_v24 = vpop.xlane.xlu0 %4150  ;;  %v4154_v1 = vpop.xlane.xlu1 %4153 }
 0x948   : > { %v4157_v47 = vpop.xlane.xlu0 %4156  ;;  %v4160_v38 = vpop.xlane.xlu1 %4159 }
 0x949   : > { %v10006_v53 = vmul.f32 %v4613_v59, %v4157_v47 }
 0x94c   : > { %v4163_v54 = vpop.xlane.xlu0 %4162  ;;  %v4166_v52 = vpop.xlane.xlu1 %4165 }
 0x94d   : > { %v10017_v7 = vmul.f32 %v4613_v59, %v4163_v54 }
 0x950   : > { %v4169_v50 = vpop.xlane.xlu0 %4168  ;;  %v4172_v35 = vpop.xlane.xlu1 %4171 }
 0x954   : > { %v4175_v12 = vpop.xlane.xlu0 %4174  ;;  %v4178_v45 = vpop.xlane.xlu1 %4177 }
 0x99e   : > { %v6955_v4 = vpop.f32.mrf.mxu1 }
 0x9a0   : > { %v4384_v49 = vpop.f32.mrf.mxu1 }
 0x9a2   : > { %v9917_v31 = vpop.f32.mrf.mxu1 }
 0x9a4   : > { %v9919_v57 = vpop.f32.mrf.mxu1 }
 0x9a6   : > { %v9921_v40 = vpop.f32.mrf.mxu1 }
 0x9a8   : > { %v9923_v25 = vpop.f32.mrf.mxu1 }
 0x9aa   : > { %v9925_v46 = vpop.f32.mrf.mxu1  ;;  %v6987_v56 = vpop.f32.mrf.mxu0 }
 0x9ab   : > { %v4522_v3 = vadd.f32 %v6987_v56, %v6955_v4  ;;  %v4620_v4 = vmul.f32 %v4613_v59, %v9913_v6 }
 0x9ac   : > { %v9927_v21 = vpop.f32.mrf.mxu1  ;;  %v4513_v15 = vpop.f32.mrf.mxu0 }
 0x9ad   : > { %v4514_v16 = vadd.f32 %v4513_v15, %v4384_v49  ;;  %v10004_v49 = vmul.f32 %v4613_v59, %v4154_v1  ;;  %v10021_v15 = vmul.f32 %v4613_v59, %v4169_v50  ;;  %v10034_v50 = vmul.f32 %v4613_v59, %v4178_v45 }
 0x9ae   : > { %v9929_v29 = vpop.f32.mrf.mxu1  ;;  %v6988_v17 = vpop.f32.mrf.mxu0 }
 0x9b0   : > { %v9931_v43 = vpop.f32.mrf.mxu1  ;;  %v9933_v42 = vpop.f32.mrf.mxu0 }
 0x9b1   : > { %v4517_v1 = vadd.f32 %v9933_v42, %v9919_v57 }
 0x9b2   : > { %v9935_v9 = vpop.f32.mrf.mxu1  ;;  %v9937_v41 = vpop.f32.mrf.mxu0 }
 0x9b4   : > { %v9939_v51 = vpop.f32.mrf.mxu1  ;;  %v9941_v48 = vpop.f32.mrf.mxu0 }
 0x9b5   : > { %v4530_v57 = vadd.f32 %v9941_v48, %v9923_v25 }
 0x9b6   : > { %v9943_v62 = vpop.f32.mrf.mxu1  ;;  %v9945_v14 = vpop.f32.mrf.mxu0 }
 0x9b8   : > { %v9947_v60 = vpop.f32.mrf.mxu1  ;;  %v9949_v34 = vpop.f32.mrf.mxu0 }
 0x9ba   : > { %v9951_v19 = vpop.f32.mrf.mxu1  ;;  %v9953_v55 = vpop.f32.mrf.mxu0 }
 0x9bc   : > { %v9955_v20 = vpop.f32.mrf.mxu1  ;;  %v9957_v61 = vpop.f32.mrf.mxu0 }
 0x9be   : > { %v9959_v32 = vpop.f32.mrf.mxu1  ;;  %v9961_v2 = vpop.f32.mrf.mxu0 }
 0x9bf   : > { %10910 = vst [vmem:[#allocation58_spill] sm:$0xff] %v9959_v32  ;;  %v4184_v32 = vpop.xlane.xlu1 %4183 }
 0x9c0   : > { %v9966_v37 = vpop.f32.mrf.mxu1  ;;  %v9968_v44 = vpop.f32.mrf.mxu0 }
 0x9c1   : > { %10911 = vst [vmem:[#allocation59_spill] sm:$0xff] %v9966_v37  ;;  %v4181_v37 = vpop.xlane.xlu0 %4180 }
 0x9c2   : > { %v9970_v36 = vpop.f32.mrf.mxu1  ;;  %v9972_v8 = vpop.f32.mrf.mxu0 }
 0x9c3   : > { %10912 = vst [vmem:[#allocation57_spill] sm:$0xff] %v9970_v36  ;;  %v4615_v36 = vmul.f32 %v4613_v59, %v9905_v10  ;;  %v4525_v10 = vadd.f32 %v6988_v17, %v9917_v31  ;;  %v10019_v31 = vmul.f32 %v4613_v59, %v4166_v52  ;;  %v4538_v17 = vadd.f32 %v9937_v41, %v9921_v40  ;;  %v4190_v54 = vpop.xlane.xlu1 %4189 }
 0x9c4   : > { %v9974_v22 = vpop.f32.mrf.mxu1  ;;  %v9977_v28 = vpop.f32.mrf.mxu0  ;;  %v4541_v40 = vadd.f32 %v9945_v14, %v9925_v46  ;;  %v10044_v41 = vmul.f32 %v4613_v59, %v4184_v32  ;;  %v4533_v46 = vadd.f32 %v9949_v34, %v9927_v21  ;;  %v4557_v34 = vadd.f32 %v9961_v2, %v9935_v9 }
 0x9c5   : > { %10913 = vst [vmem:[#allocation60_spill] sm:$0xff] %v9974_v22  ;;  %v4616_v22 = vmul.f32 %v4613_v59, %v9907_v18  ;;  %v4644_v48 = vadd.f32 %v4620_v4, %v4538_v17 }
 0x9c6   : > { %v9979_v26 = vpop.f32.mrf.mxu1  ;;  %v9983_v30 = vpop.f32.mrf.mxu0 }
 0x9c7   : > { %10915 = vst [vmem:[#allocation55_spill] sm:$0xff] %v9979_v26  ;;  %v9991_v26 = vmul.f32 %v4613_v59, %v9911_v0  ;;  %v4640_v18 = vadd.f32 %v4616_v22, %v4522_v3  ;;  %v10008_v0 = vmul.f32 %v4613_v59, %v4160_v38  ;;  %v4638_v22 = vadd.f32 %v4614_v39, %v4514_v16 }
 0x9c8   : > { %v9981_v11 = vpop.f32.mrf.mxu1  ;;  %v10010_v6 = vpop.f32.mrf.mxu0  ;;  %v10029_v38 = vmul.f32 %v4613_v59, %v4175_v12  ;;  %v4641_v39 = vadd.f32 %v4617_v63, %v4525_v10  ;;  %v4639_v10 = vadd.f32 %v4615_v36, %v4517_v1  ;;  %v4546_v36 = vadd.f32 %v9957_v61, %v9931_v43 }
 0x9c9   : > { %10916 = vst [vmem:[#allocation54_spill] sm:$0xff] %v9981_v11  ;;  %v10002_v11 = vmul.f32 %v4613_v59, %v4151_v24  ;;  %v10023_v24 = vmul.f32 %v4613_v59, %v4172_v35  ;;  %v10036_v35 = vmul.f32 %v4613_v59, %v4181_v37  ;;  %v10052_v37 = vmul.f32 %v4613_v59, %v4190_v54 }
 0x9ca   : > { %v9985_v5 = vpop.f32.mrf.mxu1  ;;  %v10042_v42 = vpop.f32.mrf.mxu0  ;;  %v4645_v54 = vadd.f32 %v4621_v27, %v4541_v40  ;;  %v4549_v1 = vadd.f32 %v9968_v44, %v9939_v51  ;;  %v4643_v43 = vadd.f32 %v9991_v26, %v4533_v46  ;;  %v4570_v61 = vadd.f32 %v9972_v8, %v9943_v62 }
 0x9cb   : > { %10917 = vst [vmem:[#allocation53_spill] sm:$0xff] %v9985_v5  ;;  %v9997_v5 = vmul.f32 %v4613_v59, %v4145_v33  ;;  %v4649_v62 = vadd.f32 %v10004_v49, %v4557_v34 }
 0x9cc   : > { %v9995_v56 = vpop.f32.mrf.mxu1  ;;  %v4652_v49 = vadd.f32 %v10017_v7, %v4570_v61 }
 0x9cd   : > { %10918 = vst [vmem:[#allocation56_spill] sm:$0xff] %v9995_v56  ;;  %v4187_v56 = vpop.xlane.xlu0 %4186 }
 0x9ce   : > { %v7013_v33 = vpop.f32.mrf.mxu1  ;;  %v10050_v45 = vmul.f32 %v4613_v59, %v4187_v56  ;;  %v4642_v59 = vadd.f32 %v4618_v13, %v4530_v57 }
 0x9cf   : > { %v4807_v3 = vadd.f32 %v7013_v33, %v4640_v18 }
 0x9d0   : > { %v4710_v47 = vpop.f32.mrf.mxu1 }
 0x9d1   : > { %v10032_v52 = vadd.f32 %v10015_v23, %v4807_v3  ;;  %v4805_v18 = vadd.f32 %v4710_v47, %v4638_v22  ;;  %v4554_v22 = vadd.f32 %v9953_v55, %v9929_v29  ;;  %v4577_v47 = vpop.f32.mrf.mxu0 }
 0x9d2   : > { %v7014_v12 = vpop.f32.mrf.mxu1 }
 0x9d3   : > { %v4859_v16 = vsub.f32 0.0, %v10032_v52  ;;  %v10048_v33 = vadd.f32 %v10015_v23, %v4805_v18  ;;  %v4808_v63 = vadd.f32 %v7014_v12, %v4641_v39  ;;  %v7004_v39 = vpop.f32.mrf.mxu0  ;;  %v4648_v9 = vadd.f32 %v10002_v11, %v4554_v22 }
 0x9d4   : > { %v4713_v25 = vpop.f32.mrf.mxu1  ;;  %v4646_v12 = vadd.f32 %v9997_v5, %v4546_v36  ;;  %v4573_v5 = vadd.f32 %v9983_v30, %v9951_v19  ;;  %v10920_v30 = vld [vmem:[#allocation59_spill] sm:$0xff] }
 0x9d5   : > { %v4885_v14 = vmul.f32 1.442695, %v4859_v16  ;;  %v4857_v32 = vsub.f32 0.0, %v10048_v33  ;;  %v10058_v3 = vadd.f32 %v10015_v23, %v4808_v63  ;;  %v4806_v56 = vadd.f32 %v4713_v25, %v4639_v10  ;;  %v4580_v46 = vpop.f32.mrf.mxu0 }
 0x9d6   : > { %v7017_v18 = vpop.f32.mrf.mxu1  ;;  %v4647_v63 = vadd.f32 %v9999_v58, %v4549_v1  ;;  %v4562_v10 = vadd.f32 %v9977_v28, %v9947_v60  ;;  %v4578_v19 = vadd.f32 %v4577_v47, %v10920_v30 }
 0x9d7   : > { %7541 = vpow2.f32 %v4885_v14  ;;  %v4881_v4 = vmul.f32 1.442695, %v4857_v32  ;;  %v4860_v21 = vsub.f32 0.0, %v10058_v3  ;;  %v10070_v29 = vadd.f32 %v10015_v23, %v4806_v56  ;;  %v7007_v1 = vpop.f32.mrf.mxu0 }
 0x9d8   : > { %v4811_v55 = vadd.f32 %v7017_v18, %v4644_v48  ;;  %v4726_v17 = vpop.f32.mrf.mxu1  ;;  %v4565_v56 = vadd.f32 %v10010_v6, %v9955_v20  ;;  %v10919_v18 = vld [vmem:[#allocation58_spill] sm:$0xff]  ;;  %v4650_v20 = vadd.f32 %v10006_v53, %v4562_v10  ;;  %v4653_v6 = vadd.f32 %v10019_v31, %v4573_v5  ;;  %v10923_v5 = vld [vmem:[#allocation55_spill] sm:$0xff] }
 0x9d9   : > { %7543 = vpow2.f32 %v4881_v4  ;;  %v4887_v13 = vmul.f32 1.442695, %v4860_v21  ;;  %v4809_v27 = vadd.f32 %v4726_v17, %v4642_v59  ;;  %v4858_v57 = vsub.f32 0.0, %v10070_v29  ;;  %v10921_v21 = vld [vmem:[#allocation57_spill] sm:$0xff] }
 0x9da   : > { %v10077_v2 = vadd.f32 %v10015_v23, %v4811_v55  ;;  %v7018_v44 = vpop.f32.mrf.mxu1  ;;  %v4586_v59 = vadd.f32 %v10042_v42, %v10919_v18  ;;  %v4589_v34 = vadd.f32 %v7004_v39, %v10921_v21 }
 0x9db   : > { %7545 = vpow2.f32 %v4887_v13  ;;  %v10081_v51 = vadd.f32 %v10015_v23, %v4809_v27  ;;  %v4812_v40 = vadd.f32 %v7018_v44, %v4645_v54  ;;  %v4883_v26 = vmul.f32 1.442695, %v4858_v57 }
 0x9dc   : > { %v4863_v16 = vsub.f32 0.0, %v10077_v2  ;;  %v4729_v8 = vpop.f32.mrf.mxu1  ;;  %v4651_v57 = vadd.f32 %v10008_v0, %v4565_v56  ;;  %v4656_v39 = vadd.f32 %v10029_v38, %v4586_v59  ;;  %v10119_v44 = vadd.f32 %v10021_v15, %v4578_v19  ;;  %v10924_v19 = vld [vmem:[#allocation54_spill] sm:$0xff] }
 0x9dd   : > { %v4861_v11 = vsub.f32 0.0, %v10081_v51  ;;  %v10091_v25 = vadd.f32 %v10015_v23, %v4812_v40  ;;  %v4810_v48 = vadd.f32 %v4729_v8, %v4643_v43  ;;  %7547 = vpow2.f32 %v4883_v26 }
 0x9de   : > { %v4893_v14 = vmul.f32 1.442695, %v4863_v16  ;;  %v7021_v32 = vpop.f32.mrf.mxu1  ;;  %v4593_v16 = vpop.f32.mrf.mxu0  ;;  %v10127_v0 = vadd.f32 %v10034_v50, %v4589_v34 }
 0x9df   : > { %v4889_v22 = vmul.f32 1.442695, %v4861_v11  ;;  %v4864_v58 = vsub.f32 0.0, %v10091_v25  ;;  %v10098_v28 = vadd.f32 %v10015_v23, %v4810_v48  ;;  %v4815_v60 = vadd.f32 %v7021_v32, %v4648_v9 }
 0x9e0   : > { %7549 = vpow2.f32 %v4893_v14  ;;  %v4742_v54 = vpop.f32.mrf.mxu1  ;;  %v4602_v14 = vadd.f32 %v7007_v1, %v10923_v5 }
 0x9e1   : > { %7551 = vpow2.f32 %v4889_v22  ;;  %v4895_v36 = vmul.f32 1.442695, %v4864_v58  ;;  %v4862_v7 = vsub.f32 0.0, %v10098_v28  ;;  %v10107_v4 = vadd.f32 %v10015_v23, %v4815_v60  ;;  %v7008_v60 = vpop.f32.mrf.mxu0 }
 0x9e2   : > { %v4813_v55 = vadd.f32 %v4742_v54, %v4646_v12  ;;  %v7022_v17 = vpop.f32.mrf.mxu1  ;;  %v10922_v12 = vld [vmem:[#allocation60_spill] sm:$0xff]  ;;  %v4594_v54 = vadd.f32 %v4593_v16, %v10924_v19 }
 0x9e3   : > { %7553 = vpow2.f32 %v4895_v36  ;;  %v4891_v42 = vmul.f32 1.442695, %v4862_v7  ;;  %v4867_v47 = vsub.f32 0.0, %v10107_v4  ;;  %v4816_v13 = vadd.f32 %v7022_v17, %v4649_v62 }
 0x9e4   : > { %v7542_v27 = vpop.eup %7541  ;;  %v10114_v43 = vadd.f32 %v10015_v23, %v4813_v55  ;;  %v4745_v61 = vpop.f32.mrf.mxu1  ;;  %v4581_v26 = vadd.f32 %v4580_v46, %v10922_v12 }
 0x9e5   : > { %v4931_v53 = vadd.f32 1.0, %v7542_v27  ;;  %7555 = vpow2.f32 %v4891_v42  ;;  %v4901_v31 = vmul.f32 1.442695, %v4867_v47  ;;  %v10122_v9 = vadd.f32 %v10015_v23, %v4816_v13  ;;  %v10925_v42 = vld [vmem:[#allocation53_spill] sm:$0xff] }
 0x9e6   : > { %v7544_v40 = vpop.eup %7543  ;;  %v4865_v8 = vsub.f32 0.0, %v10114_v43  ;;  %v4814_v62 = vadd.f32 %v4745_v61, %v4647_v63  ;;  %v7025_v10 = vpop.f32.mrf.mxu1  ;;  %v4655_v59 = vadd.f32 %v10023_v24, %v4581_v26  ;;  %v4660_v13 = vadd.f32 %v10050_v45, %v4602_v14 }
 0x9e7   : > { %7557 = vrcp.f32 %v4931_v53  ;;  %v4929_v15 = vadd.f32 1.0, %v7544_v40  ;;  %v4868_v38 = vsub.f32 0.0, %v10122_v9  ;;  %v4819_v11 = vadd.f32 %v7025_v10, %v4652_v49 }
 0x9e8   : > { %v7546_v48 = vpop.eup %7545  ;;  %7559 = vpow2.f32 %v4901_v31  ;;  %v4897_v32 = vmul.f32 1.442695, %v4865_v8  ;;  %v10132_v46 = vadd.f32 %v10015_v23, %v4814_v62  ;;  %v4758_v22 = vpop.f32.mrf.mxu1  ;;  %v4658_v10 = vadd.f32 %v10036_v35, %v4594_v54 }
 0x9e9   : > { %7561 = vrcp.f32 %v4929_v15  ;;  %v4932_v63 = vadd.f32 1.0, %v7546_v48  ;;  %v4903_v58 = vmul.f32 1.442695, %v4868_v38  ;;  %v10135_v50 = vadd.f32 %v10015_v23, %v4819_v11  ;;  %v10926_v15 = vld [vmem:[#allocation56_spill] sm:$0xff] }
 0x9ea   : > { %7563 = vpow2.f32 %v4897_v32  ;;  %v4866_v56 = vsub.f32 0.0, %v10132_v46  ;;  %v4817_v49 = vadd.f32 %v4758_v22, %v4650_v20  ;;  %v7026_v18 = vpop.f32.mrf.mxu1  ;;  %v7548_v30 = vpop.eup %7547  ;;  %v4605_v20 = vadd.f32 %v7008_v60, %v10925_v42 }
 0x9eb   : > { %7565 = vrcp.f32 %v4932_v63  ;;  %v4871_v36 = vsub.f32 0.0, %v10135_v50  ;;  %v4820_v7 = vadd.f32 %v7026_v18, %v4653_v6  ;;  %v4930_v21 = vadd.f32 1.0, %v7548_v30  ;;  %v4596_v6 = vpop.f32.mrf.mxu0 }
 0x9ec   : > { %7567 = vpow2.f32 %v4903_v58  ;;  %v4899_v34 = vmul.f32 1.442695, %v4866_v56  ;;  %v10142_v1 = vadd.f32 %v10015_v23, %v4817_v49  ;;  %v4761_v55 = vpop.f32.mrf.mxu1  ;;  %v4597_v38 = vadd.f32 %v4596_v6, %v10926_v15 }
 0x9ed   : > { %v7550_v17 = vpop.eup %7549  ;;  %v10146_v47 = vadd.f32 %v10015_v23, %v4820_v7  ;;  %v4818_v24 = vadd.f32 %v4761_v55, %v4651_v57  ;;  %7569 = vrcp.f32 %v4930_v21  ;;  %v4909_v53 = vmul.f32 1.442695, %v4871_v36 }
 0x9ee   : > { %v7552_v27 = vpop.eup %7551  ;;  %v4935_v61 = vadd.f32 1.0, %v7550_v17  ;;  %v4869_v31 = vsub.f32 0.0, %v10142_v1  ;;  %v7029_v40 = vpop.f32.mrf.mxu1  ;;  %7571 = vpow2.f32 %v4899_v34  ;;  %v4661_v30 = vadd.f32 %v10052_v37, %v4605_v20 }
 0x9ef   : > { %v4933_v12 = vadd.f32 1.0, %v7552_v27  ;;  %v4872_v26 = vsub.f32 0.0, %v10146_v47  ;;  %v10152_v16 = vadd.f32 %v10015_v23, %v4818_v24  ;;  %v4823_v62 = vadd.f32 %v7029_v40, %v4656_v39 }
 0x9f0   : > { %v7554_v8 = vpop.eup %7553  ;;  %7573 = vrcp.f32 %v4935_v61  ;;  %v4905_v57 = vmul.f32 1.442695, %v4869_v31  ;;  %v4774_v45 = vpop.f32.mrf.mxu1  ;;  %v4659_v36 = vadd.f32 %v10044_v41, %v4597_v38 }
 0x9f1   : > { %7575 = vrcp.f32 %v4933_v12  ;;  %v4936_v11 = vadd.f32 1.0, %v7554_v8  ;;  %v4870_v48 = vsub.f32 0.0, %v10152_v16  ;;  %v4911_v14 = vmul.f32 1.442695, %v4872_v26 }
 0x9f2   : > { %v7556_v5 = vpop.eup %7555  ;;  %7577 = vpow2.f32 %v4909_v53  ;;  %v10158_v32 = vadd.f32 %v10015_v23, %v4823_v62  ;;  %v4821_v22 = vadd.f32 %v4774_v45, %v10119_v44  ;;  %v7030_v63 = vpop.f32.mrf.mxu1 }
 0x9f3   : > { %7579 = vrcp.f32 %v4936_v11  ;;  %v4934_v39 = vadd.f32 1.0, %v7556_v5  ;;  %v4907_v58 = vmul.f32 1.442695, %v4870_v48  ;;  %v4824_v35 = vadd.f32 %v7030_v63, %v10127_v0 }
 0x9f4   : > { %v7558_v60 = vpop.eup %7557  ;;  %7581 = vpow2.f32 %v4905_v57  ;;  %v4875_v56 = vsub.f32 0.0, %v10158_v32  ;;  %v10164_v49 = vadd.f32 %v10015_v23, %v4821_v22  ;;  %v4777_v18 = vpop.f32.mrf.mxu1 }
 0x9f5   : > { %v7560_v19 = vpop.eup %7559  ;;  %7583 = vrcp.f32 %v4934_v39  ;;  %v10168_v44 = vadd.f32 %v10015_v23, %v4824_v35  ;;  %v4822_v54 = vadd.f32 %v4777_v18, %v4655_v59  ;;  %v4979_v42 = vmul.f32 %v7558_v60, %v10032_v52 }
 0x9f6   : > { %v7562_v7 = vpop.eup %7561  ;;  %v4939_v0 = vadd.f32 1.0, %v7560_v19  ;;  %7585 = vpow2.f32 %v4911_v14  ;;  %v4917_v21 = vmul.f32 1.442695, %v4875_v56  ;;  %v4873_v34 = vsub.f32 0.0, %v10164_v49  ;;  %v7033_v55 = vpop.f32.mrf.mxu1 }
 0x9f7   : > { %v7564_v17 = vpop.eup %7563  ;;  %7587 = vpow2.f32 %v4907_v58  ;;  %v4876_v37 = vsub.f32 0.0, %v10168_v44  ;;  %v10175_v20 = vadd.f32 %v10015_v23, %v4822_v54  ;;  %v4827_v27 = vadd.f32 %v7033_v55, %v4660_v13 }
 0x9f8   : > { %v7566_v24 = vpop.eup %7565  ;;  %7589 = vrcp.f32 %v4939_v0  ;;  %v4937_v59 = vadd.f32 1.0, %v7564_v17  ;;  %v4913_v41 = vmul.f32 1.442695, %v4873_v34  ;;  %v4790_v61 = vpop.f32.mrf.mxu1  ;;  %v4977_v53 = vmul.f32 %v7562_v7, %v10048_v33 }
 0x9f9   : > { %v7568_v6 = vpop.eup %7567  ;;  %7591 = vpow2.f32 %v4917_v21  ;;  %v4919_v31 = vmul.f32 1.442695, %v4876_v37  ;;  %v4874_v40 = vsub.f32 0.0, %v10175_v20  ;;  %v10180_v12 = vadd.f32 %v10015_v23, %v4827_v27 }
 0x9fa   : > { %7593 = vrcp.f32 %v4937_v59  ;;  %v4940_v52 = vadd.f32 1.0, %v7568_v6  ;;  %v4825_v26 = vadd.f32 %v4790_v61, %v4658_v10  ;;  %v7034_v8 = vpop.f32.mrf.mxu1  ;;  %v7570_v57 = vpop.eup %7569  ;;  %v4980_v62 = vmul.f32 %v7566_v24, %v10058_v3 }
 0x9fb   : > { %7595 = vpow2.f32 %v4913_v41  ;;  %v4915_v13 = vmul.f32 1.442695, %v4874_v40  ;;  %v4828_v45 = vadd.f32 %v7034_v8, %v4661_v30  ;;  %v7572_v15 = vpop.eup %7571  ;;  %v4978_v33 = vmul.f32 %v7570_v57, %v10070_v29 }
 0x9fc   : > { %7597 = vrcp.f32 %v4940_v52  ;;  %v4879_v38 = vsub.f32 0.0, %v10180_v12  ;;  %v10186_v11 = vadd.f32 %v10015_v23, %v4825_v26  ;;  %v4793_v48 = vpop.f32.mrf.mxu1  ;;  %v4938_v14 = vadd.f32 1.0, %v7572_v15 }
 0x9fd   : > { %v7574_v5 = vpop.eup %7573  ;;  %7599 = vpow2.f32 %v4919_v31  ;;  %v10189_v10 = vadd.f32 %v10015_v23, %v4828_v45  ;;  %v4826_v3 = vadd.f32 %v4793_v48, %v4659_v36  ;;  %v5001_v63 = vpack.c.bf16 %v4978_v33, %v4977_v53 }
 0x9fe   : > { %v7576_v22 = vpop.eup %7575  ;;  %7601 = vpow2.f32 %v4915_v13  ;;  %v4925_v39 = vmul.f32 1.442695, %v4879_v38  ;;  %v5002_v29 = vpack.c.bf16 %v4980_v62, %v4979_v42  ;;  %v4877_v35 = vsub.f32 0.0, %v10186_v11 }
 0x9ff   : > { %v7578_v58 = vpop.eup %7577  ;;  %7603 = vrcp.f32 %v4938_v14  ;;  %v4880_v60 = vsub.f32 0.0, %v10189_v10  ;;  %v10194_v30 = vadd.f32 %v10015_v23, %v4826_v3  ;;  %7037 = vmatprep.mubr.msk.bf16.mxu0 %vm1486_vm8, %v5001_v63  ;;  %v4981_v55 = vmul.f32 %v7576_v22, %v10081_v51 }
 0xa00   : > { %v7580_v56 = vpop.eup %7579  ;;  %v4943_v18 = vadd.f32 1.0, %v7578_v58  ;;  %7605 = vpow2.f32 %v4925_v39  ;;  %v4921_v54 = vmul.f32 1.442695, %v4877_v35  ;;  %7038 = vmatmul.mubr.msk.bf16.vlgmr.msra.gmra.mxu0 %vm1486_vm8, %v5002_v29  ;;  %v4983_v41 = vmul.f32 %v7574_v5, %v10077_v2 }
 0xa01   : > { %v7582_v19 = vpop.eup %7581  ;;  %v4927_v36 = vmul.f32 1.442695, %v4880_v60  ;;  %v4878_v21 = vsub.f32 0.0, %v10194_v30  ;;  %v4984_v17 = vmul.f32 %v7580_v56, %v10091_v25 }
 0xa02   : > { %v7584_v7 = vpop.eup %7583  ;;  %7607 = vrcp.f32 %v4943_v18  ;;  %v4941_v0 = vadd.f32 1.0, %v7582_v19 }
 0xa03   : > { %v7586_v34 = vpop.eup %7585  ;;  %v4982_v23 = vmul.f32 %v7584_v7, %v10098_v28  ;;  %7609 = vpow2.f32 %v4921_v54  ;;  %v4923_v24 = vmul.f32 1.442695, %v4878_v21  ;;  %v5004_v31 = vpack.c.bf16 %v4984_v17, %v4983_v41 }
 0xa04   : > { %v7588_v42 = vpop.eup %7587  ;;  %7611 = vrcp.f32 %v4941_v0  ;;  %v4944_v37 = vadd.f32 1.0, %v7586_v34 }
 0xa05   : > { %v7590_v59 = vpop.eup %7589  ;;  %v5003_v27 = vpack.c.bf16 %v4982_v23, %v4981_v55  ;;  %v4942_v61 = vadd.f32 1.0, %v7588_v42  ;;  %7613 = vpow2.f32 %v4927_v36 }
 0xa06   : > { %v7592_v6 = vpop.eup %7591  ;;  %7615 = vrcp.f32 %v4944_v37  ;;  %v4987_v33 = vmul.f32 %v7590_v59, %v10107_v4 }
 0xa07   : > { %v7594_v53 = vpop.eup %7593  ;;  %7617 = vrcp.f32 %v4942_v61  ;;  %v4947_v51 = vadd.f32 1.0, %v7592_v6  ;;  %7041 = vmatprep.mubr.msk.bf16.mxu0 %vm1486_vm8, %v5003_v27 }
 0xa08   : > { %v7596_v25 = vpop.eup %7595  ;;  %7619 = vpow2.f32 %v4923_v24  ;;  %7042 = vmatmul.mubr.msk.bf16.gmra.mxu0 %vm1486_vm8, %v5004_v31  ;;  %v4985_v13 = vmul.f32 %v7594_v53, %v10114_v43 }
 0xa09   : > { %v7598_v28 = vpop.eup %7597  ;;  %v4945_v40 = vadd.f32 1.0, %v7596_v25  ;;  %7621 = vrcp.f32 %v4947_v51 }
 0xa0a   : > { %v7600_v52 = vpop.eup %7599  ;;  %v4988_v57 = vmul.f32 %v7598_v28, %v10122_v9 }
 0xa0b   : > { %v7602_v26 = vpop.eup %7601  ;;  %v4948_v2 = vadd.f32 1.0, %v7600_v52  ;;  %7623 = vrcp.f32 %v4945_v40 }
 0xa0c   : > { %v7604_v8 = vpop.eup %7603  ;;  %v4946_v62 = vadd.f32 1.0, %v7602_v26  ;;  %v5006_v14 = vpack.c.bf16 %v4988_v57, %v4987_v33 }
 0xa0d   : > { %v4986_v45 = vmul.f32 %v7604_v8, %v10132_v46  ;;  %7625 = vrcp.f32 %v4948_v2  ;;  %v7606_v15 = vpop.eup %7605  ;;  %v10241_v2 = vld [vmem:[%s10533_s6 + $0x7] ss:$0 sm:$0xff] }
 0xa0e   : > { %7627 = vrcp.f32 %v4946_v62  ;;  %v4951_v43 = vadd.f32 1.0, %v7606_v15 }
 0xa0f   : > { %v7608_v38 = vpop.eup %7607  ;;  %v5005_v48 = vpack.c.bf16 %v4986_v45, %v4985_v13 }
 0xa10   : > { %v7610_v5 = vpop.eup %7609  ;;  %v4991_v60 = vmul.f32 %v7608_v38, %v10135_v50 }
 0xa11   : > { %v7612_v3 = vpop.eup %7611  ;;  %7045 = vmatprep.mubr.msk.bf16.mxu0 %vm1486_vm8, %v5005_v48  ;;  %v4949_v9 = vadd.f32 1.0, %v7610_v5 }
 0xa12   : > { %v7614_v22 = vpop.eup %7613  ;;  %7046 = vmatmul.mubr.msk.bf16.gmra.mxu0 %vm1486_vm8, %v5006_v14  ;;  %v4989_v4 = vmul.f32 %v7612_v3, %v10142_v1 }
 0xa13   : > { %v7616_v63 = vpop.eup %7615  ;;  %v4952_v39 = vadd.f32 1.0, %v7614_v22 }
 0xa14   : > { %v7618_v46 = vpop.eup %7617  ;;  %v4992_v58 = vmul.f32 %v7616_v63, %v10146_v47 }
 0xa15   : > { %v7620_v29 = vpop.eup %7619  ;;  %v4990_v35 = vmul.f32 %v7618_v46, %v10152_v16  ;;  %7629 = vrcp.f32 %v4952_v39 }
 0xa16   : > { %7631 = vrcp.f32 %v4949_v9  ;;  %v4950_v56 = vadd.f32 1.0, %v7620_v29  ;;  %v7622_v19 = vpop.eup %7621  ;;  %v5008_v54 = vpack.c.bf16 %v4992_v58, %v4991_v60 }
 0xa17   : > { %v5007_v18 = vpack.c.bf16 %v4990_v35, %v4989_v4  ;;  %7633 = vrcp.f32 %v4951_v43  ;;  %v4995_v0 = vmul.f32 %v7622_v19, %v10158_v32 }
 0xa18   : > { %7635 = vrcp.f32 %v4950_v56  ;;  %v7624_v36 = vpop.eup %7623 }
 0xa19   : > { %7049 = vmatprep.mubr.msk.bf16.mxu0 %vm1486_vm8, %v5007_v18  ;;  %v4993_v1 = vmul.f32 %v7624_v36, %v10164_v49 }
 0xa1a   : > { %v7626_v7 = vpop.eup %7625  ;;  %7050 = vmatmul.mubr.msk.bf16.gmra.mxu0 %vm1486_vm8, %v5008_v54 }
 0xa1b   : > { %v7628_v47 = vpop.eup %7627  ;;  %v4996_v16 = vmul.f32 %v7626_v7, %v10168_v44 }
 0xa1c   : > { %v4994_v50 = vmul.f32 %v7628_v47, %v10175_v20 }
 0xa1d   : > { %v5010_v34 = vpack.c.bf16 %v4996_v16, %v4995_v0 }
 0xa1e   : > { %v5009_v21 = vpack.c.bf16 %v4994_v50, %v4993_v1 }
 0xa20   : > { %7053 = vmatprep.mubr.msk.bf16.mxu0 %vm1486_vm8, %v5009_v21 }
 0xa22   : > { %v7630_v55 = vpop.eup %7629  ;;  %7054 = vmatmul.mubr.msk.bf16.gmra.mxu0 %vm1486_vm8, %v5010_v34 }
 0xa23   : > { %v7632_v17 = vpop.eup %7631  ;;  %v5000_v37 = vmul.f32 %v7630_v55, %v10189_v10 }
 0xa24   : > { %v7634_v23 = vpop.eup %7633  ;;  %v4997_v49 = vmul.f32 %v7632_v17, %v10186_v11 }
 0xa25   : > { %v7636_v42 = vpop.eup %7635  ;;  %v4999_v20 = vmul.f32 %v7634_v23, %v10180_v12  ;;  %v7202_v12 = vld [vmem:[%s10532_s5 + $0x30] sm:$0x7c]  }
 0xa26   : > { %v4998_v44 = vmul.f32 %v7636_v42, %v10194_v30  ;;  %v5435_v53 = vshrl.u32 %v7202_v12, 16  ;;  %v5438_v31 = vshll.u32 %v7202_v12, 16 }
 0xa27   : > { %v5012_v32 = vpack.c.bf16 %v5000_v37, %v4999_v20 }
 0xa28   : > { %v5011_v24 = vpack.c.bf16 %v4998_v44, %v4997_v49  ;;  %v5437_v25 = vrot.slane %v5435_v53, 2  ;;  %v5440_v28 = vrot.slane %v5438_v31, 3 }
 0xa2a   : > { %7057 = vmatprep.mubr.msk.bf16.mxu0 %vm1486_vm8, %v5011_v24  ;;  %v5441_v52 = vor.u32 %v5440_v28, %v5437_v25 }
 0xa2b   : > { %7058 = vmatmul.mubr.msk.bf16.gmra.mxu0 %vm1486_vm8, %v5012_v32 }
 0xa2c   : > { %7113 = vmatprep.subr.msk.bf16.mxu0 %vm1499_vm9, %v5441_v52  ;;  %v5455_v8 = vsel %vm1499_vm9, %v5441_v52, 0 }
 0xa2d   : > { %7062 = vmatpush3.bf16.msra.mxu0 %v5455_v8 }
 0xac0   : > { %v7039_v59 = vpop.f32.mrf.mxu0 }
 0xac1   : > { %v10292_v21 = vadd.f32 %v7039_v59, %v10241_v2 }
 0xac2   : > { %v10229_v41 = vpop.f32.mrf.mxu0 }
 0xac3   : > { %v5202_v24 = vsub.f32 0.0, %v10292_v21  ;;  %v10314_v31 = vadd.f32 %v10241_v2, %v10229_v41 }
 0xac4   : > { %v10231_v27 = vpop.f32.mrf.mxu0 }
 0xac5   : > { %v10300_v37 = vadd.f32 %v10231_v27, %v10241_v2  ;;  %v5228_v12 = vmul.f32 1.442695, %v5202_v24 }
 0xac6   : > { %v10233_v61 = vpop.f32.mrf.mxu0 }
 0xac8   : > { %v7043_v10 = vpop.f32.mrf.mxu0 }
 0xac9   : > { %v10279_v18 = vadd.f32 %v7043_v10, %v10241_v2 }
 0xaca   : > { %v5121_v6 = vpop.f32.mrf.mxu0 }
 0xacb   : > { %v5206_v55 = vsub.f32 0.0, %v10279_v18  ;;  %v10296_v17 = vadd.f32 %v10241_v2, %v5121_v6  ;;  %v5203_v6 = vsub.f32 0.0, %v10300_v37 }
 0xacc   : > { %v7044_v11 = vpop.f32.mrf.mxu0 }
 0xacd   : > { %v10271_v46 = vadd.f32 %v7044_v11, %v10241_v2  ;;  %v5236_v32 = vmul.f32 1.442695, %v5206_v55  ;;  %v5204_v59 = vsub.f32 0.0, %v10296_v17  ;;  %v10310_v11 = vadd.f32 %v10241_v2, %v10233_v61 }
 0xace   : > { %v5124_v30 = vpop.f32.mrf.mxu0  ;;  %v5230_v52 = vmul.f32 1.442695, %v5203_v6 }
 0xacf   : > { %v5207_v1 = vsub.f32 0.0, %v10271_v46  ;;  %v10287_v16 = vadd.f32 %v10241_v2, %v5124_v30 }
 0xad1   : > { %v5238_v49 = vmul.f32 1.442695, %v5207_v1  ;;  %v5205_v44 = vsub.f32 0.0, %v10287_v16 }
 0xad2   : > { %v7047_v51 = vpop.f32.mrf.mxu0 }
 0xad3   : > { %v10249_v13 = vadd.f32 %v7047_v51, %v10241_v2  ;;  %v5234_v27 = vmul.f32 1.442695, %v5205_v44  ;;  %v5232_v51 = vmul.f32 1.442695, %v5204_v59 }
 0xad4   : > { %v5137_v40 = vpop.f32.mrf.mxu0 }
 0xad5   : > { %v5210_v3 = vsub.f32 0.0, %v10249_v13  ;;  %v10264_v22 = vadd.f32 %v10241_v2, %v5137_v40 }
 0xad6   : > { %v7048_v26 = vpop.f32.mrf.mxu0 }
 0xad7   : > { %v10246_v57 = vadd.f32 %v7048_v26, %v10241_v2  ;;  %v5244_v19 = vmul.f32 1.442695, %v5210_v3  ;;  %v5208_v54 = vsub.f32 0.0, %v10264_v22  ;;  %v5201_v26 = vsub.f32 0.0, %v10310_v11 }
 0xad8   : > { %v5140_v62 = vpop.f32.mrf.mxu0 }
 0xad9   : > { %v5211_v33 = vsub.f32 0.0, %v10246_v57  ;;  %v10256_v38 = vadd.f32 %v10241_v2, %v5140_v62  ;;  %v5240_v23 = vmul.f32 1.442695, %v5208_v54 }
 0xada   : > { %v7051_v45 = vpop.f32.mrf.mxu0 }
 0xadb   : > { %v10252_v15 = vadd.f32 %v7051_v45, %v10241_v2  ;;  %v5246_v58 = vmul.f32 1.442695, %v5211_v33  ;;  %v5209_v29 = vsub.f32 0.0, %v10256_v38  ;;  %v5200_v45 = vsub.f32 0.0, %v10314_v31 }
 0xadc   : > { %v5153_v48 = vpop.f32.mrf.mxu0 }
 0xadd   : > { %v5214_v5 = vsub.f32 0.0, %v10252_v15  ;;  %v10260_v14 = vadd.f32 %v10241_v2, %v5153_v48  ;;  %v5242_v50 = vmul.f32 1.442695, %v5209_v29 }
 0xade   : > { %v7052_v9 = vpop.f32.mrf.mxu0 }
 0xadf   : > { %v5252_v63 = vmul.f32 1.442695, %v5214_v5  ;;  %v5212_v43 = vsub.f32 0.0, %v10260_v14  ;;  %v10268_v39 = vadd.f32 %v7052_v9, %v10241_v2 }
 0xae0   : > { %v5156_v4 = vpop.f32.mrf.mxu0 }
 0xae1   : > { %7637 = vpow2.f32 %v5252_v63  ;;  %v5248_v35 = vmul.f32 1.442695, %v5212_v43  ;;  %v5215_v60 = vsub.f32 0.0, %v10268_v39  ;;  %v10276_v56 = vadd.f32 %v10241_v2, %v5156_v4 }
 0xae2   : > { %v10282_v36 = vpop.f32.mrf.mxu0  ;;  %v5226_v63 = vmul.f32 1.442695, %v5201_v26 }
 0xae3   : > { %7639 = vpow2.f32 %v5248_v35  ;;  %v5254_v7 = vmul.f32 1.442695, %v5215_v60  ;;  %v5213_v47 = vsub.f32 0.0, %v10276_v56  ;;  %v5224_v60 = vmul.f32 1.442695, %v5200_v45 }
 0xae4   : > { %7641 = vpow2.f32 %v5246_v58  ;;  %v10289_v0 = vpop.f32.mrf.mxu0  ;;  %v10338_v44 = vadd.f32 %v10282_v36, %v10241_v2 }
 0xae5   : > { %7643 = vpow2.f32 %v5254_v7  ;;  %v5250_v34 = vmul.f32 1.442695, %v5213_v47 }
 0xae6   : > { %7645 = vpow2.f32 %v5244_v19  ;;  %v7056_v42 = vpop.f32.mrf.mxu0  ;;  %v5218_v36 = vsub.f32 0.0, %v10338_v44 }
 0xae7   : > { %7647 = vpow2.f32 %v5250_v34  ;;  %v10333_v34 = vadd.f32 %v7056_v42, %v10241_v2 }
 0xae8   : > { %7649 = vpow2.f32 %v5242_v50  ;;  %v10303_v20 = vpop.f32.mrf.mxu0 }
 0xae9   : > { %7651 = vpow2.f32 %v5240_v23  ;;  %v5219_v42 = vsub.f32 0.0, %v10333_v34 }
 0xaea   : > { %7653 = vpow2.f32 %v5238_v49 }
 0xaeb   : > { %v7059_v10 = vpop.f32.mrf.mxu0  ;;  %7655 = vpow2.f32 %v5236_v32 }
 0xaec   : > { %7657 = vpow2.f32 %v5234_v27  ;;  %v10322_v3 = vadd.f32 %v7059_v10, %v10241_v2  ;;  %v10344_v27 = vadd.f32 %v10241_v2, %v10303_v20  ;;  %v5262_v20 = vmul.f32 1.442695, %v5219_v42 }
 0xaed   : > { %v5185_v30 = vpop.f32.mrf.mxu0  ;;  %7659 = vpow2.f32 %v5228_v12 }
 0xaee   : > { %v7638_v53 = vpop.eup %7637  ;;  %7661 = vpow2.f32 %v5232_v51  ;;  %v5222_v7 = vsub.f32 0.0, %v10322_v3  ;;  %v10330_v47 = vadd.f32 %v10241_v2, %v5185_v30 }
 0xaef   : > { %v5286_v25 = vadd.f32 1.0, %v7638_v53  ;;  %v7060_v28 = vpop.f32.mrf.mxu0 }
 0xaf0   : > { %v7640_v40 = vpop.eup %7639  ;;  %v10318_v8 = vadd.f32 %v7060_v28, %v10241_v2  ;;  %v5268_v32 = vmul.f32 1.442695, %v5222_v7  ;;  %v5220_v59 = vsub.f32 0.0, %v10330_v47  ;;  %v10927_v7 = vmov 0  }
 0xaf1   : > { %v7642_v61 = vpop.eup %7641  ;;  %v5284_v41 = vadd.f32 1.0, %v7640_v40  ;;  %v5188_v33 = vpop.f32.mrf.mxu0  ;;  %7663 = vrcp.f32 %v5286_v25  ;;  %v10349_v25 = vadd.f32 %v10241_v2, %v10289_v0 }
 0xaf2   : > { %v7644_v62 = vpop.eup %7643  ;;  %7665 = vpow2.f32 %v5230_v52  ;;  %v5283_v43 = vadd.f32 1.0, %v7642_v61  ;;  %v5223_v4 = vsub.f32 0.0, %v10318_v8  ;;  %v10326_v35 = vadd.f32 %v10241_v2, %v5188_v33 }
 0xaf3   : > { %v7646_v48 = vpop.eup %7645  ;;  %v5287_v5 = vadd.f32 1.0, %v7644_v62  ;;  %v5264_v28 = vmul.f32 1.442695, %v5220_v59  ;;  %v5217_v61 = vsub.f32 0.0, %v10344_v27  ;;  %v5216_v0 = vsub.f32 0.0, %v10349_v25 }
 0xaf4   : > { %v7648_v9 = vpop.eup %7647  ;;  %v5282_v54 = vadd.f32 1.0, %v7646_v48  ;;  %v5270_v55 = vmul.f32 1.442695, %v5223_v4  ;;  %v5221_v23 = vsub.f32 0.0, %v10326_v35 }
 0xaf5   : > { %v7650_v58 = vpop.eup %7649  ;;  %7667 = vrcp.f32 %v5287_v5  ;;  %v5285_v29 = vadd.f32 1.0, %v7648_v9 }
 0xaf6   : > { %7669 = vrcp.f32 %v5284_v41  ;;  %v7652_v19 = vpop.eup %7651  ;;  %v5281_v1 = vadd.f32 1.0, %v7650_v58  ;;  %v5266_v12 = vmul.f32 1.442695, %v5221_v23  ;;  %v5260_v41 = vmul.f32 1.442695, %v5218_v36 }
 0xaf7   : > { %7671 = vrcp.f32 %v5285_v29  ;;  %v7654_v50 = vpop.eup %7653  ;;  %v5280_v49 = vadd.f32 1.0, %v7652_v19  ;;  %v5258_v29 = vmul.f32 1.442695, %v5217_v61 }
 0xaf8   : > { %7673 = vpow2.f32 %v5226_v63  ;;  %v7656_v24 = vpop.eup %7655  ;;  %v5279_v10 = vadd.f32 1.0, %v7654_v50 }
 0xaf9   : > { %7675 = vrcp.f32 %v5283_v43  ;;  %v7658_v6 = vpop.eup %7657  ;;  %v5278_v53 = vadd.f32 1.0, %v7656_v24 }
 0xafa   : > { %7677 = vpow2.f32 %v5224_v60  ;;  %v7660_v30 = vpop.eup %7659  ;;  %v5277_v52 = vadd.f32 1.0, %v7658_v6 }
 0xafb   : > { %7679 = vrcp.f32 %v5282_v54  ;;  %v7662_v51 = vpop.eup %7661  ;;  %v5274_v60 = vadd.f32 1.0, %v7660_v30 }
 0xafc   : > { %7681 = vrcp.f32 %v5281_v1  ;;  %v5276_v45 = vadd.f32 1.0, %v7662_v51 }
 0xafd   : > { %7683 = vpow2.f32 %v5270_v55 }
 0xafe   : > { %7685 = vrcp.f32 %v5280_v49  ;;  %v7664_v40 = vpop.eup %7663 }
 0xaff   : > { %7687 = vpow2.f32 %v5268_v32  ;;  %v7666_v26 = vpop.eup %7665  ;;  %v5334_v48 = vmul.f32 %v7664_v40, %v10252_v15 }
 0xb00   : > { %7689 = vrcp.f32 %v5279_v10  ;;  %v5275_v9 = vadd.f32 1.0, %v7666_v26 }
 0xb01   : > { %7691 = vpow2.f32 %v5266_v12 }
 0xb02   : > { %v7668_v62 = vpop.eup %7667  ;;  %7693 = vrcp.f32 %v5278_v53 }
 0xb03   : > { %v7670_v33 = vpop.eup %7669  ;;  %v5335_v2 = vmul.f32 %v7668_v62, %v10268_v39  ;;  %7695 = vpow2.f32 %v5264_v28  ;;  %v5256_v39 = vmul.f32 1.442695, %v5216_v0 }
 0xb04   : > { %v7672_v5 = vpop.eup %7671  ;;  %7697 = vrcp.f32 %v5277_v52  ;;  %v5332_v15 = vmul.f32 %v7670_v33, %v10260_v14 }
 0xb05   : > { %v7674_v63 = vpop.eup %7673  ;;  %v5351_v43 = vpack.c.bf16 %v5335_v2, %v5334_v48  ;;  %v5333_v58 = vmul.f32 %v7672_v5, %v10276_v56  ;;  %7699 = vpow2.f32 %v5262_v20 }
 0xb06   : > { %v7676_v4 = vpop.eup %7675  ;;  %7701 = vrcp.f32 %v5276_v45  ;;  %v5273_v50 = vadd.f32 1.0, %v7674_v63 }
 0xb07   : > { %v7678_v19 = vpop.eup %7677  ;;  %7703 = vpow2.f32 %v5260_v41  ;;  %5357 = vmatpush1.bf16.msra.mxu1 %v5351_v43  ;;  %v5331_v55 = vmul.f32 %v7676_v4, %v10246_v57  ;;  %v5350_v56 = vpack.c.bf16 %v5333_v58, %v5332_v15 }
 0xb08   : > { %v7680_v54 = vpop.eup %7679  ;;  %7705 = vrcp.f32 %v5275_v9  ;;  %5358 = vmatprep.subr.bf16.mxu1 %v10927_v7  ;;  %v5272_v24 = vadd.f32 1.0, %v7678_v19 }
 0xb09   : > { %v7682_v1 = vpop.eup %7681  ;;  %7707 = vpow2.f32 %v5258_v29  ;;  %v5330_v32 = vmul.f32 %v7680_v54, %v10249_v13 }
 0xb0a   : > { %v7684_v23 = vpop.eup %7683  ;;  %7709 = vrcp.f32 %v5274_v60  ;;  %v5329_v6 = vmul.f32 %v7682_v1, %v10256_v38 }
 0xb0b   : > { %v7686_v49 = vpop.eup %7685  ;;  %7711 = vpow2.f32 %v5256_v39  ;;  %5359 = vmatpush1.bf16.msra.mxu1 %v5350_v56  ;;  %v5349_v10 = vpack.c.bf16 %v5331_v55, %v5330_v32  ;;  %v5295_v42 = vadd.f32 1.0, %v7684_v23 }
 0xb0c   : > { %v7688_v14 = vpop.eup %7687  ;;  %5360 = vmatprep.subr.bf16.mxu1 %v10927_v7  ;;  %7713 = vrcp.f32 %v5273_v50  ;;  %v5328_v30 = vmul.f32 %v7686_v49, %v10264_v22 }
 0xb0d   : > { %v7690_v59 = vpop.eup %7689  ;;  %7715 = vrcp.f32 %v5272_v24  ;;  %v5294_v53 = vadd.f32 1.0, %v7688_v14  ;;  %v10928_v14 = vmov 1.0|1.0  }
 0xb0e   : > { %v7692_v57 = vpop.eup %7691  ;;  %v5327_v51 = vmul.f32 %v7690_v59, %v10271_v46  ;;  %v5348_v28 = vpack.c.bf16 %v5329_v6, %v5328_v30  ;;  %7717 = vrcp.f32 %v5295_v42  ;;  %v10930_v59 = vld [vmem:[#allocation96_spill] sm:$0xff]  ;;  %v7203_v6 = vld [vmem:[%s10532_s5 + $0x2c] sm:$0x7c]  }
 0xb0f   : > { %v7694_v12 = vpop.eup %7693  ;;  %5361 = vmatpush1.bf16.msra.mxu1 %v5349_v10  ;;  %v5293_v40 = vadd.f32 1.0, %v7692_v57  ;;  %7719 = vrcp.f32 %v5294_v53  ;;  %v10932_v10 = vld [vmem:[#allocation98_spill] sm:$0xff]  ;;  %v5528_v42 = vshrl.u32 %v7203_v6, 16  ;;  %v5531_v57 = vshll.u32 %v7203_v6, 16 }
 0xb10   : > { %v7696_v36 = vpop.eup %7695  ;;  %5362 = vmatprep.subr.bf16.mxu1 %v10927_v7  ;;  %v5326_v38 = vmul.f32 %v7694_v12, %v10279_v18 }
 0xb11   : > { %v7698_v13 = vpop.eup %7697  ;;  %v5292_v20 = vadd.f32 1.0, %v7696_v36  ;;  %7721 = vrcp.f32 %v5293_v40  ;;  %v5530_v12 = vrot.slane %v5528_v42, 2  ;;  %v5533_v30 = vrot.slane %v5531_v57, 3 }
 0xb12   : > { %v7700_v52 = vpop.eup %7699  ;;  %v5347_v62 = vpack.c.bf16 %v5327_v51, %v5326_v38  ;;  %v5325_v45 = vmul.f32 %v7698_v13, %v10287_v16 }
 0xb13   : > { %v7702_v26 = vpop.eup %7701  ;;  %5363 = vmatpush1.bf16.msra.mxu1 %v5348_v28  ;;  %v5291_v41 = vadd.f32 1.0, %v7700_v52  ;;  %7723 = vrcp.f32 %v5292_v20  ;;  %v5534_v53 = vor.u32 %v5533_v30, %v5530_v12 }
 0xb14   : > { %v7704_v61 = vpop.eup %7703  ;;  %5364 = vmatprep.subr.bf16.mxu1 %v10927_v7  ;;  %v5324_v48 = vmul.f32 %v7702_v26, %v10296_v17 }
 0xb15   : > { %v7706_v22 = vpop.eup %7705  ;;  %v5290_v2 = vadd.f32 1.0, %v7704_v61  ;;  %7725 = vrcp.f32 %v5291_v41  ;;  %7114 = vmatprep.subr.msk.bf16.mxu0 %vm1499_vm9, %v5534_v53  ;;  %v5536_v61 = vsel %vm1499_vm9, %v5534_v53, 0 }
 0xb16   : > { %v7708_v46 = vpop.eup %7707  ;;  %v5323_v0 = vmul.f32 %v7706_v22, %v10300_v37  ;;  %v5346_v5 = vpack.c.bf16 %v5325_v45, %v5324_v48 }
 0xb17   : > { %v7710_v33 = vpop.eup %7709  ;;  %5365 = vmatpush1.bf16.msra.mxu1 %v5347_v62  ;;  %v5289_v9 = vadd.f32 1.0, %v7708_v46  ;;  %7727 = vrcp.f32 %v5290_v2 }
 0xb18   : > { %v7712_v18 = vpop.eup %7711  ;;  %5366 = vmatprep.subr.bf16.mxu1 %v10927_v7  ;;  %v5322_v16 = vmul.f32 %v7710_v33, %v10292_v21 }
 0xb19   : > { %v7714_v63 = vpop.eup %7713  ;;  %v5288_v43 = vadd.f32 1.0, %v7712_v18  ;;  %7729 = vrcp.f32 %v5289_v9  ;;  %v10936_v9 = vld [vmem:[#allocation91_spill] sm:$0xff] }
 0xb1a   : > { %v7716_v58 = vpop.eup %7715  ;;  %v5345_v17 = vpack.c.bf16 %v5323_v0, %v5322_v16  ;;  %v5321_v29 = vmul.f32 %v7714_v63, %v10310_v11  ;;  %v10937_v63 = vld [vmem:[#allocation68_spill] sm:$0xff]  ;;  %v10938_v16 = vld [vmem:[#allocation62_spill] sm:$0xff] }
 0xb1b   : > { %5367 = vmatpush1.bf16.msra.mxu1 %v5346_v5  ;;  %v7718_v4 = vpop.eup %7717  ;;  %v5320_v60 = vmul.f32 %v7716_v58, %v10314_v31  ;;  %7731 = vrcp.f32 %v5288_v43  ;;  %v10939_v43 = vld [vmem:[#allocation64_spill] sm:$0xff] }
 0xb1c   : > { %5368 = vmatprep.subr.bf16.mxu1 %v10927_v7  ;;  %v7720_v37 = vpop.eup %7719  ;;  %v5343_v21 = vmul.f32 %v7718_v4, %v10318_v8  ;;  %v7204_v58 = vld [vmem:[%s10532_s5 + $0x34] sm:$0x7c]  }
 0xb1d   : > { %v5344_v19 = vpack.c.bf16 %v5321_v29, %v5320_v60  ;;  %v5342_v39 = vmul.f32 %v7720_v37, %v10322_v3  ;;  %v5682_v29 = vshll.u32 %v7204_v58, 16 }
 0xb1e   : > { %v7722_v15 = vpop.eup %7721 }
 0xb1f   : > { %5369 = vmatpush1.bf16.msra.mxu1 %v5345_v17  ;;  %v5355_v11 = vpack.c.bf16 %v5343_v21, %v5342_v39  ;;  %v5341_v1 = vmul.f32 %v7722_v15, %v10326_v35  ;;  %v5679_v17 = vshrl.u32 %v7204_v58, 16  ;;  %v5684_v60 = vrot.slane %v5682_v29, 3  ;;  %v5778_v21 = vld [vmem:[%s10534_s7] sm:$0xf] }
 0xb20   : > { %5370 = vmatprep.subr.bf16.mxu1 %v10927_v7  ;;  %v7724_v54 = vpop.eup %7723  ;;  %v5799_v15 = vsel %vm1499_vm9, %v5778_v21, 0 }
 0xb21   : > { %v5340_v31 = vmul.f32 %v7724_v54, %v10330_v47  ;;  %v5681_v4 = vrot.slane %v5679_v17, 2 }
 0xb22   : > { %v7726_v50 = vpop.eup %7725 }
 0xb23   : > { %5371 = vmatpush1.bf16.msra.mxu1 %v5344_v19  ;;  %v5339_v56 = vmul.f32 %v7726_v50, %v10333_v34  ;;  %v5354_v8 = vpack.c.bf16 %v5341_v1, %v5340_v31  ;;  %v5685_v37 = vor.u32 %v5684_v60, %v5681_v4 }
 0xb24   : > { %5380 = vmatprep.subr.bf16.mxu1 %v10927_v7  ;;  %v7728_v55 = vpop.eup %7727 }
 0xb25   : > { %v5338_v3 = vmul.f32 %v7728_v55, %v10338_v44  ;;  %v5699_v19 = vsel %vm1499_vm9, %v5685_v37, 0 }
 0xb26   : > { %v7730_v23 = vpop.eup %7729 }
 0xb27   : > { %5381 = vmatpush2.bf16.msra.mxu1 %v5355_v11  ;;  %v5353_v24 = vpack.c.bf16 %v5339_v56, %v5338_v3  ;;  %v5337_v35 = vmul.f32 %v7730_v23, %v10344_v27 }
 0xb28   : > { %5382 = vmatprep.subr.bf16.mxu1 %v10927_v7  ;;  %v7732_v49 = vpop.eup %7731 }
 0xb29   : > { %v5336_v32 = vmul.f32 %v7732_v49, %v10349_v25  ;;  %v10934_v25 = vld [vmem:[#allocation100_spill] sm:$0xff] }
 0xb2b   : > { %5383 = vmatpush2.bf16.msra.mxu1 %v5354_v8  ;;  %v5352_v47 = vpack.c.bf16 %v5337_v35, %v5336_v32  ;;  %v6321_v8 = vld [vmem:[%s10533_s6 + $0x8] ss:$0 sm:$0xff] }
 0xb2c   : > { %5384 = vmatprep.subr.bf16.mxu1 %v10927_v7 }
 0xb2f   : > { %5385 = vmatpush2.bf16.msra.mxu1 %v5353_v24 }
 0xb30   : > { %5386 = vmatprep.subr.bf16.mxu1 %v10927_v7 }
 0xb33   : > { %5387 = vmatpush2.bf16.msra.mxu1 %v5352_v47 }
 0xb34   : > { %7115 = vmatprep.subr.msk.bf16.mxu1 %vm1499_vm9, %v5685_v37 }
 0xb36   : > { %6297 = vmatmul.mubr.msk.bf16.vlgmr.msra.gmra.mxu1 %vm9186_vm3, %v10928_v14 }
 0xb37   : > { %6298 = vmatprep.mubr.msk.bf16.mxu1 %vm873_vm6, %v10930_v59  ;;  %7082 = vmatpush3.bf16.msra.mxu1 %v5699_v19 }
 0xb3e   : > { %6300 = vmatmul.mubr.msk.bf16.gmra.mxu1 %vm9225_vm14, %v10928_v14 }
 0xb3f   : > { %6301 = vmatprep.mubr.msk.bf16.mxu1 %vm873_vm6, %v10932_v10 }
 0xb46   : > { %6303 = vmatmul.mubr.msk.bf16.gmra.mxu1 %vm9258_vm12, %v10928_v14 }
 0xb47   : > { %6304 = vmatprep.mubr.msk.bf16.mxu1 %vm873_vm6, %v10934_v25 }
 0xb4e   : > { %6306 = vmatmul.mubr.msk.bf16.gmra.mxu1 %vm9281_vm11, %v10928_v14 }
 0xbf6   : > { %v5390_v36 = vpop.f32.mrf.mxu1 }
 0xbf8   : > { %v5392_v13 = vpop.f32.mrf.mxu1 }
 0xbfa   : > { %v5393_v51 = vpop.f32.mrf.mxu1 }
 0xbfb   : > { %v5423_v28 = vpack.c.bf16 %v5393_v51, %v5390_v36 }
 0xbfc   : > { %v5395_v40 = vpop.f32.mrf.mxu1 }
 0xbfd   : > { %7063 = vmatprep.mubr.msk.bf16.mxu0 %vm1486_vm8, %v5423_v28 }
 0xbfe   : > { %v5398_v52 = vpop.f32.mrf.mxu1 }
 0xc00   : > { %v5400_v26 = vpop.f32.mrf.mxu1 }
 0xc02   : > { %v5401_v38 = vpop.f32.mrf.mxu1 }
 0xc03   : > { %v5424_v20 = vpack.c.bf16 %v5401_v38, %v5398_v52 }
 0xc04   : > { %v5403_v22 = vpop.f32.mrf.mxu1 }
 0xc05   : > { %7064 = vmatmul.mubr.msk.bf16.vlgmr.msra.gmra.mxu0 %vm1486_vm8, %v5424_v20 }
 0xc06   : > { %v5406_v62 = vpop.f32.mrf.mxu1  ;;  %7072 = vmatpush3.bf16.msra.mxu0 %v5536_v61 }
 0xc07   : > { %7116 = vmatprep.subr.msk.bf16.mxu0 %vm1499_vm9, %v5778_v21 }
 0xc08   : > { %v5408_v45 = vpop.f32.mrf.mxu1 }
 0xc0a   : > { %v5409_v41 = vpop.f32.mrf.mxu1 }
 0xc0b   : > { %v5425_v46 = vpack.c.bf16 %v5409_v41, %v5406_v62 }
 0xc0c   : > { %v5411_v33 = vpop.f32.mrf.mxu1 }
 0xc0d   : > { %7067 = vmatprep.mubr.msk.bf16.mxu0 %vm1486_vm8, %v5425_v46 }
 0xc0e   : > { %v5414_v48 = vpop.f32.mrf.mxu1 }
 0xc10   : > { %v5416_v2 = vpop.f32.mrf.mxu1 }
 0xc12   : > { %v5417_v18 = vpop.f32.mrf.mxu1 }
 0xc13   : > { %v5426_v0 = vpack.c.bf16 %v5417_v18, %v5414_v48 }
 0xc14   : > { %v5419_v5 = vpop.f32.mrf.mxu1 }
 0xc15   : > { %7068 = vmatmul.mubr.msk.bf16.gmra.mxu0 %vm1486_vm8, %v5426_v0 }
 0xc16   : > { %7073 = vmatprep.mubr.msk.bf16.mxu0 %vm1486_vm8, %v10936_v9 }
 0xc1d   : > { %7074 = vmatmul.mubr.msk.bf16.vlgmr.msra.gmra.mxu0 %vm1486_vm8, %v10937_v63 }
 0xc1e   : > { %7077 = vmatprep.mubr.msk.bf16.mxu0 %vm1486_vm8, %v10938_v16  ;;  %7092 = vmatpush3.bf16.msra.mxu0 %v5799_v15 }
 0xc25   : > { %7078 = vmatmul.mubr.msk.bf16.gmra.mxu0 %vm1486_vm8, %v10939_v43 }
 0xcc5   : > { %v7065_v39 = vpop.f32.mrf.mxu0 }
 0xcc7   : > { %v5491_v54 = vpop.f32.mrf.mxu0 }
 0xcc9   : > { %v7066_v11 = vpop.f32.mrf.mxu0 }
 0xccb   : > { %v5494_v1 = vpop.f32.mrf.mxu0 }
 0xcd5   : > { %v7069_v50 = vpop.f32.mrf.mxu0 }
 0xcd7   : > { %v5507_v31 = vpop.f32.mrf.mxu0 }
 0xcd9   : > { %v7070_v55 = vpop.f32.mrf.mxu0 }
 0xcdb   : > { %v5510_v56 = vpop.f32.mrf.mxu0 }
 0xcdd   : > { %v7075_v23 = vpop.f32.mrf.mxu0 }
 0xcde   : > { %v5581_v3 = vadd.f32 %v7075_v23, %v7065_v39 }
 0xcdf   : > { %v5572_v49 = vpop.f32.mrf.mxu0 }
 0xce0   : > { %v10436_v24 = vadd.f32 %v6321_v8, %v5581_v3  ;;  %v5573_v35 = vadd.f32 %v5572_v49, %v5491_v54 }
 0xce1   : > { %v7076_v32 = vpop.f32.mrf.mxu0 }
 0xce2   : > { %v5617_v47 = vsub.f32 0.0, %v10436_v24  ;;  %v10439_v14 = vadd.f32 %v6321_v8, %v5573_v35  ;;  %v5584_v34 = vadd.f32 %v7076_v32, %v7066_v11 }
 0xce3   : > { %v5575_v59 = vpop.f32.mrf.mxu0 }
 0xce4   : > { %v5627_v44 = vmul.f32 1.442695, %v5617_v47  ;;  %v5615_v10 = vsub.f32 0.0, %v10439_v14  ;;  %v10442_v27 = vadd.f32 %v6321_v8, %v5584_v34  ;;  %v5576_v25 = vadd.f32 %v5575_v59, %v5494_v1 }
 0xce5   : > { %v7079_v7 = vpop.f32.mrf.mxu0 }
 0xce6   : > { %v5623_v6 = vmul.f32 1.442695, %v5615_v10  ;;  %v5618_v42 = vsub.f32 0.0, %v10442_v27  ;;  %v5608_v57 = vadd.f32 %v6321_v8, %v5576_v25  ;;  %7733 = vpow2.f32 %v5627_v44 }
 0xce7   : > { %v5597_v12 = vadd.f32 %v7079_v7, %v7069_v50  ;;  %v5588_v30 = vpop.f32.mrf.mxu0  ;;  %v6324_v7 = vld [vmem:[%s10533_s6 + $0x9] ss:$0 sm:$0xff] }
 0xce8   : > { %7735 = vpow2.f32 %v5623_v6  ;;  %v5629_v53 = vmul.f32 1.442695, %v5618_v42  ;;  %v5616_v36 = vsub.f32 0.0, %v5608_v57  ;;  %v5589_v13 = vadd.f32 %v5588_v30, %v5507_v31 }
 0xce9   : > { %v10445_v51 = vadd.f32 %v6321_v8, %v5597_v12  ;;  %v7080_v28 = vpop.f32.mrf.mxu0 }
 0xcea   : > { %7737 = vpow2.f32 %v5629_v53  ;;  %v5625_v40 = vmul.f32 1.442695, %v5616_v36  ;;  %v5611_v52 = vadd.f32 %v6321_v8, %v5589_v13  ;;  %v5600_v26 = vadd.f32 %v7080_v28, %v7070_v55  ;;  %v10940_v36 = vld [vmem:[#allocation93_spill] sm:$0xff]  ;;  %v10941_v28 = vld [vmem:[#allocation92_spill] sm:$0xff] }
 0xceb   : > { %v5621_v38 = vsub.f32 0.0, %v10445_v51  ;;  %v5591_v20 = vpop.f32.mrf.mxu0 }
 0xcec   : > { %7739 = vpow2.f32 %v5625_v40  ;;  %v5619_v61 = vsub.f32 0.0, %v5611_v52  ;;  %v5614_v22 = vadd.f32 %v6321_v8, %v5600_v26  ;;  %v5592_v62 = vadd.f32 %v5591_v20, %v5510_v56 }
 0xced   : > { %v5635_v45 = vmul.f32 1.442695, %v5621_v38  ;;  %v10943_v38 = vld [vmem:[#allocation67_spill] sm:$0xff] }
 0xcee   : > { %v5631_v41 = vmul.f32 1.442695, %v5619_v61  ;;  %v5622_v46 = vsub.f32 0.0, %v5614_v22  ;;  %v5612_v33 = vadd.f32 %v6321_v8, %v5592_v62 }
 0xcef   : > { %7741 = vpow2.f32 %v5635_v45 }
 0xcf0   : > { %7743 = vpow2.f32 %v5631_v41  ;;  %v5637_v48 = vmul.f32 1.442695, %v5622_v46  ;;  %v5620_v2 = vsub.f32 0.0, %v5612_v33 }
 0xcf2   : > { %7745 = vpow2.f32 %v5637_v48  ;;  %v5633_v18 = vmul.f32 1.442695, %v5620_v2 }
 0xcf3   : > { %v7734_v0 = vpop.eup %7733 }
 0xcf4   : > { %7747 = vpow2.f32 %v5633_v18  ;;  %v5641_v16 = vadd.f32 1.0, %v7734_v0  ;;  %v10944_v18 = vld [vmem:[#allocation63_spill] sm:$0xff] }
 0xcf5   : > { %v7736_v5 = vpop.eup %7735 }
 0xcf6   : > { %v5639_v9 = vadd.f32 1.0, %v7736_v5  ;;  %v10945_v5 = vld [vmem:[#allocation65_spill] sm:$0xff] }
 0xcf7   : > { %v7738_v63 = vpop.eup %7737 }
 0xcf8   : > { %v5642_v43 = vadd.f32 1.0, %v7738_v63  ;;  %7749 = vrcp.f32 %v5639_v9  ;;  %v10946_v63 = vld [vmem:[#allocation66_spill] sm:$0xff] }
 0xcf9   : > { %v7740_v58 = vpop.eup %7739 }
 0xcfa   : > { %7751 = vrcp.f32 %v5642_v43  ;;  %v5640_v17 = vadd.f32 1.0, %v7740_v58  ;;  %v10947_v43 = vld [vmem:[#allocation61_spill] sm:$0xff] }
 0xcfb   : > { %7753 = vrcp.f32 %v5641_v16 }
 0xcfc   : > { %v7742_v29 = vpop.eup %7741  ;;  %7755 = vrcp.f32 %v5640_v17 }
 0xcfd   : > { %v7744_v4 = vpop.eup %7743  ;;  %v5645_v19 = vadd.f32 1.0, %v7742_v29 }
 0xcfe   : > { %v5643_v60 = vadd.f32 1.0, %v7744_v4  ;;  %v6330_v4 = vld [vmem:[%s10535_s8] ss:$0 sm:$0xff] }
 0xcff   : > { %v7746_v37 = vpop.eup %7745 }
 0xd00   : > { %v5646_v21 = vadd.f32 1.0, %v7746_v37  ;;  %7757 = vrcp.f32 %v5643_v60 }
 0xd01   : > { %v7748_v15 = vpop.eup %7747 }
 0xd02   : > { %7759 = vrcp.f32 %v5646_v21  ;;  %v5644_v39 = vadd.f32 1.0, %v7748_v15 }
 0xd03   : > { %7761 = vrcp.f32 %v5645_v19 }
 0xd04   : > { %7763 = vrcp.f32 %v5644_v39 }
 0xd05   : > { %v7750_v54 = vpop.eup %7749 }
 0xd06   : > { %v5655_v55 = vmul.f32 %v7750_v54, %v10439_v14 }
 0xd07   : > { %v7752_v11 = vpop.eup %7751 }
 0xd08   : > { %v7754_v1 = vpop.eup %7753  ;;  %v5658_v31 = vmul.f32 %v7752_v11, %v10442_v27 }
 0xd09   : > { %v7756_v50 = vpop.eup %7755  ;;  %v5657_v8 = vmul.f32 %v7754_v1, %v10436_v24 }
 0xd0a   : > { %v5656_v56 = vmul.f32 %v7756_v50, %v5608_v57 }
 0xd0b   : > { %v5664_v3 = vpack.c.bf16 %v5658_v31, %v5657_v8 }
 0xd0c   : > { %v5663_v23 = vpack.c.bf16 %v5656_v56, %v5655_v55 }
 0xd0d   : > { %v7758_v49 = vpop.eup %7757 }
 0xd0e   : > { %7083 = vmatprep.mubr.msk.bf16.mxu1 %vm1486_vm8, %v5663_v23  ;;  %v5659_v59 = vmul.f32 %v7758_v49, %v5611_v52  ;;  %v10942_v52 = vld [vmem:[#allocation89_spill] sm:$0xff] }
 0xd0f   : > { %v7760_v35 = vpop.eup %7759  ;;  %7084 = vmatmul.mubr.msk.bf16.vlgmr.msra.gmra.mxu1 %vm1486_vm8, %v5664_v3 }
 0xd10   : > { %v7762_v32 = vpop.eup %7761  ;;  %v5662_v34 = vmul.f32 %v7760_v35, %v5614_v22 }
 0xd11   : > { %v7764_v47 = vpop.eup %7763  ;;  %v5661_v10 = vmul.f32 %v7762_v32, %v10445_v51 }
 0xd12   : > { %v5660_v44 = vmul.f32 %v7764_v47, %v5612_v33 }
 0xd13   : > { %v5666_v14 = vpack.c.bf16 %v5662_v34, %v5661_v10 }
 0xd14   : > { %v5665_v27 = vpack.c.bf16 %v5660_v44, %v5659_v59 }
 0xd16   : > { %7087 = vmatprep.mubr.msk.bf16.mxu1 %vm1486_vm8, %v5665_v27 }
 0xd17   : > { %7088 = vmatmul.mubr.msk.bf16.gmra.mxu1 %vm1486_vm8, %v5666_v14 }
 0xdcf   : > { %v7085_v24 = vpop.f32.mrf.mxu1 }
 0xdd0   : > { %v5744_v12 = vadd.f32 %v7085_v24, %v6324_v7 }
 0xdd1   : > { %v5735_v25 = vpop.f32.mrf.mxu1 }
 0xdd2   : > { %v5736_v42 = vadd.f32 %v6324_v7, %v5735_v25  ;;  %v5768_v20 = vadd.f32 %v5744_v12, %v10943_v38 }
 0xdd3   : > { %v7086_v6 = vpop.f32.mrf.mxu1 }
 0xdd4   : > { %v5747_v57 = vadd.f32 %v7086_v6, %v6324_v7  ;;  %v5766_v40 = vadd.f32 %v5736_v42, %v10941_v28 }
 0xdd5   : > { %v5738_v30 = vpop.f32.mrf.mxu1 }
 0xdd6   : > { %v5739_v53 = vadd.f32 %v6324_v7, %v5738_v30  ;;  %v5769_v13 = vadd.f32 %v5747_v57, %v10940_v36 }
 0xdd7   : > { %v7089_v51 = vpop.f32.mrf.mxu1 }
 0xdd8   : > { %v5767_v26 = vadd.f32 %v5739_v53, %v10942_v52  ;;  %v5775_v62 = vpack.c.bf16 %v5769_v13, %v5768_v20  ;;  %v5760_v33 = vadd.f32 %v7089_v51, %v6324_v7 }
 0xdd9   : > { %v5751_v61 = vpop.f32.mrf.mxu1 }
 0xdda   : > { %v5774_v22 = vpack.c.bf16 %v5767_v26, %v5766_v40  ;;  %v5752_v41 = vadd.f32 %v6324_v7, %v5751_v61  ;;  %v5772_v58 = vadd.f32 %v5760_v33, %v10947_v43 }
 0xddb   : > { %v7090_v45 = vpop.f32.mrf.mxu1 }
 0xddc   : > { %v5763_v46 = vadd.f32 %v7090_v45, %v6324_v7  ;;  %7093 = vmatprep.mubr.msk.bf16.mxu0 %vm1486_vm8, %v5774_v22  ;;  %v5770_v9 = vadd.f32 %v5752_v41, %v10945_v5 }
 0xddd   : > { %v5754_v48 = vpop.f32.mrf.mxu1  ;;  %7094 = vmatmul.mubr.msk.bf16.vlgmr.msra.gmra.mxu0 %vm1486_vm8, %v5775_v62 }
 0xdde   : > { %v5755_v2 = vadd.f32 %v6324_v7, %v5754_v48  ;;  %v5773_v0 = vadd.f32 %v5763_v46, %v10944_v18 }
 0xde0   : > { %v5771_v16 = vadd.f32 %v5755_v2, %v10946_v63  ;;  %v5777_v29 = vpack.c.bf16 %v5773_v0, %v5772_v58 }
 0xde2   : > { %v5776_v17 = vpack.c.bf16 %v5771_v16, %v5770_v9 }
 0xde4   : > { %7097 = vmatprep.mubr.msk.bf16.mxu0 %vm1486_vm8, %v5776_v17 }
 0xde5   : > { %7098 = vmatmul.mubr.msk.bf16.gmra.mxu0 %vm1486_vm8, %v5777_v29 }
 0xe9d   : > { %v7095_v60 = vpop.f32.mrf.mxu0 }
 0xe9e   : > { %v5844_v37 = vadd.f32 %v7095_v60, %v6330_v4 }
 0xe9f   : > { %v5835_v19 = vpop.f32.mrf.mxu0 }
 0xea0   : > { %5868 = vst [vmem:[%s368_s29 + $0x10] sm:$0xff] %v5844_v37  ;;  %v5836_v21 = vadd.f32 %v6330_v4, %v5835_v19 }
 0xea1   : > { %v7096_v15 = vpop.f32.mrf.mxu0 }
 0xea2   : > { %5866 = vst [vmem:[%s368_s29] sm:$0xff] %v5836_v21  ;;  %v5847_v39 = vadd.f32 %v7096_v15, %v6330_v4 }
 0xea3   : > { %v5838_v54 = vpop.f32.mrf.mxu0 }
 0xea4   : > { %5869 = vst [vmem:[%s368_s29 + $0x18] sm:$0xff] %v5847_v39  ;;  %v5839_v11 = vadd.f32 %v6330_v4, %v5838_v54 }
 0xea5   : > { %v7099_v1 = vpop.f32.mrf.mxu0 }
 0xea6   : > { %5867 = vst [vmem:[%s368_s29 + $0x8] sm:$0xff] %v5839_v11  ;;  %v5860_v50 = vadd.f32 %v7099_v1, %v6330_v4 }
 0xea7   : > { %v5851_v31 = vpop.f32.mrf.mxu0 }
 0xea8   : > { %5872 = vst [vmem:[%s368_s29 + $0x30] sm:$0xff] %v5860_v50  ;;  %v5852_v55 = vadd.f32 %v6330_v4, %v5851_v31 }
 0xea9   : > { %v7100_v56 = vpop.f32.mrf.mxu0 }
 0xeaa   : > { %5870 = vst [vmem:[%s368_s29 + $0x20] sm:$0xff] %v5852_v55  ;;  %v5863_v8 = vadd.f32 %v7100_v56, %v6330_v4 }
 0xeab   : > { %v5854_v23 = vpop.f32.mrf.mxu0 }
 0xeac   : > { %5873 = vst [vmem:[%s368_s29 + $0x38] sm:$0xff] %v5863_v8  ;;  %v5855_v3 = vadd.f32 %v6330_v4, %v5854_v23 }
 0xeae   : > { %5871 = vst [vmem:[%s368_s29 + $0x28] sm:$0xff] %v5855_v3 }
 0xeaf   : > { %7786 = shalt.err (!%p7783_p3)
}
 0xeb0   : > { %s7787_s24 = scalar_lea.hbm %s10481_s22, 1024  ;;  %s7791_s14 = scalar_lea.hbm %s10536_s9, 2048 }
 0xeb1   : > { %p7788_p4 = scmp.ne.s32.totalorder %s10481_s22, %s7787_s24  ;;  %p7792_p9 = scmp.lt.s32.totalorder %s10481_s22, %s10536_s9 }
 0xeb2   : > { %p7793_p10 = scmp.lt.s32.totalorder %s7791_s14, %s7787_s24 }
 0xeb3   : > { %p7789_p7 = pnand %p7788_p4, %p7932_p5 }
 0xeb4   : > { %p7794_p11 = por %p7793_p10, %p7792_p9 }
 0xeb5   : > { %p7790_p8 = pneg %p7789_p7 }
 0xeb7   : > { %p7795_p12 = pnand %p7794_p11, %p7790_p8 }
 0xeb9   : > { %7798 = shalt.err (!%p7795_p12)
}
 0xeba   : > { %s7842_s17 = smov 128   ;;  %s7843_s25 = smov 8  }
 0xebb   : > { %7118 = dma.vmem_to_hbm [thread:$0]  (%p7932_p5), %s10483_s16, 1024, %s10481_s22, %s10487_s13, %s7842_s17, %s7842_s17, %s7843_s25  }
 0xebc PF: > { %p7124_p13 = scmp.ge.s32.totalorder %s7833_s12, 2  ;;  %s5903_s26 = sand.u32 1, %s7821_s30  }
 0xebd   : > { %s5904_s27 = scalar_lea.sflag [#allocation3], %s5903_s26 }
 0xebe   : > { %p7121_p0 = pnand %p7124_p13, %p7936_p6 }
 0xec0   : > { %p7122_p1 = pneg %p7121_p0 }
 0xec2   : > { %7816 = dma.done.wait (%p7122_p1), %s5904_s27, 1024  }
 0xec3   : > { %7818 = vsyncadd (%p7122_p1), %s5904_s27, 4294966272  ;;  %p19_p2 = scmp.ge.s32.totalorder %s7919_s15, 4   ;;  %s10948_s30 = smov %s7825_s10 }
 0xec4   : > { %s10949_s10 = smov %s7829_s11  ;;  %s10950_s11 = smov %s7930_s18 }
 0xec5   : > { %s10951_s12 = smov %s7919_s15  ;;  %21 = sbr.rel (!%p19_p2) target bundleno = 3 (0x3), region = 101 }
 0xeca   :  { %5909 = vsyncpa [#allocation3], 1 }
 0xecb   :  { %5911 = vsyncpa [#allocation3 + $0x1], 1 }

</bundles_post_ra>
